<compile_context>
chip_gen: v7x
topology: tpu7x:2x2x1
jax: 0.10.0
libtpu: 0.0.40
codegen_flags: <defaults>
</compile_context>

<pallas_src>
import math
import jax
import jax.numpy as jnp
from jax.experimental import pallas as pl
from jax.experimental.pallas import tpu as pltpu

POSITIONAL_FEATURES = 5


# ------------------------------------------------------------------ kernel

def _make_fused_kernel(B, T, H, n_layers):
    H2, H3, H6 = 2 * H, 3 * H, 6 * H

    def kernel(*refs):
        y_scr = refs[-1]            # VMEM scratch (B, T, 2H): per-layer output
        out_ref = refs[-2]          # (B, T, 2H)
        x_ref, lw_ref, lb_ref = refs[0], refs[1], refs[2]
        layer_refs = refs[3:-2]     # 6 refs per GRU layer

        # ---- Linear(5 -> D) + ReLU: all B*T rows in one MXU matmul ----------
        x2 = x_ref[...].reshape(B * T, POSITIONAL_FEATURES)
        h_flat = jnp.maximum(
            jnp.dot(x2, lw_ref[...], preferred_element_type=jnp.float32)
            + lb_ref[...], 0.0)                                   # (B*T, D)

        for layer in range(n_layers):
            (wih_ref, bih_ref, whhf_ref, whhb_ref,
             bnf_ref, bnb_ref) = layer_refs[6 * layer:6 * layer + 6]

            if layer > 0:
                # previous layer's output (still resident in VMEM scratch)
                h_flat = y_scr[...].reshape(B * T, H2)

            # -- input projection for BOTH directions & ALL timesteps at once,
            #    with b_ih (+ b_hh for r/z) already folded into the bias row.
            gi = jnp.dot(h_flat, wih_ref[...],
                         preferred_element_type=jnp.float32) + bih_ref[...]
            gi = gi.reshape(B, T, H6)

            # Pre-slice per direction / gate (off the serial chain).
            gif_r = gi[:, :, 0:H]
            gif_z = gi[:, :, H:H2]
            gif_n = gi[:, :, H2:H3]
            gib_r = gi[:, :, H3:H3 + H]
            gib_z = gi[:, :, H3 + H:H3 + H2]
            gib_n = gi[:, :, H3 + H2:H6]

            whh_f = whhf_ref[...]                                 # (H, 3H)
            whh_b = whhb_ref[...]                                 # (H, 3H)
            bn_f = jnp.broadcast_to(bnf_ref[...], (B, H))         # hoisted
            bn_b = jnp.broadcast_to(bnb_ref[...], (B, H))         # hoisted

            h_f = jnp.zeros((B, H), jnp.float32)
            h_b = jnp.zeros((B, H), jnp.float32)

            # Fully unrolled time loop; fwd/bwd recurrences are independent and
            # interleaved so MXU / EUP / VPU work of the two chains overlaps.
            for s in range(T):
                tf = s
                tb = T - 1 - s

                gh_f = jnp.dot(h_f, whh_f, preferred_element_type=jnp.float32)
                gh_b = jnp.dot(h_b, whh_b, preferred_element_type=jnp.float32)

                r_f = jax.nn.sigmoid(gif_r[:, tf, :] + gh_f[:, 0:H])
                z_f = jax.nn.sigmoid(gif_z[:, tf, :] + gh_f[:, H:H2])
                n_f = jnp.tanh(gif_n[:, tf, :] + r_f * (gh_f[:, H2:H3] + bn_f))
                h_f = (1.0 - z_f) * n_f + z_f * h_f

                r_b = jax.nn.sigmoid(gib_r[:, tb, :] + gh_b[:, 0:H])
                z_b = jax.nn.sigmoid(gib_z[:, tb, :] + gh_b[:, H:H2])
                n_b = jnp.tanh(gib_n[:, tb, :] + r_b * (gh_b[:, H2:H3] + bn_b))
                h_b = (1.0 - z_b) * n_b + z_b * h_b

                y_scr[:, tf, 0:H] = h_f
                y_scr[:, tb, H:H2] = h_b

        # Single, full-array (lane-dense) store to the HBM-backed output.
        out_ref[...] = y_scr[...]

    return kernel


# --------------------------------------------------------------- param prep

def init_params(key, input_dim, hidden_size, n_layers):
    """PyTorch-layout parameters (same init ranges as nn.Linear / nn.GRU)."""
    params = {}
    k_lw, k_lb, key = jax.random.split(key, 3)
    bound = 1.0 / math.sqrt(POSITIONAL_FEATURES)
    params["lin_w"] = jax.random.uniform(
        k_lw, (input_dim, POSITIONAL_FEATURES), jnp.float32, -bound, bound)
    params["lin_b"] = jax.random.uniform(
        k_lb, (input_dim,), jnp.float32, -bound, bound)

    stdv = 1.0 / math.sqrt(hidden_size)
    gru_layers = []
    for layer in range(n_layers):
        in_size = input_dim if layer == 0 else 2 * hidden_size
        layer_p = {}
        for suffix in ("", "_rev"):
            ks = jax.random.split(key, 5)
            key = ks[4]
            layer_p["w_ih" + suffix] = jax.random.uniform(
                ks[0], (3 * hidden_size, in_size), jnp.float32, -stdv, stdv)
            layer_p["w_hh" + suffix] = jax.random.uniform(
                ks[1], (3 * hidden_size, hidden_size), jnp.float32, -stdv, stdv)
            layer_p["b_ih" + suffix] = jax.random.uniform(
                ks[2], (3 * hidden_size,), jnp.float32, -stdv, stdv)
            layer_p["b_hh" + suffix] = jax.random.uniform(
                ks[3], (3 * hidden_size,), jnp.float32, -stdv, stdv)
        gru_layers.append(layer_p)
    params["gru"] = gru_layers
    return params


def prepare_params(params, hidden_size):
    """One-time repack: transpose weights, fuse direction weights, fold biases."""
    H = hidden_size
    prep = {
        "hidden_size": H,
        "lin_w_t": jnp.asarray(params["lin_w"]).T,            # (5, D)
        "lin_b_row": jnp.asarray(params["lin_b"])[None, :],   # (1, D)
        "layers": [],
    }
    for p in params["gru"]:
        def pack(sfx):
            w_ih = p["w_ih" + sfx]          # (3H, D_in)  torch layout (r,z,n)
            w_hh = p["w_hh" + sfx]          # (3H, H)
            b_ih = p["b_ih" + sfx]
            b_hh = p["b_hh" + sfx]
            # fold b_ih (all gates) + b_hh (r,z gates) into the gi precompute;
            # b_hh_n must stay inside the r * (...) term so it is kept separate.
            b_fold = b_ih + jnp.concatenate(
                [b_hh[:2 * H], jnp.zeros((H,), jnp.float32)])
            return w_ih.T, w_hh.T, b_fold, b_hh[2 * H:]

        wih_f, whh_f, bf_f, bn_f = pack("")
        wih_b, whh_b, bf_b, bn_b = pack("_rev")
        prep["layers"].append({
            "w_ih_both_t": jnp.concatenate([wih_f, wih_b], axis=1),  # (D_in, 6H)
            "b_fold_row": jnp.concatenate([bf_f, bf_b])[None, :],    # (1, 6H)
            "w_hh_f_t": whh_f,                                       # (H, 3H)
            "w_hh_b_t": whh_b,                                       # (H, 3H)
            "b_hh_n_f_row": bn_f[None, :],                           # (1, H)
            "b_hh_n_b_row": bn_b[None, :],                           # (1, H)
        })
    return prep


# ----------------------------------------------------------------- forward

def gru_network_forward(prepared, pos_stat):
    B, T, _ = pos_stat.shape
    H = prepared["hidden_size"]
    layers = prepared["layers"]
    n_layers = len(layers)

    args = [pos_stat.astype(jnp.float32),
            prepared["lin_w_t"], prepared["lin_b_row"]]
    for lp in layers:
        args += [lp["w_ih_both_t"], lp["b_fold_row"], lp["w_hh_f_t"],
                 lp["w_hh_b_t"], lp["b_hh_n_f_row"], lp["b_hh_n_b_row"]]

    vmem = pl.BlockSpec(memory_space=pltpu.MemorySpace.VMEM)
    kernel = _make_fused_kernel(B, T, H, n_layers)
    # TODO(synk): if T/B/H are scaled up, tile over T with a BlockSpec grid and
    # carry h in scratch instead of whole-array VMEM residency (v7x VMEM = 64MiB).
    return pl.pallas_call(
        kernel,
        out_shape=jax.ShapeDtypeStruct((B, T, 2 * H), jnp.float32),
        in_specs=[vmem] * len(args),
        out_specs=vmem,
        scratch_shapes=[pltpu.VMEM((B, T, 2 * H), jnp.float32)],
    )(*args)


# ---------------------------------------------------------- pure-JAX reference

def _ref_gru_dir(x_tbd, w_ih, w_hh, b_ih, b_hh, reverse):
    H = w_hh.shape[1]
    B = x_tbd.shape[1]
    xs = x_tbd[::-1] if reverse else x_tbd

    def step(h, x_t):
        gi = x_t @ w_ih.T + b_ih
        gh = h @ w_hh.T + b_hh
        r = jax.nn.sigmoid(gi[:, :H] + gh[:, :H])
        z = jax.nn.sigmoid(gi[:, H:2 * H] + gh[:, H:2 * H])
        n = jnp.tanh(gi[:, 2 * H:] + r * gh[:, 2 * H:])
        h_new = (1.0 - z) * n + z * h
        return h_new, h_new

    _, ys = jax.lax.scan(step, jnp.zeros((B, H), jnp.float32), xs)
    return ys[::-1] if reverse else ys


def reference_forward(params, pos_stat, input_dim, hidden_size, n_layers):
    h = jnp.maximum(pos_stat @ params["lin_w"].T + params["lin_b"], 0.0)
    h = h.transpose(1, 0, 2)
    for layer in range(n_layers):
        p = params["gru"][layer]
        y_f = _ref_gru_dir(h, p["w_ih"], p["w_hh"], p["b_ih"], p["b_hh"], False)
        y_b = _ref_gru_dir(h, p["w_ih_rev"], p["w_hh_rev"], p["b_ih_rev"],
                           p["b_hh_rev"], True)
        h = jnp.concatenate([y_f, y_b], axis=-1)
    return h.transpose(1, 0, 2)


# ------------------------------------------------------------------------ main

if __name__ == "__main__":
    INPUT_DIM = 16
    HIDDEN = 32
    N_LAYERS = 2
    B, T = 2, 8

    key = jax.random.PRNGKey(0)
    k_params, k_x = jax.random.split(key)
    params = init_params(k_params, INPUT_DIM, HIDDEN, N_LAYERS)
    prepared = prepare_params(params, HIDDEN)
    pos_stat = jax.random.normal(k_x, (B, T, POSITIONAL_FEATURES), jnp.float32)

    out = gru_network_forward(prepared, pos_stat)
    out = jax.block_until_ready(out)

    assert out.shape == (B, T, 2 * HIDDEN), out.shape

    ref = jax.block_until_ready(
        reference_forward(params, pos_stat, INPUT_DIM, HIDDEN, N_LAYERS))
    assert jnp.allclose(out, ref, atol=1e-3, rtol=1e-3), float(
        jnp.max(jnp.abs(out - ref)))

    print("KERNEL_OK")
</pallas_src>

<mosaic_0001>
module attributes {stable_mosaic.version = 11 : i64} {
  func.func @kernel(%arg0: memref<2x8x5xf32, #tpu.memory_space<vmem>>, %arg1: memref<5x16xf32, #tpu.memory_space<vmem>>, %arg2: memref<1x16xf32, #tpu.memory_space<vmem>>, %arg3: memref<16x192xf32, #tpu.memory_space<vmem>>, %arg4: memref<1x192xf32, #tpu.memory_space<vmem>>, %arg5: memref<32x96xf32, #tpu.memory_space<vmem>>, %arg6: memref<32x96xf32, #tpu.memory_space<vmem>>, %arg7: memref<1x32xf32, #tpu.memory_space<vmem>>, %arg8: memref<1x32xf32, #tpu.memory_space<vmem>>, %arg9: memref<64x192xf32, #tpu.memory_space<vmem>>, %arg10: memref<1x192xf32, #tpu.memory_space<vmem>>, %arg11: memref<32x96xf32, #tpu.memory_space<vmem>>, %arg12: memref<32x96xf32, #tpu.memory_space<vmem>>, %arg13: memref<1x32xf32, #tpu.memory_space<vmem>>, %arg14: memref<1x32xf32, #tpu.memory_space<vmem>>, %arg15: memref<2x8x64xf32, #tpu.memory_space<vmem>>, %arg16: memref<2x8x64xf32, #tpu.memory_space<vmem>>) attributes {dimension_semantics = [], scalar_prefetch = 0 : i64, scratch_operands = 1 : i64, tpu.core_type = #tpu.core_type<tc>} {
    %c0 = arith.constant 0 : index
    %c0_0 = arith.constant 0 : index
    %c0_1 = arith.constant 0 : index
    %0 = vector.load %arg0[%c0, %c0_0, %c0_1] : memref<2x8x5xf32, #tpu.memory_space<vmem>>, vector<2x8x5xf32>
    %1 = vector.shape_cast %0 : vector<2x8x5xf32> to vector<16x5xf32>
    %c0_2 = arith.constant 0 : index
    %c0_3 = arith.constant 0 : index
    %2 = vector.load %arg1[%c0_2, %c0_3] : memref<5x16xf32, #tpu.memory_space<vmem>>, vector<5x16xf32>
    %cst = arith.constant dense<0.000000e+00> : vector<16x16xf32>
    %3 = tpu.matmul %1, %2, %cst {dimension_numbers = #tpu.dot_dimension_numbers<[1], [0], [0], [1], [0, 0, 1, 1], [], []>} : vector<16x5xf32>, vector<5x16xf32>, vector<16x16xf32> -> vector<16x16xf32>
    %c0_4 = arith.constant 0 : index
    %c0_5 = arith.constant 0 : index
    %4 = vector.load %arg2[%c0_4, %c0_5] : memref<1x16xf32, #tpu.memory_space<vmem>>, vector<1x16xf32>
    %5 = vector.broadcast %4 : vector<1x16xf32> to vector<16x16xf32>
    %6 = arith.addf %3, %5 : vector<16x16xf32>
    %cst_6 = arith.constant 0.000000e+00 : f32
    %7 = vector.broadcast %cst_6 : f32 to vector<16x16xf32>
    %8 = arith.maximumf %6, %7 : vector<16x16xf32>
    %c0_7 = arith.constant 0 : index
    %c0_8 = arith.constant 0 : index
    %9 = vector.load %arg3[%c0_7, %c0_8] : memref<16x192xf32, #tpu.memory_space<vmem>>, vector<16x192xf32>
    %cst_9 = arith.constant dense<0.000000e+00> : vector<16x192xf32>
    %10 = tpu.matmul %8, %9, %cst_9 {dimension_numbers = #tpu.dot_dimension_numbers<[1], [0], [0], [1], [0, 0, 1, 1], [], []>} : vector<16x16xf32>, vector<16x192xf32>, vector<16x192xf32> -> vector<16x192xf32>
    %c0_10 = arith.constant 0 : index
    %c0_11 = arith.constant 0 : index
    %11 = vector.load %arg4[%c0_10, %c0_11] : memref<1x192xf32, #tpu.memory_space<vmem>>, vector<1x192xf32>
    %12 = vector.broadcast %11 : vector<1x192xf32> to vector<16x192xf32>
    %13 = arith.addf %10, %12 : vector<16x192xf32>
    %14 = vector.shape_cast %13 : vector<16x192xf32> to vector<2x8x192xf32>
    %15 = vector.extract_strided_slice %14 {offsets = [0, 0, 0], sizes = [2, 8, 32], strides = [1, 1, 1]} : vector<2x8x192xf32> to vector<2x8x32xf32>
    %16 = vector.extract_strided_slice %14 {offsets = [0, 0, 32], sizes = [2, 8, 32], strides = [1, 1, 1]} : vector<2x8x192xf32> to vector<2x8x32xf32>
    %17 = vector.extract_strided_slice %14 {offsets = [0, 0, 64], sizes = [2, 8, 32], strides = [1, 1, 1]} : vector<2x8x192xf32> to vector<2x8x32xf32>
    %18 = vector.extract_strided_slice %14 {offsets = [0, 0, 96], sizes = [2, 8, 32], strides = [1, 1, 1]} : vector<2x8x192xf32> to vector<2x8x32xf32>
    %19 = vector.extract_strided_slice %14 {offsets = [0, 0, 128], sizes = [2, 8, 32], strides = [1, 1, 1]} : vector<2x8x192xf32> to vector<2x8x32xf32>
    %20 = vector.extract_strided_slice %14 {offsets = [0, 0, 160], sizes = [2, 8, 32], strides = [1, 1, 1]} : vector<2x8x192xf32> to vector<2x8x32xf32>
    %c0_12 = arith.constant 0 : index
    %c0_13 = arith.constant 0 : index
    %21 = vector.load %arg5[%c0_12, %c0_13] : memref<32x96xf32, #tpu.memory_space<vmem>>, vector<32x96xf32>
    %c0_14 = arith.constant 0 : index
    %c0_15 = arith.constant 0 : index
    %22 = vector.load %arg6[%c0_14, %c0_15] : memref<32x96xf32, #tpu.memory_space<vmem>>, vector<32x96xf32>
    %c0_16 = arith.constant 0 : index
    %c0_17 = arith.constant 0 : index
    %23 = vector.load %arg7[%c0_16, %c0_17] : memref<1x32xf32, #tpu.memory_space<vmem>>, vector<1x32xf32>
    %24 = vector.shape_cast %23 : vector<1x32xf32> to vector<1x32xf32>
    %25 = vector.broadcast %24 : vector<1x32xf32> to vector<2x32xf32>
    %c0_18 = arith.constant 0 : index
    %c0_19 = arith.constant 0 : index
    %26 = vector.load %arg8[%c0_18, %c0_19] : memref<1x32xf32, #tpu.memory_space<vmem>>, vector<1x32xf32>
    %27 = vector.shape_cast %26 : vector<1x32xf32> to vector<1x32xf32>
    %28 = vector.broadcast %27 : vector<1x32xf32> to vector<2x32xf32>
    %cst_20 = arith.constant 0.000000e+00 : f32
    %29 = vector.broadcast %cst_20 : f32 to vector<2x32xf32>
    %cst_21 = arith.constant 0.000000e+00 : f32
    %30 = vector.broadcast %cst_21 : f32 to vector<2x32xf32>
    %cst_22 = arith.constant dense<0.000000e+00> : vector<2x96xf32>
    %31 = tpu.matmul %29, %21, %cst_22 {dimension_numbers = #tpu.dot_dimension_numbers<[1], [0], [0], [1], [0, 0, 1, 1], [], []>} : vector<2x32xf32>, vector<32x96xf32>, vector<2x96xf32> -> vector<2x96xf32>
    %cst_23 = arith.constant dense<0.000000e+00> : vector<2x96xf32>
    %32 = tpu.matmul %30, %22, %cst_23 {dimension_numbers = #tpu.dot_dimension_numbers<[1], [0], [0], [1], [0, 0, 1, 1], [], []>} : vector<2x32xf32>, vector<32x96xf32>, vector<2x96xf32> -> vector<2x96xf32>
    %33 = vector.extract_strided_slice %15 {offsets = [0, 0, 0], sizes = [2, 1, 32], strides = [1, 1, 1]} : vector<2x8x32xf32> to vector<2x1x32xf32>
    %34 = vector.shape_cast %33 : vector<2x1x32xf32> to vector<2x32xf32>
    %35 = vector.extract_strided_slice %31 {offsets = [0, 0], sizes = [2, 32], strides = [1, 1]} : vector<2x96xf32> to vector<2x32xf32>
    %36 = arith.addf %34, %35 : vector<2x32xf32>
    %37 = arith.negf %36 : vector<2x32xf32>
    %38 = math.exp %37 : vector<2x32xf32>
    %cst_24 = arith.constant 1.000000e+00 : f32
    %39 = vector.broadcast %cst_24 : f32 to vector<2x32xf32>
    %40 = arith.addf %39, %38 : vector<2x32xf32>
    %41 = arith.divf %39, %40 : vector<2x32xf32>
    %42 = vector.extract_strided_slice %16 {offsets = [0, 0, 0], sizes = [2, 1, 32], strides = [1, 1, 1]} : vector<2x8x32xf32> to vector<2x1x32xf32>
    %43 = vector.shape_cast %42 : vector<2x1x32xf32> to vector<2x32xf32>
    %44 = vector.extract_strided_slice %31 {offsets = [0, 32], sizes = [2, 32], strides = [1, 1]} : vector<2x96xf32> to vector<2x32xf32>
    %45 = arith.addf %43, %44 : vector<2x32xf32>
    %46 = arith.negf %45 : vector<2x32xf32>
    %47 = math.exp %46 : vector<2x32xf32>
    %cst_25 = arith.constant 1.000000e+00 : f32
    %48 = vector.broadcast %cst_25 : f32 to vector<2x32xf32>
    %49 = arith.addf %48, %47 : vector<2x32xf32>
    %50 = arith.divf %48, %49 : vector<2x32xf32>
    %51 = vector.extract_strided_slice %17 {offsets = [0, 0, 0], sizes = [2, 1, 32], strides = [1, 1, 1]} : vector<2x8x32xf32> to vector<2x1x32xf32>
    %52 = vector.shape_cast %51 : vector<2x1x32xf32> to vector<2x32xf32>
    %53 = vector.extract_strided_slice %31 {offsets = [0, 64], sizes = [2, 32], strides = [1, 1]} : vector<2x96xf32> to vector<2x32xf32>
    %54 = arith.addf %53, %25 : vector<2x32xf32>
    %55 = arith.mulf %41, %54 : vector<2x32xf32>
    %56 = arith.addf %52, %55 : vector<2x32xf32>
    %57 = math.tanh %56 : vector<2x32xf32>
    %cst_26 = arith.constant 1.000000e+00 : f32
    %58 = vector.broadcast %cst_26 : f32 to vector<2x32xf32>
    %59 = arith.subf %58, %50 : vector<2x32xf32>
    %60 = arith.mulf %59, %57 : vector<2x32xf32>
    %61 = arith.mulf %50, %29 : vector<2x32xf32>
    %62 = arith.addf %60, %61 : vector<2x32xf32>
    %63 = vector.extract_strided_slice %18 {offsets = [0, 7, 0], sizes = [2, 1, 32], strides = [1, 1, 1]} : vector<2x8x32xf32> to vector<2x1x32xf32>
    %64 = vector.shape_cast %63 : vector<2x1x32xf32> to vector<2x32xf32>
    %65 = vector.extract_strided_slice %32 {offsets = [0, 0], sizes = [2, 32], strides = [1, 1]} : vector<2x96xf32> to vector<2x32xf32>
    %66 = arith.addf %64, %65 : vector<2x32xf32>
    %67 = arith.negf %66 : vector<2x32xf32>
    %68 = math.exp %67 : vector<2x32xf32>
    %cst_27 = arith.constant 1.000000e+00 : f32
    %69 = vector.broadcast %cst_27 : f32 to vector<2x32xf32>
    %70 = arith.addf %69, %68 : vector<2x32xf32>
    %71 = arith.divf %69, %70 : vector<2x32xf32>
    %72 = vector.extract_strided_slice %19 {offsets = [0, 7, 0], sizes = [2, 1, 32], strides = [1, 1, 1]} : vector<2x8x32xf32> to vector<2x1x32xf32>
    %73 = vector.shape_cast %72 : vector<2x1x32xf32> to vector<2x32xf32>
    %74 = vector.extract_strided_slice %32 {offsets = [0, 32], sizes = [2, 32], strides = [1, 1]} : vector<2x96xf32> to vector<2x32xf32>
    %75 = arith.addf %73, %74 : vector<2x32xf32>
    %76 = arith.negf %75 : vector<2x32xf32>
    %77 = math.exp %76 : vector<2x32xf32>
    %cst_28 = arith.constant 1.000000e+00 : f32
    %78 = vector.broadcast %cst_28 : f32 to vector<2x32xf32>
    %79 = arith.addf %78, %77 : vector<2x32xf32>
    %80 = arith.divf %78, %79 : vector<2x32xf32>
    %81 = vector.extract_strided_slice %20 {offsets = [0, 7, 0], sizes = [2, 1, 32], strides = [1, 1, 1]} : vector<2x8x32xf32> to vector<2x1x32xf32>
    %82 = vector.shape_cast %81 : vector<2x1x32xf32> to vector<2x32xf32>
    %83 = vector.extract_strided_slice %32 {offsets = [0, 64], sizes = [2, 32], strides = [1, 1]} : vector<2x96xf32> to vector<2x32xf32>
    %84 = arith.addf %83, %28 : vector<2x32xf32>
    %85 = arith.mulf %71, %84 : vector<2x32xf32>
    %86 = arith.addf %82, %85 : vector<2x32xf32>
    %87 = math.tanh %86 : vector<2x32xf32>
    %cst_29 = arith.constant 1.000000e+00 : f32
    %88 = vector.broadcast %cst_29 : f32 to vector<2x32xf32>
    %89 = arith.subf %88, %80 : vector<2x32xf32>
    %90 = arith.mulf %89, %87 : vector<2x32xf32>
    %91 = arith.mulf %80, %30 : vector<2x32xf32>
    %92 = arith.addf %90, %91 : vector<2x32xf32>
    %c0_30 = arith.constant 0 : index
    %c0_31 = arith.constant 0 : index
    %c0_32 = arith.constant 0 : index
    %93 = vector.load %arg16[%c0_30, %c0_31, %c0_32] : memref<2x8x64xf32, #tpu.memory_space<vmem>>, vector<2x1x32xf32>
    %94 = vector.shape_cast %93 : vector<2x1x32xf32> to vector<2x32xf32>
    %95 = vector.shape_cast %62 : vector<2x32xf32> to vector<2x1x32xf32>
    tpu.vector_store %arg16[%c0_30, %c0_31, %c0_32], %95 {strides = array<i32>} : memref<2x8x64xf32, #tpu.memory_space<vmem>>, vector<2x1x32xf32>,
    %c0_33 = arith.constant 0 : index
    %c7 = arith.constant 7 : index
    %c32 = arith.constant 32 : index
    %96 = vector.load %arg16[%c0_33, %c7, %c32] : memref<2x8x64xf32, #tpu.memory_space<vmem>>, vector<2x1x32xf32>
    %97 = vector.shape_cast %96 : vector<2x1x32xf32> to vector<2x32xf32>
    %98 = vector.shape_cast %92 : vector<2x32xf32> to vector<2x1x32xf32>
    tpu.vector_store %arg16[%c0_33, %c7, %c32], %98 {strides = array<i32>} : memref<2x8x64xf32, #tpu.memory_space<vmem>>, vector<2x1x32xf32>,
    %cst_34 = arith.constant dense<0.000000e+00> : vector<2x96xf32>
    %99 = tpu.matmul %62, %21, %cst_34 {dimension_numbers = #tpu.dot_dimension_numbers<[1], [0], [0], [1], [0, 0, 1, 1], [], []>} : vector<2x32xf32>, vector<32x96xf32>, vector<2x96xf32> -> vector<2x96xf32>
    %cst_35 = arith.constant dense<0.000000e+00> : vector<2x96xf32>
    %100 = tpu.matmul %92, %22, %cst_35 {dimension_numbers = #tpu.dot_dimension_numbers<[1], [0], [0], [1], [0, 0, 1, 1], [], []>} : vector<2x32xf32>, vector<32x96xf32>, vector<2x96xf32> -> vector<2x96xf32>
    %101 = vector.extract_strided_slice %15 {offsets = [0, 1, 0], sizes = [2, 1, 32], strides = [1, 1, 1]} : vector<2x8x32xf32> to vector<2x1x32xf32>
    %102 = vector.shape_cast %101 : vector<2x1x32xf32> to vector<2x32xf32>
    %103 = vector.extract_strided_slice %99 {offsets = [0, 0], sizes = [2, 32], strides = [1, 1]} : vector<2x96xf32> to vector<2x32xf32>
    %104 = arith.addf %102, %103 : vector<2x32xf32>
    %105 = arith.negf %104 : vector<2x32xf32>
    %106 = math.exp %105 : vector<2x32xf32>
    %cst_36 = arith.constant 1.000000e+00 : f32
    %107 = vector.broadcast %cst_36 : f32 to vector<2x32xf32>
    %108 = arith.addf %107, %106 : vector<2x32xf32>
    %109 = arith.divf %107, %108 : vector<2x32xf32>
    %110 = vector.extract_strided_slice %16 {offsets = [0, 1, 0], sizes = [2, 1, 32], strides = [1, 1, 1]} : vector<2x8x32xf32> to vector<2x1x32xf32>
    %111 = vector.shape_cast %110 : vector<2x1x32xf32> to vector<2x32xf32>
    %112 = vector.extract_strided_slice %99 {offsets = [0, 32], sizes = [2, 32], strides = [1, 1]} : vector<2x96xf32> to vector<2x32xf32>
    %113 = arith.addf %111, %112 : vector<2x32xf32>
    %114 = arith.negf %113 : vector<2x32xf32>
    %115 = math.exp %114 : vector<2x32xf32>
    %cst_37 = arith.constant 1.000000e+00 : f32
    %116 = vector.broadcast %cst_37 : f32 to vector<2x32xf32>
    %117 = arith.addf %116, %115 : vector<2x32xf32>
    %118 = arith.divf %116, %117 : vector<2x32xf32>
    %119 = vector.extract_strided_slice %17 {offsets = [0, 1, 0], sizes = [2, 1, 32], strides = [1, 1, 1]} : vector<2x8x32xf32> to vector<2x1x32xf32>
    %120 = vector.shape_cast %119 : vector<2x1x32xf32> to vector<2x32xf32>
    %121 = vector.extract_strided_slice %99 {offsets = [0, 64], sizes = [2, 32], strides = [1, 1]} : vector<2x96xf32> to vector<2x32xf32>
    %122 = arith.addf %121, %25 : vector<2x32xf32>
    %123 = arith.mulf %109, %122 : vector<2x32xf32>
    %124 = arith.addf %120, %123 : vector<2x32xf32>
    %125 = math.tanh %124 : vector<2x32xf32>
    %cst_38 = arith.constant 1.000000e+00 : f32
    %126 = vector.broadcast %cst_38 : f32 to vector<2x32xf32>
    %127 = arith.subf %126, %118 : vector<2x32xf32>
    %128 = arith.mulf %127, %125 : vector<2x32xf32>
    %129 = arith.mulf %118, %62 : vector<2x32xf32>
    %130 = arith.addf %128, %129 : vector<2x32xf32>
    %131 = vector.extract_strided_slice %18 {offsets = [0, 6, 0], sizes = [2, 1, 32], strides = [1, 1, 1]} : vector<2x8x32xf32> to vector<2x1x32xf32>
    %132 = vector.shape_cast %131 : vector<2x1x32xf32> to vector<2x32xf32>
    %133 = vector.extract_strided_slice %100 {offsets = [0, 0], sizes = [2, 32], strides = [1, 1]} : vector<2x96xf32> to vector<2x32xf32>
    %134 = arith.addf %132, %133 : vector<2x32xf32>
    %135 = arith.negf %134 : vector<2x32xf32>
    %136 = math.exp %135 : vector<2x32xf32>
    %cst_39 = arith.constant 1.000000e+00 : f32
    %137 = vector.broadcast %cst_39 : f32 to vector<2x32xf32>
    %138 = arith.addf %137, %136 : vector<2x32xf32>
    %139 = arith.divf %137, %138 : vector<2x32xf32>
    %140 = vector.extract_strided_slice %19 {offsets = [0, 6, 0], sizes = [2, 1, 32], strides = [1, 1, 1]} : vector<2x8x32xf32> to vector<2x1x32xf32>
    %141 = vector.shape_cast %140 : vector<2x1x32xf32> to vector<2x32xf32>
    %142 = vector.extract_strided_slice %100 {offsets = [0, 32], sizes = [2, 32], strides = [1, 1]} : vector<2x96xf32> to vector<2x32xf32>
    %143 = arith.addf %141, %142 : vector<2x32xf32>
    %144 = arith.negf %143 : vector<2x32xf32>
    %145 = math.exp %144 : vector<2x32xf32>
    %cst_40 = arith.constant 1.000000e+00 : f32
    %146 = vector.broadcast %cst_40 : f32 to vector<2x32xf32>
    %147 = arith.addf %146, %145 : vector<2x32xf32>
    %148 = arith.divf %146, %147 : vector<2x32xf32>
    %149 = vector.extract_strided_slice %20 {offsets = [0, 6, 0], sizes = [2, 1, 32], strides = [1, 1, 1]} : vector<2x8x32xf32> to vector<2x1x32xf32>
    %150 = vector.shape_cast %149 : vector<2x1x32xf32> to vector<2x32xf32>
    %151 = vector.extract_strided_slice %100 {offsets = [0, 64], sizes = [2, 32], strides = [1, 1]} : vector<2x96xf32> to vector<2x32xf32>
    %152 = arith.addf %151, %28 : vector<2x32xf32>
    %153 = arith.mulf %139, %152 : vector<2x32xf32>
    %154 = arith.addf %150, %153 : vector<2x32xf32>
    %155 = math.tanh %154 : vector<2x32xf32>
    %cst_41 = arith.constant 1.000000e+00 : f32
    %156 = vector.broadcast %cst_41 : f32 to vector<2x32xf32>
    %157 = arith.subf %156, %148 : vector<2x32xf32>
    %158 = arith.mulf %157, %155 : vector<2x32xf32>
    %159 = arith.mulf %148, %92 : vector<2x32xf32>
    %160 = arith.addf %158, %159 : vector<2x32xf32>
    %c0_42 = arith.constant 0 : index
    %c1 = arith.constant 1 : index
    %c0_43 = arith.constant 0 : index
    %161 = vector.load %arg16[%c0_42, %c1, %c0_43] : memref<2x8x64xf32, #tpu.memory_space<vmem>>, vector<2x1x32xf32>
    %162 = vector.shape_cast %161 : vector<2x1x32xf32> to vector<2x32xf32>
    %163 = vector.shape_cast %130 : vector<2x32xf32> to vector<2x1x32xf32>
    tpu.vector_store %arg16[%c0_42, %c1, %c0_43], %163 {strides = array<i32>} : memref<2x8x64xf32, #tpu.memory_space<vmem>>, vector<2x1x32xf32>,
    %c0_44 = arith.constant 0 : index
    %c6 = arith.constant 6 : index
    %c32_45 = arith.constant 32 : index
    %164 = vector.load %arg16[%c0_44, %c6, %c32_45] : memref<2x8x64xf32, #tpu.memory_space<vmem>>, vector<2x1x32xf32>
    %165 = vector.shape_cast %164 : vector<2x1x32xf32> to vector<2x32xf32>
    %166 = vector.shape_cast %160 : vector<2x32xf32> to vector<2x1x32xf32>
    tpu.vector_store %arg16[%c0_44, %c6, %c32_45], %166 {strides = array<i32>} : memref<2x8x64xf32, #tpu.memory_space<vmem>>, vector<2x1x32xf32>,
    %cst_46 = arith.constant dense<0.000000e+00> : vector<2x96xf32>
    %167 = tpu.matmul %130, %21, %cst_46 {dimension_numbers = #tpu.dot_dimension_numbers<[1], [0], [0], [1], [0, 0, 1, 1], [], []>} : vector<2x32xf32>, vector<32x96xf32>, vector<2x96xf32> -> vector<2x96xf32>
    %cst_47 = arith.constant dense<0.000000e+00> : vector<2x96xf32>
    %168 = tpu.matmul %160, %22, %cst_47 {dimension_numbers = #tpu.dot_dimension_numbers<[1], [0], [0], [1], [0, 0, 1, 1], [], []>} : vector<2x32xf32>, vector<32x96xf32>, vector<2x96xf32> -> vector<2x96xf32>
    %169 = vector.extract_strided_slice %15 {offsets = [0, 2, 0], sizes = [2, 1, 32], strides = [1, 1, 1]} : vector<2x8x32xf32> to vector<2x1x32xf32>
    %170 = vector.shape_cast %169 : vector<2x1x32xf32> to vector<2x32xf32>
    %171 = vector.extract_strided_slice %167 {offsets = [0, 0], sizes = [2, 32], strides = [1, 1]} : vector<2x96xf32> to vector<2x32xf32>
    %172 = arith.addf %170, %171 : vector<2x32xf32>
    %173 = arith.negf %172 : vector<2x32xf32>
    %174 = math.exp %173 : vector<2x32xf32>
    %cst_48 = arith.constant 1.000000e+00 : f32
    %175 = vector.broadcast %cst_48 : f32 to vector<2x32xf32>
    %176 = arith.addf %175, %174 : vector<2x32xf32>
    %177 = arith.divf %175, %176 : vector<2x32xf32>
    %178 = vector.extract_strided_slice %16 {offsets = [0, 2, 0], sizes = [2, 1, 32], strides = [1, 1, 1]} : vector<2x8x32xf32> to vector<2x1x32xf32>
    %179 = vector.shape_cast %178 : vector<2x1x32xf32> to vector<2x32xf32>
    %180 = vector.extract_strided_slice %167 {offsets = [0, 32], sizes = [2, 32], strides = [1, 1]} : vector<2x96xf32> to vector<2x32xf32>
    %181 = arith.addf %179, %180 : vector<2x32xf32>
    %182 = arith.negf %181 : vector<2x32xf32>
    %183 = math.exp %182 : vector<2x32xf32>
    %cst_49 = arith.constant 1.000000e+00 : f32
    %184 = vector.broadcast %cst_49 : f32 to vector<2x32xf32>
    %185 = arith.addf %184, %183 : vector<2x32xf32>
    %186 = arith.divf %184, %185 : vector<2x32xf32>
    %187 = vector.extract_strided_slice %17 {offsets = [0, 2, 0], sizes = [2, 1, 32], strides = [1, 1, 1]} : vector<2x8x32xf32> to vector<2x1x32xf32>
    %188 = vector.shape_cast %187 : vector<2x1x32xf32> to vector<2x32xf32>
    %189 = vector.extract_strided_slice %167 {offsets = [0, 64], sizes = [2, 32], strides = [1, 1]} : vector<2x96xf32> to vector<2x32xf32>
    %190 = arith.addf %189, %25 : vector<2x32xf32>
    %191 = arith.mulf %177, %190 : vector<2x32xf32>
    %192 = arith.addf %188, %191 : vector<2x32xf32>
    %193 = math.tanh %192 : vector<2x32xf32>
    %cst_50 = arith.constant 1.000000e+00 : f32
    %194 = vector.broadcast %cst_50 : f32 to vector<2x32xf32>
    %195 = arith.subf %194, %186 : vector<2x32xf32>
    %196 = arith.mulf %195, %193 : vector<2x32xf32>
    %197 = arith.mulf %186, %130 : vector<2x32xf32>
    %198 = arith.addf %196, %197 : vector<2x32xf32>
    %199 = vector.extract_strided_slice %18 {offsets = [0, 5, 0], sizes = [2, 1, 32], strides = [1, 1, 1]} : vector<2x8x32xf32> to vector<2x1x32xf32>
    %200 = vector.shape_cast %199 : vector<2x1x32xf32> to vector<2x32xf32>
    %201 = vector.extract_strided_slice %168 {offsets = [0, 0], sizes = [2, 32], strides = [1, 1]} : vector<2x96xf32> to vector<2x32xf32>
    %202 = arith.addf %200, %201 : vector<2x32xf32>
    %203 = arith.negf %202 : vector<2x32xf32>
    %204 = math.exp %203 : vector<2x32xf32>
    %cst_51 = arith.constant 1.000000e+00 : f32
    %205 = vector.broadcast %cst_51 : f32 to vector<2x32xf32>
    %206 = arith.addf %205, %204 : vector<2x32xf32>
    %207 = arith.divf %205, %206 : vector<2x32xf32>
    %208 = vector.extract_strided_slice %19 {offsets = [0, 5, 0], sizes = [2, 1, 32], strides = [1, 1, 1]} : vector<2x8x32xf32> to vector<2x1x32xf32>
    %209 = vector.shape_cast %208 : vector<2x1x32xf32> to vector<2x32xf32>
    %210 = vector.extract_strided_slice %168 {offsets = [0, 32], sizes = [2, 32], strides = [1, 1]} : vector<2x96xf32> to vector<2x32xf32>
    %211 = arith.addf %209, %210 : vector<2x32xf32>
    %212 = arith.negf %211 : vector<2x32xf32>
    %213 = math.exp %212 : vector<2x32xf32>
    %cst_52 = arith.constant 1.000000e+00 : f32
    %214 = vector.broadcast %cst_52 : f32 to vector<2x32xf32>
    %215 = arith.addf %214, %213 : vector<2x32xf32>
    %216 = arith.divf %214, %215 : vector<2x32xf32>
    %217 = vector.extract_strided_slice %20 {offsets = [0, 5, 0], sizes = [2, 1, 32], strides = [1, 1, 1]} : vector<2x8x32xf32> to vector<2x1x32xf32>
    %218 = vector.shape_cast %217 : vector<2x1x32xf32> to vector<2x32xf32>
    %219 = vector.extract_strided_slice %168 {offsets = [0, 64], sizes = [2, 32], strides = [1, 1]} : vector<2x96xf32> to vector<2x32xf32>
    %220 = arith.addf %219, %28 : vector<2x32xf32>
    %221 = arith.mulf %207, %220 : vector<2x32xf32>
    %222 = arith.addf %218, %221 : vector<2x32xf32>
    %223 = math.tanh %222 : vector<2x32xf32>
    %cst_53 = arith.constant 1.000000e+00 : f32
    %224 = vector.broadcast %cst_53 : f32 to vector<2x32xf32>
    %225 = arith.subf %224, %216 : vector<2x32xf32>
    %226 = arith.mulf %225, %223 : vector<2x32xf32>
    %227 = arith.mulf %216, %160 : vector<2x32xf32>
    %228 = arith.addf %226, %227 : vector<2x32xf32>
    %c0_54 = arith.constant 0 : index
    %c2 = arith.constant 2 : index
    %c0_55 = arith.constant 0 : index
    %229 = vector.load %arg16[%c0_54, %c2, %c0_55] : memref<2x8x64xf32, #tpu.memory_space<vmem>>, vector<2x1x32xf32>
    %230 = vector.shape_cast %229 : vector<2x1x32xf32> to vector<2x32xf32>
    %231 = vector.shape_cast %198 : vector<2x32xf32> to vector<2x1x32xf32>
    tpu.vector_store %arg16[%c0_54, %c2, %c0_55], %231 {strides = array<i32>} : memref<2x8x64xf32, #tpu.memory_space<vmem>>, vector<2x1x32xf32>,
    %c0_56 = arith.constant 0 : index
    %c5 = arith.constant 5 : index
    %c32_57 = arith.constant 32 : index
    %232 = vector.load %arg16[%c0_56, %c5, %c32_57] : memref<2x8x64xf32, #tpu.memory_space<vmem>>, vector<2x1x32xf32>
    %233 = vector.shape_cast %232 : vector<2x1x32xf32> to vector<2x32xf32>
    %234 = vector.shape_cast %228 : vector<2x32xf32> to vector<2x1x32xf32>
    tpu.vector_store %arg16[%c0_56, %c5, %c32_57], %234 {strides = array<i32>} : memref<2x8x64xf32, #tpu.memory_space<vmem>>, vector<2x1x32xf32>,
    %cst_58 = arith.constant dense<0.000000e+00> : vector<2x96xf32>
    %235 = tpu.matmul %198, %21, %cst_58 {dimension_numbers = #tpu.dot_dimension_numbers<[1], [0], [0], [1], [0, 0, 1, 1], [], []>} : vector<2x32xf32>, vector<32x96xf32>, vector<2x96xf32> -> vector<2x96xf32>
    %cst_59 = arith.constant dense<0.000000e+00> : vector<2x96xf32>
    %236 = tpu.matmul %228, %22, %cst_59 {dimension_numbers = #tpu.dot_dimension_numbers<[1], [0], [0], [1], [0, 0, 1, 1], [], []>} : vector<2x32xf32>, vector<32x96xf32>, vector<2x96xf32> -> vector<2x96xf32>
    %237 = vector.extract_strided_slice %15 {offsets = [0, 3, 0], sizes = [2, 1, 32], strides = [1, 1, 1]} : vector<2x8x32xf32> to vector<2x1x32xf32>
    %238 = vector.shape_cast %237 : vector<2x1x32xf32> to vector<2x32xf32>
    %239 = vector.extract_strided_slice %235 {offsets = [0, 0], sizes = [2, 32], strides = [1, 1]} : vector<2x96xf32> to vector<2x32xf32>
    %240 = arith.addf %238, %239 : vector<2x32xf32>
    %241 = arith.negf %240 : vector<2x32xf32>
    %242 = math.exp %241 : vector<2x32xf32>
    %cst_60 = arith.constant 1.000000e+00 : f32
    %243 = vector.broadcast %cst_60 : f32 to vector<2x32xf32>
    %244 = arith.addf %243, %242 : vector<2x32xf32>
    %245 = arith.divf %243, %244 : vector<2x32xf32>
    %246 = vector.extract_strided_slice %16 {offsets = [0, 3, 0], sizes = [2, 1, 32], strides = [1, 1, 1]} : vector<2x8x32xf32> to vector<2x1x32xf32>
    %247 = vector.shape_cast %246 : vector<2x1x32xf32> to vector<2x32xf32>
    %248 = vector.extract_strided_slice %235 {offsets = [0, 32], sizes = [2, 32], strides = [1, 1]} : vector<2x96xf32> to vector<2x32xf32>
    %249 = arith.addf %247, %248 : vector<2x32xf32>
    %250 = arith.negf %249 : vector<2x32xf32>
    %251 = math.exp %250 : vector<2x32xf32>
    %cst_61 = arith.constant 1.000000e+00 : f32
    %252 = vector.broadcast %cst_61 : f32 to vector<2x32xf32>
    %253 = arith.addf %252, %251 : vector<2x32xf32>
    %254 = arith.divf %252, %253 : vector<2x32xf32>
    %255 = vector.extract_strided_slice %17 {offsets = [0, 3, 0], sizes = [2, 1, 32], strides = [1, 1, 1]} : vector<2x8x32xf32> to vector<2x1x32xf32>
    %256 = vector.shape_cast %255 : vector<2x1x32xf32> to vector<2x32xf32>
    %257 = vector.extract_strided_slice %235 {offsets = [0, 64], sizes = [2, 32], strides = [1, 1]} : vector<2x96xf32> to vector<2x32xf32>
    %258 = arith.addf %257, %25 : vector<2x32xf32>
    %259 = arith.mulf %245, %258 : vector<2x32xf32>
    %260 = arith.addf %256, %259 : vector<2x32xf32>
    %261 = math.tanh %260 : vector<2x32xf32>
    %cst_62 = arith.constant 1.000000e+00 : f32
    %262 = vector.broadcast %cst_62 : f32 to vector<2x32xf32>
    %263 = arith.subf %262, %254 : vector<2x32xf32>
    %264 = arith.mulf %263, %261 : vector<2x32xf32>
    %265 = arith.mulf %254, %198 : vector<2x32xf32>
    %266 = arith.addf %264, %265 : vector<2x32xf32>
    %267 = vector.extract_strided_slice %18 {offsets = [0, 4, 0], sizes = [2, 1, 32], strides = [1, 1, 1]} : vector<2x8x32xf32> to vector<2x1x32xf32>
    %268 = vector.shape_cast %267 : vector<2x1x32xf32> to vector<2x32xf32>
    %269 = vector.extract_strided_slice %236 {offsets = [0, 0], sizes = [2, 32], strides = [1, 1]} : vector<2x96xf32> to vector<2x32xf32>
    %270 = arith.addf %268, %269 : vector<2x32xf32>
    %271 = arith.negf %270 : vector<2x32xf32>
    %272 = math.exp %271 : vector<2x32xf32>
    %cst_63 = arith.constant 1.000000e+00 : f32
    %273 = vector.broadcast %cst_63 : f32 to vector<2x32xf32>
    %274 = arith.addf %273, %272 : vector<2x32xf32>
    %275 = arith.divf %273, %274 : vector<2x32xf32>
    %276 = vector.extract_strided_slice %19 {offsets = [0, 4, 0], sizes = [2, 1, 32], strides = [1, 1, 1]} : vector<2x8x32xf32> to vector<2x1x32xf32>
    %277 = vector.shape_cast %276 : vector<2x1x32xf32> to vector<2x32xf32>
    %278 = vector.extract_strided_slice %236 {offsets = [0, 32], sizes = [2, 32], strides = [1, 1]} : vector<2x96xf32> to vector<2x32xf32>
    %279 = arith.addf %277, %278 : vector<2x32xf32>
    %280 = arith.negf %279 : vector<2x32xf32>
    %281 = math.exp %280 : vector<2x32xf32>
    %cst_64 = arith.constant 1.000000e+00 : f32
    %282 = vector.broadcast %cst_64 : f32 to vector<2x32xf32>
    %283 = arith.addf %282, %281 : vector<2x32xf32>
    %284 = arith.divf %282, %283 : vector<2x32xf32>
    %285 = vector.extract_strided_slice %20 {offsets = [0, 4, 0], sizes = [2, 1, 32], strides = [1, 1, 1]} : vector<2x8x32xf32> to vector<2x1x32xf32>
    %286 = vector.shape_cast %285 : vector<2x1x32xf32> to vector<2x32xf32>
    %287 = vector.extract_strided_slice %236 {offsets = [0, 64], sizes = [2, 32], strides = [1, 1]} : vector<2x96xf32> to vector<2x32xf32>
    %288 = arith.addf %287, %28 : vector<2x32xf32>
    %289 = arith.mulf %275, %288 : vector<2x32xf32>
    %290 = arith.addf %286, %289 : vector<2x32xf32>
    %291 = math.tanh %290 : vector<2x32xf32>
    %cst_65 = arith.constant 1.000000e+00 : f32
    %292 = vector.broadcast %cst_65 : f32 to vector<2x32xf32>
    %293 = arith.subf %292, %284 : vector<2x32xf32>
    %294 = arith.mulf %293, %291 : vector<2x32xf32>
    %295 = arith.mulf %284, %228 : vector<2x32xf32>
    %296 = arith.addf %294, %295 : vector<2x32xf32>
    %c0_66 = arith.constant 0 : index
    %c3 = arith.constant 3 : index
    %c0_67 = arith.constant 0 : index
    %297 = vector.load %arg16[%c0_66, %c3, %c0_67] : memref<2x8x64xf32, #tpu.memory_space<vmem>>, vector<2x1x32xf32>
    %298 = vector.shape_cast %297 : vector<2x1x32xf32> to vector<2x32xf32>
    %299 = vector.shape_cast %266 : vector<2x32xf32> to vector<2x1x32xf32>
    tpu.vector_store %arg16[%c0_66, %c3, %c0_67], %299 {strides = array<i32>} : memref<2x8x64xf32, #tpu.memory_space<vmem>>, vector<2x1x32xf32>,
    %c0_68 = arith.constant 0 : index
    %c4 = arith.constant 4 : index
    %c32_69 = arith.constant 32 : index
    %300 = vector.load %arg16[%c0_68, %c4, %c32_69] : memref<2x8x64xf32, #tpu.memory_space<vmem>>, vector<2x1x32xf32>
    %301 = vector.shape_cast %300 : vector<2x1x32xf32> to vector<2x32xf32>
    %302 = vector.shape_cast %296 : vector<2x32xf32> to vector<2x1x32xf32>
    tpu.vector_store %arg16[%c0_68, %c4, %c32_69], %302 {strides = array<i32>} : memref<2x8x64xf32, #tpu.memory_space<vmem>>, vector<2x1x32xf32>,
    %cst_70 = arith.constant dense<0.000000e+00> : vector<2x96xf32>
    %303 = tpu.matmul %266, %21, %cst_70 {dimension_numbers = #tpu.dot_dimension_numbers<[1], [0], [0], [1], [0, 0, 1, 1], [], []>} : vector<2x32xf32>, vector<32x96xf32>, vector<2x96xf32> -> vector<2x96xf32>
    %cst_71 = arith.constant dense<0.000000e+00> : vector<2x96xf32>
    %304 = tpu.matmul %296, %22, %cst_71 {dimension_numbers = #tpu.dot_dimension_numbers<[1], [0], [0], [1], [0, 0, 1, 1], [], []>} : vector<2x32xf32>, vector<32x96xf32>, vector<2x96xf32> -> vector<2x96xf32>
    %305 = vector.extract_strided_slice %15 {offsets = [0, 4, 0], sizes = [2, 1, 32], strides = [1, 1, 1]} : vector<2x8x32xf32> to vector<2x1x32xf32>
    %306 = vector.shape_cast %305 : vector<2x1x32xf32> to vector<2x32xf32>
    %307 = vector.extract_strided_slice %303 {offsets = [0, 0], sizes = [2, 32], strides = [1, 1]} : vector<2x96xf32> to vector<2x32xf32>
    %308 = arith.addf %306, %307 : vector<2x32xf32>
    %309 = arith.negf %308 : vector<2x32xf32>
    %310 = math.exp %309 : vector<2x32xf32>
    %cst_72 = arith.constant 1.000000e+00 : f32
    %311 = vector.broadcast %cst_72 : f32 to vector<2x32xf32>
    %312 = arith.addf %311, %310 : vector<2x32xf32>
    %313 = arith.divf %311, %312 : vector<2x32xf32>
    %314 = vector.extract_strided_slice %16 {offsets = [0, 4, 0], sizes = [2, 1, 32], strides = [1, 1, 1]} : vector<2x8x32xf32> to vector<2x1x32xf32>
    %315 = vector.shape_cast %314 : vector<2x1x32xf32> to vector<2x32xf32>
    %316 = vector.extract_strided_slice %303 {offsets = [0, 32], sizes = [2, 32], strides = [1, 1]} : vector<2x96xf32> to vector<2x32xf32>
    %317 = arith.addf %315, %316 : vector<2x32xf32>
    %318 = arith.negf %317 : vector<2x32xf32>
    %319 = math.exp %318 : vector<2x32xf32>
    %cst_73 = arith.constant 1.000000e+00 : f32
    %320 = vector.broadcast %cst_73 : f32 to vector<2x32xf32>
    %321 = arith.addf %320, %319 : vector<2x32xf32>
    %322 = arith.divf %320, %321 : vector<2x32xf32>
    %323 = vector.extract_strided_slice %17 {offsets = [0, 4, 0], sizes = [2, 1, 32], strides = [1, 1, 1]} : vector<2x8x32xf32> to vector<2x1x32xf32>
    %324 = vector.shape_cast %323 : vector<2x1x32xf32> to vector<2x32xf32>
    %325 = vector.extract_strided_slice %303 {offsets = [0, 64], sizes = [2, 32], strides = [1, 1]} : vector<2x96xf32> to vector<2x32xf32>
    %326 = arith.addf %325, %25 : vector<2x32xf32>
    %327 = arith.mulf %313, %326 : vector<2x32xf32>
    %328 = arith.addf %324, %327 : vector<2x32xf32>
    %329 = math.tanh %328 : vector<2x32xf32>
    %cst_74 = arith.constant 1.000000e+00 : f32
    %330 = vector.broadcast %cst_74 : f32 to vector<2x32xf32>
    %331 = arith.subf %330, %322 : vector<2x32xf32>
    %332 = arith.mulf %331, %329 : vector<2x32xf32>
    %333 = arith.mulf %322, %266 : vector<2x32xf32>
    %334 = arith.addf %332, %333 : vector<2x32xf32>
    %335 = vector.extract_strided_slice %18 {offsets = [0, 3, 0], sizes = [2, 1, 32], strides = [1, 1, 1]} : vector<2x8x32xf32> to vector<2x1x32xf32>
    %336 = vector.shape_cast %335 : vector<2x1x32xf32> to vector<2x32xf32>
    %337 = vector.extract_strided_slice %304 {offsets = [0, 0], sizes = [2, 32], strides = [1, 1]} : vector<2x96xf32> to vector<2x32xf32>
    %338 = arith.addf %336, %337 : vector<2x32xf32>
    %339 = arith.negf %338 : vector<2x32xf32>
    %340 = math.exp %339 : vector<2x32xf32>
    %cst_75 = arith.constant 1.000000e+00 : f32
    %341 = vector.broadcast %cst_75 : f32 to vector<2x32xf32>
    %342 = arith.addf %341, %340 : vector<2x32xf32>
    %343 = arith.divf %341, %342 : vector<2x32xf32>
    %344 = vector.extract_strided_slice %19 {offsets = [0, 3, 0], sizes = [2, 1, 32], strides = [1, 1, 1]} : vector<2x8x32xf32> to vector<2x1x32xf32>
    %345 = vector.shape_cast %344 : vector<2x1x32xf32> to vector<2x32xf32>
    %346 = vector.extract_strided_slice %304 {offsets = [0, 32], sizes = [2, 32], strides = [1, 1]} : vector<2x96xf32> to vector<2x32xf32>
    %347 = arith.addf %345, %346 : vector<2x32xf32>
    %348 = arith.negf %347 : vector<2x32xf32>
    %349 = math.exp %348 : vector<2x32xf32>
    %cst_76 = arith.constant 1.000000e+00 : f32
    %350 = vector.broadcast %cst_76 : f32 to vector<2x32xf32>
    %351 = arith.addf %350, %349 : vector<2x32xf32>
    %352 = arith.divf %350, %351 : vector<2x32xf32>
    %353 = vector.extract_strided_slice %20 {offsets = [0, 3, 0], sizes = [2, 1, 32], strides = [1, 1, 1]} : vector<2x8x32xf32> to vector<2x1x32xf32>
    %354 = vector.shape_cast %353 : vector<2x1x32xf32> to vector<2x32xf32>
    %355 = vector.extract_strided_slice %304 {offsets = [0, 64], sizes = [2, 32], strides = [1, 1]} : vector<2x96xf32> to vector<2x32xf32>
    %356 = arith.addf %355, %28 : vector<2x32xf32>
    %357 = arith.mulf %343, %356 : vector<2x32xf32>
    %358 = arith.addf %354, %357 : vector<2x32xf32>
    %359 = math.tanh %358 : vector<2x32xf32>
    %cst_77 = arith.constant 1.000000e+00 : f32
    %360 = vector.broadcast %cst_77 : f32 to vector<2x32xf32>
    %361 = arith.subf %360, %352 : vector<2x32xf32>
    %362 = arith.mulf %361, %359 : vector<2x32xf32>
    %363 = arith.mulf %352, %296 : vector<2x32xf32>
    %364 = arith.addf %362, %363 : vector<2x32xf32>
    %c0_78 = arith.constant 0 : index
    %c4_79 = arith.constant 4 : index
    %c0_80 = arith.constant 0 : index
    %365 = vector.load %arg16[%c0_78, %c4_79, %c0_80] : memref<2x8x64xf32, #tpu.memory_space<vmem>>, vector<2x1x32xf32>
    %366 = vector.shape_cast %365 : vector<2x1x32xf32> to vector<2x32xf32>
    %367 = vector.shape_cast %334 : vector<2x32xf32> to vector<2x1x32xf32>
    tpu.vector_store %arg16[%c0_78, %c4_79, %c0_80], %367 {strides = array<i32>} : memref<2x8x64xf32, #tpu.memory_space<vmem>>, vector<2x1x32xf32>,
    %c0_81 = arith.constant 0 : index
    %c3_82 = arith.constant 3 : index
    %c32_83 = arith.constant 32 : index
    %368 = vector.load %arg16[%c0_81, %c3_82, %c32_83] : memref<2x8x64xf32, #tpu.memory_space<vmem>>, vector<2x1x32xf32>
    %369 = vector.shape_cast %368 : vector<2x1x32xf32> to vector<2x32xf32>
    %370 = vector.shape_cast %364 : vector<2x32xf32> to vector<2x1x32xf32>
    tpu.vector_store %arg16[%c0_81, %c3_82, %c32_83], %370 {strides = array<i32>} : memref<2x8x64xf32, #tpu.memory_space<vmem>>, vector<2x1x32xf32>,
    %cst_84 = arith.constant dense<0.000000e+00> : vector<2x96xf32>
    %371 = tpu.matmul %334, %21, %cst_84 {dimension_numbers = #tpu.dot_dimension_numbers<[1], [0], [0], [1], [0, 0, 1, 1], [], []>} : vector<2x32xf32>, vector<32x96xf32>, vector<2x96xf32> -> vector<2x96xf32>
    %cst_85 = arith.constant dense<0.000000e+00> : vector<2x96xf32>
    %372 = tpu.matmul %364, %22, %cst_85 {dimension_numbers = #tpu.dot_dimension_numbers<[1], [0], [0], [1], [0, 0, 1, 1], [], []>} : vector<2x32xf32>, vector<32x96xf32>, vector<2x96xf32> -> vector<2x96xf32>
    %373 = vector.extract_strided_slice %15 {offsets = [0, 5, 0], sizes = [2, 1, 32], strides = [1, 1, 1]} : vector<2x8x32xf32> to vector<2x1x32xf32>
    %374 = vector.shape_cast %373 : vector<2x1x32xf32> to vector<2x32xf32>
    %375 = vector.extract_strided_slice %371 {offsets = [0, 0], sizes = [2, 32], strides = [1, 1]} : vector<2x96xf32> to vector<2x32xf32>
    %376 = arith.addf %374, %375 : vector<2x32xf32>
    %377 = arith.negf %376 : vector<2x32xf32>
    %378 = math.exp %377 : vector<2x32xf32>
    %cst_86 = arith.constant 1.000000e+00 : f32
    %379 = vector.broadcast %cst_86 : f32 to vector<2x32xf32>
    %380 = arith.addf %379, %378 : vector<2x32xf32>
    %381 = arith.divf %379, %380 : vector<2x32xf32>
    %382 = vector.extract_strided_slice %16 {offsets = [0, 5, 0], sizes = [2, 1, 32], strides = [1, 1, 1]} : vector<2x8x32xf32> to vector<2x1x32xf32>
    %383 = vector.shape_cast %382 : vector<2x1x32xf32> to vector<2x32xf32>
    %384 = vector.extract_strided_slice %371 {offsets = [0, 32], sizes = [2, 32], strides = [1, 1]} : vector<2x96xf32> to vector<2x32xf32>
    %385 = arith.addf %383, %384 : vector<2x32xf32>
    %386 = arith.negf %385 : vector<2x32xf32>
    %387 = math.exp %386 : vector<2x32xf32>
    %cst_87 = arith.constant 1.000000e+00 : f32
    %388 = vector.broadcast %cst_87 : f32 to vector<2x32xf32>
    %389 = arith.addf %388, %387 : vector<2x32xf32>
    %390 = arith.divf %388, %389 : vector<2x32xf32>
    %391 = vector.extract_strided_slice %17 {offsets = [0, 5, 0], sizes = [2, 1, 32], strides = [1, 1, 1]} : vector<2x8x32xf32> to vector<2x1x32xf32>
    %392 = vector.shape_cast %391 : vector<2x1x32xf32> to vector<2x32xf32>
    %393 = vector.extract_strided_slice %371 {offsets = [0, 64], sizes = [2, 32], strides = [1, 1]} : vector<2x96xf32> to vector<2x32xf32>
    %394 = arith.addf %393, %25 : vector<2x32xf32>
    %395 = arith.mulf %381, %394 : vector<2x32xf32>
    %396 = arith.addf %392, %395 : vector<2x32xf32>
    %397 = math.tanh %396 : vector<2x32xf32>
    %cst_88 = arith.constant 1.000000e+00 : f32
    %398 = vector.broadcast %cst_88 : f32 to vector<2x32xf32>
    %399 = arith.subf %398, %390 : vector<2x32xf32>
    %400 = arith.mulf %399, %397 : vector<2x32xf32>
    %401 = arith.mulf %390, %334 : vector<2x32xf32>
    %402 = arith.addf %400, %401 : vector<2x32xf32>
    %403 = vector.extract_strided_slice %18 {offsets = [0, 2, 0], sizes = [2, 1, 32], strides = [1, 1, 1]} : vector<2x8x32xf32> to vector<2x1x32xf32>
    %404 = vector.shape_cast %403 : vector<2x1x32xf32> to vector<2x32xf32>
    %405 = vector.extract_strided_slice %372 {offsets = [0, 0], sizes = [2, 32], strides = [1, 1]} : vector<2x96xf32> to vector<2x32xf32>
    %406 = arith.addf %404, %405 : vector<2x32xf32>
    %407 = arith.negf %406 : vector<2x32xf32>
    %408 = math.exp %407 : vector<2x32xf32>
    %cst_89 = arith.constant 1.000000e+00 : f32
    %409 = vector.broadcast %cst_89 : f32 to vector<2x32xf32>
    %410 = arith.addf %409, %408 : vector<2x32xf32>
    %411 = arith.divf %409, %410 : vector<2x32xf32>
    %412 = vector.extract_strided_slice %19 {offsets = [0, 2, 0], sizes = [2, 1, 32], strides = [1, 1, 1]} : vector<2x8x32xf32> to vector<2x1x32xf32>
    %413 = vector.shape_cast %412 : vector<2x1x32xf32> to vector<2x32xf32>
    %414 = vector.extract_strided_slice %372 {offsets = [0, 32], sizes = [2, 32], strides = [1, 1]} : vector<2x96xf32> to vector<2x32xf32>
    %415 = arith.addf %413, %414 : vector<2x32xf32>
    %416 = arith.negf %415 : vector<2x32xf32>
    %417 = math.exp %416 : vector<2x32xf32>
    %cst_90 = arith.constant 1.000000e+00 : f32
    %418 = vector.broadcast %cst_90 : f32 to vector<2x32xf32>
    %419 = arith.addf %418, %417 : vector<2x32xf32>
    %420 = arith.divf %418, %419 : vector<2x32xf32>
    %421 = vector.extract_strided_slice %20 {offsets = [0, 2, 0], sizes = [2, 1, 32], strides = [1, 1, 1]} : vector<2x8x32xf32> to vector<2x1x32xf32>
    %422 = vector.shape_cast %421 : vector<2x1x32xf32> to vector<2x32xf32>
    %423 = vector.extract_strided_slice %372 {offsets = [0, 64], sizes = [2, 32], strides = [1, 1]} : vector<2x96xf32> to vector<2x32xf32>
    %424 = arith.addf %423, %28 : vector<2x32xf32>
    %425 = arith.mulf %411, %424 : vector<2x32xf32>
    %426 = arith.addf %422, %425 : vector<2x32xf32>
    %427 = math.tanh %426 : vector<2x32xf32>
    %cst_91 = arith.constant 1.000000e+00 : f32
    %428 = vector.broadcast %cst_91 : f32 to vector<2x32xf32>
    %429 = arith.subf %428, %420 : vector<2x32xf32>
    %430 = arith.mulf %429, %427 : vector<2x32xf32>
    %431 = arith.mulf %420, %364 : vector<2x32xf32>
    %432 = arith.addf %430, %431 : vector<2x32xf32>
    %c0_92 = arith.constant 0 : index
    %c5_93 = arith.constant 5 : index
    %c0_94 = arith.constant 0 : index
    %433 = vector.load %arg16[%c0_92, %c5_93, %c0_94] : memref<2x8x64xf32, #tpu.memory_space<vmem>>, vector<2x1x32xf32>
    %434 = vector.shape_cast %433 : vector<2x1x32xf32> to vector<2x32xf32>
    %435 = vector.shape_cast %402 : vector<2x32xf32> to vector<2x1x32xf32>
    tpu.vector_store %arg16[%c0_92, %c5_93, %c0_94], %435 {strides = array<i32>} : memref<2x8x64xf32, #tpu.memory_space<vmem>>, vector<2x1x32xf32>,
    %c0_95 = arith.constant 0 : index
    %c2_96 = arith.constant 2 : index
    %c32_97 = arith.constant 32 : index
    %436 = vector.load %arg16[%c0_95, %c2_96, %c32_97] : memref<2x8x64xf32, #tpu.memory_space<vmem>>, vector<2x1x32xf32>
    %437 = vector.shape_cast %436 : vector<2x1x32xf32> to vector<2x32xf32>
    %438 = vector.shape_cast %432 : vector<2x32xf32> to vector<2x1x32xf32>
    tpu.vector_store %arg16[%c0_95, %c2_96, %c32_97], %438 {strides = array<i32>} : memref<2x8x64xf32, #tpu.memory_space<vmem>>, vector<2x1x32xf32>,
    %cst_98 = arith.constant dense<0.000000e+00> : vector<2x96xf32>
    %439 = tpu.matmul %402, %21, %cst_98 {dimension_numbers = #tpu.dot_dimension_numbers<[1], [0], [0], [1], [0, 0, 1, 1], [], []>} : vector<2x32xf32>, vector<32x96xf32>, vector<2x96xf32> -> vector<2x96xf32>
    %cst_99 = arith.constant dense<0.000000e+00> : vector<2x96xf32>
    %440 = tpu.matmul %432, %22, %cst_99 {dimension_numbers = #tpu.dot_dimension_numbers<[1], [0], [0], [1], [0, 0, 1, 1], [], []>} : vector<2x32xf32>, vector<32x96xf32>, vector<2x96xf32> -> vector<2x96xf32>
    %441 = vector.extract_strided_slice %15 {offsets = [0, 6, 0], sizes = [2, 1, 32], strides = [1, 1, 1]} : vector<2x8x32xf32> to vector<2x1x32xf32>
    %442 = vector.shape_cast %441 : vector<2x1x32xf32> to vector<2x32xf32>
    %443 = vector.extract_strided_slice %439 {offsets = [0, 0], sizes = [2, 32], strides = [1, 1]} : vector<2x96xf32> to vector<2x32xf32>
    %444 = arith.addf %442, %443 : vector<2x32xf32>
    %445 = arith.negf %444 : vector<2x32xf32>
    %446 = math.exp %445 : vector<2x32xf32>
    %cst_100 = arith.constant 1.000000e+00 : f32
    %447 = vector.broadcast %cst_100 : f32 to vector<2x32xf32>
    %448 = arith.addf %447, %446 : vector<2x32xf32>
    %449 = arith.divf %447, %448 : vector<2x32xf32>
    %450 = vector.extract_strided_slice %16 {offsets = [0, 6, 0], sizes = [2, 1, 32], strides = [1, 1, 1]} : vector<2x8x32xf32> to vector<2x1x32xf32>
    %451 = vector.shape_cast %450 : vector<2x1x32xf32> to vector<2x32xf32>
    %452 = vector.extract_strided_slice %439 {offsets = [0, 32], sizes = [2, 32], strides = [1, 1]} : vector<2x96xf32> to vector<2x32xf32>
    %453 = arith.addf %451, %452 : vector<2x32xf32>
    %454 = arith.negf %453 : vector<2x32xf32>
    %455 = math.exp %454 : vector<2x32xf32>
    %cst_101 = arith.constant 1.000000e+00 : f32
    %456 = vector.broadcast %cst_101 : f32 to vector<2x32xf32>
    %457 = arith.addf %456, %455 : vector<2x32xf32>
    %458 = arith.divf %456, %457 : vector<2x32xf32>
    %459 = vector.extract_strided_slice %17 {offsets = [0, 6, 0], sizes = [2, 1, 32], strides = [1, 1, 1]} : vector<2x8x32xf32> to vector<2x1x32xf32>
    %460 = vector.shape_cast %459 : vector<2x1x32xf32> to vector<2x32xf32>
    %461 = vector.extract_strided_slice %439 {offsets = [0, 64], sizes = [2, 32], strides = [1, 1]} : vector<2x96xf32> to vector<2x32xf32>
    %462 = arith.addf %461, %25 : vector<2x32xf32>
    %463 = arith.mulf %449, %462 : vector<2x32xf32>
    %464 = arith.addf %460, %463 : vector<2x32xf32>
    %465 = math.tanh %464 : vector<2x32xf32>
    %cst_102 = arith.constant 1.000000e+00 : f32
    %466 = vector.broadcast %cst_102 : f32 to vector<2x32xf32>
    %467 = arith.subf %466, %458 : vector<2x32xf32>
    %468 = arith.mulf %467, %465 : vector<2x32xf32>
    %469 = arith.mulf %458, %402 : vector<2x32xf32>
    %470 = arith.addf %468, %469 : vector<2x32xf32>
    %471 = vector.extract_strided_slice %18 {offsets = [0, 1, 0], sizes = [2, 1, 32], strides = [1, 1, 1]} : vector<2x8x32xf32> to vector<2x1x32xf32>
    %472 = vector.shape_cast %471 : vector<2x1x32xf32> to vector<2x32xf32>
    %473 = vector.extract_strided_slice %440 {offsets = [0, 0], sizes = [2, 32], strides = [1, 1]} : vector<2x96xf32> to vector<2x32xf32>
    %474 = arith.addf %472, %473 : vector<2x32xf32>
    %475 = arith.negf %474 : vector<2x32xf32>
    %476 = math.exp %475 : vector<2x32xf32>
    %cst_103 = arith.constant 1.000000e+00 : f32
    %477 = vector.broadcast %cst_103 : f32 to vector<2x32xf32>
    %478 = arith.addf %477, %476 : vector<2x32xf32>
    %479 = arith.divf %477, %478 : vector<2x32xf32>
    %480 = vector.extract_strided_slice %19 {offsets = [0, 1, 0], sizes = [2, 1, 32], strides = [1, 1, 1]} : vector<2x8x32xf32> to vector<2x1x32xf32>
    %481 = vector.shape_cast %480 : vector<2x1x32xf32> to vector<2x32xf32>
    %482 = vector.extract_strided_slice %440 {offsets = [0, 32], sizes = [2, 32], strides = [1, 1]} : vector<2x96xf32> to vector<2x32xf32>
    %483 = arith.addf %481, %482 : vector<2x32xf32>
    %484 = arith.negf %483 : vector<2x32xf32>
    %485 = math.exp %484 : vector<2x32xf32>
    %cst_104 = arith.constant 1.000000e+00 : f32
    %486 = vector.broadcast %cst_104 : f32 to vector<2x32xf32>
    %487 = arith.addf %486, %485 : vector<2x32xf32>
    %488 = arith.divf %486, %487 : vector<2x32xf32>
    %489 = vector.extract_strided_slice %20 {offsets = [0, 1, 0], sizes = [2, 1, 32], strides = [1, 1, 1]} : vector<2x8x32xf32> to vector<2x1x32xf32>
    %490 = vector.shape_cast %489 : vector<2x1x32xf32> to vector<2x32xf32>
    %491 = vector.extract_strided_slice %440 {offsets = [0, 64], sizes = [2, 32], strides = [1, 1]} : vector<2x96xf32> to vector<2x32xf32>
    %492 = arith.addf %491, %28 : vector<2x32xf32>
    %493 = arith.mulf %479, %492 : vector<2x32xf32>
    %494 = arith.addf %490, %493 : vector<2x32xf32>
    %495 = math.tanh %494 : vector<2x32xf32>
    %cst_105 = arith.constant 1.000000e+00 : f32
    %496 = vector.broadcast %cst_105 : f32 to vector<2x32xf32>
    %497 = arith.subf %496, %488 : vector<2x32xf32>
    %498 = arith.mulf %497, %495 : vector<2x32xf32>
    %499 = arith.mulf %488, %432 : vector<2x32xf32>
    %500 = arith.addf %498, %499 : vector<2x32xf32>
    %c0_106 = arith.constant 0 : index
    %c6_107 = arith.constant 6 : index
    %c0_108 = arith.constant 0 : index
    %501 = vector.load %arg16[%c0_106, %c6_107, %c0_108] : memref<2x8x64xf32, #tpu.memory_space<vmem>>, vector<2x1x32xf32>
    %502 = vector.shape_cast %501 : vector<2x1x32xf32> to vector<2x32xf32>
    %503 = vector.shape_cast %470 : vector<2x32xf32> to vector<2x1x32xf32>
    tpu.vector_store %arg16[%c0_106, %c6_107, %c0_108], %503 {strides = array<i32>} : memref<2x8x64xf32, #tpu.memory_space<vmem>>, vector<2x1x32xf32>,
    %c0_109 = arith.constant 0 : index
    %c1_110 = arith.constant 1 : index
    %c32_111 = arith.constant 32 : index
    %504 = vector.load %arg16[%c0_109, %c1_110, %c32_111] : memref<2x8x64xf32, #tpu.memory_space<vmem>>, vector<2x1x32xf32>
    %505 = vector.shape_cast %504 : vector<2x1x32xf32> to vector<2x32xf32>
    %506 = vector.shape_cast %500 : vector<2x32xf32> to vector<2x1x32xf32>
    tpu.vector_store %arg16[%c0_109, %c1_110, %c32_111], %506 {strides = array<i32>} : memref<2x8x64xf32, #tpu.memory_space<vmem>>, vector<2x1x32xf32>,
    %cst_112 = arith.constant dense<0.000000e+00> : vector<2x96xf32>
    %507 = tpu.matmul %470, %21, %cst_112 {dimension_numbers = #tpu.dot_dimension_numbers<[1], [0], [0], [1], [0, 0, 1, 1], [], []>} : vector<2x32xf32>, vector<32x96xf32>, vector<2x96xf32> -> vector<2x96xf32>
    %cst_113 = arith.constant dense<0.000000e+00> : vector<2x96xf32>
    %508 = tpu.matmul %500, %22, %cst_113 {dimension_numbers = #tpu.dot_dimension_numbers<[1], [0], [0], [1], [0, 0, 1, 1], [], []>} : vector<2x32xf32>, vector<32x96xf32>, vector<2x96xf32> -> vector<2x96xf32>
    %509 = vector.extract_strided_slice %15 {offsets = [0, 7, 0], sizes = [2, 1, 32], strides = [1, 1, 1]} : vector<2x8x32xf32> to vector<2x1x32xf32>
    %510 = vector.shape_cast %509 : vector<2x1x32xf32> to vector<2x32xf32>
    %511 = vector.extract_strided_slice %507 {offsets = [0, 0], sizes = [2, 32], strides = [1, 1]} : vector<2x96xf32> to vector<2x32xf32>
    %512 = arith.addf %510, %511 : vector<2x32xf32>
    %513 = arith.negf %512 : vector<2x32xf32>
    %514 = math.exp %513 : vector<2x32xf32>
    %cst_114 = arith.constant 1.000000e+00 : f32
    %515 = vector.broadcast %cst_114 : f32 to vector<2x32xf32>
    %516 = arith.addf %515, %514 : vector<2x32xf32>
    %517 = arith.divf %515, %516 : vector<2x32xf32>
    %518 = vector.extract_strided_slice %16 {offsets = [0, 7, 0], sizes = [2, 1, 32], strides = [1, 1, 1]} : vector<2x8x32xf32> to vector<2x1x32xf32>
    %519 = vector.shape_cast %518 : vector<2x1x32xf32> to vector<2x32xf32>
    %520 = vector.extract_strided_slice %507 {offsets = [0, 32], sizes = [2, 32], strides = [1, 1]} : vector<2x96xf32> to vector<2x32xf32>
    %521 = arith.addf %519, %520 : vector<2x32xf32>
    %522 = arith.negf %521 : vector<2x32xf32>
    %523 = math.exp %522 : vector<2x32xf32>
    %cst_115 = arith.constant 1.000000e+00 : f32
    %524 = vector.broadcast %cst_115 : f32 to vector<2x32xf32>
    %525 = arith.addf %524, %523 : vector<2x32xf32>
    %526 = arith.divf %524, %525 : vector<2x32xf32>
    %527 = vector.extract_strided_slice %17 {offsets = [0, 7, 0], sizes = [2, 1, 32], strides = [1, 1, 1]} : vector<2x8x32xf32> to vector<2x1x32xf32>
    %528 = vector.shape_cast %527 : vector<2x1x32xf32> to vector<2x32xf32>
    %529 = vector.extract_strided_slice %507 {offsets = [0, 64], sizes = [2, 32], strides = [1, 1]} : vector<2x96xf32> to vector<2x32xf32>
    %530 = arith.addf %529, %25 : vector<2x32xf32>
    %531 = arith.mulf %517, %530 : vector<2x32xf32>
    %532 = arith.addf %528, %531 : vector<2x32xf32>
    %533 = math.tanh %532 : vector<2x32xf32>
    %cst_116 = arith.constant 1.000000e+00 : f32
    %534 = vector.broadcast %cst_116 : f32 to vector<2x32xf32>
    %535 = arith.subf %534, %526 : vector<2x32xf32>
    %536 = arith.mulf %535, %533 : vector<2x32xf32>
    %537 = arith.mulf %526, %470 : vector<2x32xf32>
    %538 = arith.addf %536, %537 : vector<2x32xf32>
    %539 = vector.extract_strided_slice %18 {offsets = [0, 0, 0], sizes = [2, 1, 32], strides = [1, 1, 1]} : vector<2x8x32xf32> to vector<2x1x32xf32>
    %540 = vector.shape_cast %539 : vector<2x1x32xf32> to vector<2x32xf32>
    %541 = vector.extract_strided_slice %508 {offsets = [0, 0], sizes = [2, 32], strides = [1, 1]} : vector<2x96xf32> to vector<2x32xf32>
    %542 = arith.addf %540, %541 : vector<2x32xf32>
    %543 = arith.negf %542 : vector<2x32xf32>
    %544 = math.exp %543 : vector<2x32xf32>
    %cst_117 = arith.constant 1.000000e+00 : f32
    %545 = vector.broadcast %cst_117 : f32 to vector<2x32xf32>
    %546 = arith.addf %545, %544 : vector<2x32xf32>
    %547 = arith.divf %545, %546 : vector<2x32xf32>
    %548 = vector.extract_strided_slice %19 {offsets = [0, 0, 0], sizes = [2, 1, 32], strides = [1, 1, 1]} : vector<2x8x32xf32> to vector<2x1x32xf32>
    %549 = vector.shape_cast %548 : vector<2x1x32xf32> to vector<2x32xf32>
    %550 = vector.extract_strided_slice %508 {offsets = [0, 32], sizes = [2, 32], strides = [1, 1]} : vector<2x96xf32> to vector<2x32xf32>
    %551 = arith.addf %549, %550 : vector<2x32xf32>
    %552 = arith.negf %551 : vector<2x32xf32>
    %553 = math.exp %552 : vector<2x32xf32>
    %cst_118 = arith.constant 1.000000e+00 : f32
    %554 = vector.broadcast %cst_118 : f32 to vector<2x32xf32>
    %555 = arith.addf %554, %553 : vector<2x32xf32>
    %556 = arith.divf %554, %555 : vector<2x32xf32>
    %557 = vector.extract_strided_slice %20 {offsets = [0, 0, 0], sizes = [2, 1, 32], strides = [1, 1, 1]} : vector<2x8x32xf32> to vector<2x1x32xf32>
    %558 = vector.shape_cast %557 : vector<2x1x32xf32> to vector<2x32xf32>
    %559 = vector.extract_strided_slice %508 {offsets = [0, 64], sizes = [2, 32], strides = [1, 1]} : vector<2x96xf32> to vector<2x32xf32>
    %560 = arith.addf %559, %28 : vector<2x32xf32>
    %561 = arith.mulf %547, %560 : vector<2x32xf32>
    %562 = arith.addf %558, %561 : vector<2x32xf32>
    %563 = math.tanh %562 : vector<2x32xf32>
    %cst_119 = arith.constant 1.000000e+00 : f32
    %564 = vector.broadcast %cst_119 : f32 to vector<2x32xf32>
    %565 = arith.subf %564, %556 : vector<2x32xf32>
    %566 = arith.mulf %565, %563 : vector<2x32xf32>
    %567 = arith.mulf %556, %500 : vector<2x32xf32>
    %568 = arith.addf %566, %567 : vector<2x32xf32>
    %c0_120 = arith.constant 0 : index
    %c7_121 = arith.constant 7 : index
    %c0_122 = arith.constant 0 : index
    %569 = vector.load %arg16[%c0_120, %c7_121, %c0_122] : memref<2x8x64xf32, #tpu.memory_space<vmem>>, vector<2x1x32xf32>
    %570 = vector.shape_cast %569 : vector<2x1x32xf32> to vector<2x32xf32>
    %571 = vector.shape_cast %538 : vector<2x32xf32> to vector<2x1x32xf32>
    tpu.vector_store %arg16[%c0_120, %c7_121, %c0_122], %571 {strides = array<i32>} : memref<2x8x64xf32, #tpu.memory_space<vmem>>, vector<2x1x32xf32>,
    %c0_123 = arith.constant 0 : index
    %c0_124 = arith.constant 0 : index
    %c32_125 = arith.constant 32 : index
    %572 = vector.load %arg16[%c0_123, %c0_124, %c32_125] : memref<2x8x64xf32, #tpu.memory_space<vmem>>, vector<2x1x32xf32>
    %573 = vector.shape_cast %572 : vector<2x1x32xf32> to vector<2x32xf32>
    %574 = vector.shape_cast %568 : vector<2x32xf32> to vector<2x1x32xf32>
    tpu.vector_store %arg16[%c0_123, %c0_124, %c32_125], %574 {strides = array<i32>} : memref<2x8x64xf32, #tpu.memory_space<vmem>>, vector<2x1x32xf32>,
    %c0_126 = arith.constant 0 : index
    %c0_127 = arith.constant 0 : index
    %c0_128 = arith.constant 0 : index
    %575 = vector.load %arg16[%c0_126, %c0_127, %c0_128] : memref<2x8x64xf32, #tpu.memory_space<vmem>>, vector<2x8x64xf32>
    %576 = vector.shape_cast %575 : vector<2x8x64xf32> to vector<16x64xf32>
    %c0_129 = arith.constant 0 : index
    %c0_130 = arith.constant 0 : index
    %577 = vector.load %arg9[%c0_129, %c0_130] : memref<64x192xf32, #tpu.memory_space<vmem>>, vector<64x192xf32>
    %cst_131 = arith.constant dense<0.000000e+00> : vector<16x192xf32>
    %578 = tpu.matmul %576, %577, %cst_131 {dimension_numbers = #tpu.dot_dimension_numbers<[1], [0], [0], [1], [0, 0, 1, 1], [], []>} : vector<16x64xf32>, vector<64x192xf32>, vector<16x192xf32> -> vector<16x192xf32>
    %c0_132 = arith.constant 0 : index
    %c0_133 = arith.constant 0 : index
    %579 = vector.load %arg10[%c0_132, %c0_133] : memref<1x192xf32, #tpu.memory_space<vmem>>, vector<1x192xf32>
    %580 = vector.broadcast %579 : vector<1x192xf32> to vector<16x192xf32>
    %581 = arith.addf %578, %580 : vector<16x192xf32>
    %582 = vector.shape_cast %581 : vector<16x192xf32> to vector<2x8x192xf32>
    %583 = vector.extract_strided_slice %582 {offsets = [0, 0, 0], sizes = [2, 8, 32], strides = [1, 1, 1]} : vector<2x8x192xf32> to vector<2x8x32xf32>
    %584 = vector.extract_strided_slice %582 {offsets = [0, 0, 32], sizes = [2, 8, 32], strides = [1, 1, 1]} : vector<2x8x192xf32> to vector<2x8x32xf32>
    %585 = vector.extract_strided_slice %582 {offsets = [0, 0, 64], sizes = [2, 8, 32], strides = [1, 1, 1]} : vector<2x8x192xf32> to vector<2x8x32xf32>
    %586 = vector.extract_strided_slice %582 {offsets = [0, 0, 96], sizes = [2, 8, 32], strides = [1, 1, 1]} : vector<2x8x192xf32> to vector<2x8x32xf32>
    %587 = vector.extract_strided_slice %582 {offsets = [0, 0, 128], sizes = [2, 8, 32], strides = [1, 1, 1]} : vector<2x8x192xf32> to vector<2x8x32xf32>
    %588 = vector.extract_strided_slice %582 {offsets = [0, 0, 160], sizes = [2, 8, 32], strides = [1, 1, 1]} : vector<2x8x192xf32> to vector<2x8x32xf32>
    %c0_134 = arith.constant 0 : index
    %c0_135 = arith.constant 0 : index
    %589 = vector.load %arg11[%c0_134, %c0_135] : memref<32x96xf32, #tpu.memory_space<vmem>>, vector<32x96xf32>
    %c0_136 = arith.constant 0 : index
    %c0_137 = arith.constant 0 : index
    %590 = vector.load %arg12[%c0_136, %c0_137] : memref<32x96xf32, #tpu.memory_space<vmem>>, vector<32x96xf32>
    %c0_138 = arith.constant 0 : index
    %c0_139 = arith.constant 0 : index
    %591 = vector.load %arg13[%c0_138, %c0_139] : memref<1x32xf32, #tpu.memory_space<vmem>>, vector<1x32xf32>
    %592 = vector.shape_cast %591 : vector<1x32xf32> to vector<1x32xf32>
    %593 = vector.broadcast %592 : vector<1x32xf32> to vector<2x32xf32>
    %c0_140 = arith.constant 0 : index
    %c0_141 = arith.constant 0 : index
    %594 = vector.load %arg14[%c0_140, %c0_141] : memref<1x32xf32, #tpu.memory_space<vmem>>, vector<1x32xf32>
    %595 = vector.shape_cast %594 : vector<1x32xf32> to vector<1x32xf32>
    %596 = vector.broadcast %595 : vector<1x32xf32> to vector<2x32xf32>
    %cst_142 = arith.constant 0.000000e+00 : f32
    %597 = vector.broadcast %cst_142 : f32 to vector<2x32xf32>
    %cst_143 = arith.constant 0.000000e+00 : f32
    %598 = vector.broadcast %cst_143 : f32 to vector<2x32xf32>
    %cst_144 = arith.constant dense<0.000000e+00> : vector<2x96xf32>
    %599 = tpu.matmul %597, %589, %cst_144 {dimension_numbers = #tpu.dot_dimension_numbers<[1], [0], [0], [1], [0, 0, 1, 1], [], []>} : vector<2x32xf32>, vector<32x96xf32>, vector<2x96xf32> -> vector<2x96xf32>
    %cst_145 = arith.constant dense<0.000000e+00> : vector<2x96xf32>
    %600 = tpu.matmul %598, %590, %cst_145 {dimension_numbers = #tpu.dot_dimension_numbers<[1], [0], [0], [1], [0, 0, 1, 1], [], []>} : vector<2x32xf32>, vector<32x96xf32>, vector<2x96xf32> -> vector<2x96xf32>
    %601 = vector.extract_strided_slice %583 {offsets = [0, 0, 0], sizes = [2, 1, 32], strides = [1, 1, 1]} : vector<2x8x32xf32> to vector<2x1x32xf32>
    %602 = vector.shape_cast %601 : vector<2x1x32xf32> to vector<2x32xf32>
    %603 = vector.extract_strided_slice %599 {offsets = [0, 0], sizes = [2, 32], strides = [1, 1]} : vector<2x96xf32> to vector<2x32xf32>
    %604 = arith.addf %602, %603 : vector<2x32xf32>
    %605 = arith.negf %604 : vector<2x32xf32>
    %606 = math.exp %605 : vector<2x32xf32>
    %cst_146 = arith.constant 1.000000e+00 : f32
    %607 = vector.broadcast %cst_146 : f32 to vector<2x32xf32>
    %608 = arith.addf %607, %606 : vector<2x32xf32>
    %609 = arith.divf %607, %608 : vector<2x32xf32>
    %610 = vector.extract_strided_slice %584 {offsets = [0, 0, 0], sizes = [2, 1, 32], strides = [1, 1, 1]} : vector<2x8x32xf32> to vector<2x1x32xf32>
    %611 = vector.shape_cast %610 : vector<2x1x32xf32> to vector<2x32xf32>
    %612 = vector.extract_strided_slice %599 {offsets = [0, 32], sizes = [2, 32], strides = [1, 1]} : vector<2x96xf32> to vector<2x32xf32>
    %613 = arith.addf %611, %612 : vector<2x32xf32>
    %614 = arith.negf %613 : vector<2x32xf32>
    %615 = math.exp %614 : vector<2x32xf32>
    %cst_147 = arith.constant 1.000000e+00 : f32
    %616 = vector.broadcast %cst_147 : f32 to vector<2x32xf32>
    %617 = arith.addf %616, %615 : vector<2x32xf32>
    %618 = arith.divf %616, %617 : vector<2x32xf32>
    %619 = vector.extract_strided_slice %585 {offsets = [0, 0, 0], sizes = [2, 1, 32], strides = [1, 1, 1]} : vector<2x8x32xf32> to vector<2x1x32xf32>
    %620 = vector.shape_cast %619 : vector<2x1x32xf32> to vector<2x32xf32>
    %621 = vector.extract_strided_slice %599 {offsets = [0, 64], sizes = [2, 32], strides = [1, 1]} : vector<2x96xf32> to vector<2x32xf32>
    %622 = arith.addf %621, %593 : vector<2x32xf32>
    %623 = arith.mulf %609, %622 : vector<2x32xf32>
    %624 = arith.addf %620, %623 : vector<2x32xf32>
    %625 = math.tanh %624 : vector<2x32xf32>
    %cst_148 = arith.constant 1.000000e+00 : f32
    %626 = vector.broadcast %cst_148 : f32 to vector<2x32xf32>
    %627 = arith.subf %626, %618 : vector<2x32xf32>
    %628 = arith.mulf %627, %625 : vector<2x32xf32>
    %629 = arith.mulf %618, %597 : vector<2x32xf32>
    %630 = arith.addf %628, %629 : vector<2x32xf32>
    %631 = vector.extract_strided_slice %586 {offsets = [0, 7, 0], sizes = [2, 1, 32], strides = [1, 1, 1]} : vector<2x8x32xf32> to vector<2x1x32xf32>
    %632 = vector.shape_cast %631 : vector<2x1x32xf32> to vector<2x32xf32>
    %633 = vector.extract_strided_slice %600 {offsets = [0, 0], sizes = [2, 32], strides = [1, 1]} : vector<2x96xf32> to vector<2x32xf32>
    %634 = arith.addf %632, %633 : vector<2x32xf32>
    %635 = arith.negf %634 : vector<2x32xf32>
    %636 = math.exp %635 : vector<2x32xf32>
    %cst_149 = arith.constant 1.000000e+00 : f32
    %637 = vector.broadcast %cst_149 : f32 to vector<2x32xf32>
    %638 = arith.addf %637, %636 : vector<2x32xf32>
    %639 = arith.divf %637, %638 : vector<2x32xf32>
    %640 = vector.extract_strided_slice %587 {offsets = [0, 7, 0], sizes = [2, 1, 32], strides = [1, 1, 1]} : vector<2x8x32xf32> to vector<2x1x32xf32>
    %641 = vector.shape_cast %640 : vector<2x1x32xf32> to vector<2x32xf32>
    %642 = vector.extract_strided_slice %600 {offsets = [0, 32], sizes = [2, 32], strides = [1, 1]} : vector<2x96xf32> to vector<2x32xf32>
    %643 = arith.addf %641, %642 : vector<2x32xf32>
    %644 = arith.negf %643 : vector<2x32xf32>
    %645 = math.exp %644 : vector<2x32xf32>
    %cst_150 = arith.constant 1.000000e+00 : f32
    %646 = vector.broadcast %cst_150 : f32 to vector<2x32xf32>
    %647 = arith.addf %646, %645 : vector<2x32xf32>
    %648 = arith.divf %646, %647 : vector<2x32xf32>
    %649 = vector.extract_strided_slice %588 {offsets = [0, 7, 0], sizes = [2, 1, 32], strides = [1, 1, 1]} : vector<2x8x32xf32> to vector<2x1x32xf32>
    %650 = vector.shape_cast %649 : vector<2x1x32xf32> to vector<2x32xf32>
    %651 = vector.extract_strided_slice %600 {offsets = [0, 64], sizes = [2, 32], strides = [1, 1]} : vector<2x96xf32> to vector<2x32xf32>
    %652 = arith.addf %651, %596 : vector<2x32xf32>
    %653 = arith.mulf %639, %652 : vector<2x32xf32>
    %654 = arith.addf %650, %653 : vector<2x32xf32>
    %655 = math.tanh %654 : vector<2x32xf32>
    %cst_151 = arith.constant 1.000000e+00 : f32
    %656 = vector.broadcast %cst_151 : f32 to vector<2x32xf32>
    %657 = arith.subf %656, %648 : vector<2x32xf32>
    %658 = arith.mulf %657, %655 : vector<2x32xf32>
    %659 = arith.mulf %648, %598 : vector<2x32xf32>
    %660 = arith.addf %658, %659 : vector<2x32xf32>
    %c0_152 = arith.constant 0 : index
    %c0_153 = arith.constant 0 : index
    %c0_154 = arith.constant 0 : index
    %661 = vector.load %arg16[%c0_152, %c0_153, %c0_154] : memref<2x8x64xf32, #tpu.memory_space<vmem>>, vector<2x1x32xf32>
    %662 = vector.shape_cast %661 : vector<2x1x32xf32> to vector<2x32xf32>
    %663 = vector.shape_cast %630 : vector<2x32xf32> to vector<2x1x32xf32>
    tpu.vector_store %arg16[%c0_152, %c0_153, %c0_154], %663 {strides = array<i32>} : memref<2x8x64xf32, #tpu.memory_space<vmem>>, vector<2x1x32xf32>,
    %c0_155 = arith.constant 0 : index
    %c7_156 = arith.constant 7 : index
    %c32_157 = arith.constant 32 : index
    %664 = vector.load %arg16[%c0_155, %c7_156, %c32_157] : memref<2x8x64xf32, #tpu.memory_space<vmem>>, vector<2x1x32xf32>
    %665 = vector.shape_cast %664 : vector<2x1x32xf32> to vector<2x32xf32>
    %666 = vector.shape_cast %660 : vector<2x32xf32> to vector<2x1x32xf32>
    tpu.vector_store %arg16[%c0_155, %c7_156, %c32_157], %666 {strides = array<i32>} : memref<2x8x64xf32, #tpu.memory_space<vmem>>, vector<2x1x32xf32>,
    %cst_158 = arith.constant dense<0.000000e+00> : vector<2x96xf32>
    %667 = tpu.matmul %630, %589, %cst_158 {dimension_numbers = #tpu.dot_dimension_numbers<[1], [0], [0], [1], [0, 0, 1, 1], [], []>} : vector<2x32xf32>, vector<32x96xf32>, vector<2x96xf32> -> vector<2x96xf32>
    %cst_159 = arith.constant dense<0.000000e+00> : vector<2x96xf32>
    %668 = tpu.matmul %660, %590, %cst_159 {dimension_numbers = #tpu.dot_dimension_numbers<[1], [0], [0], [1], [0, 0, 1, 1], [], []>} : vector<2x32xf32>, vector<32x96xf32>, vector<2x96xf32> -> vector<2x96xf32>
    %669 = vector.extract_strided_slice %583 {offsets = [0, 1, 0], sizes = [2, 1, 32], strides = [1, 1, 1]} : vector<2x8x32xf32> to vector<2x1x32xf32>
    %670 = vector.shape_cast %669 : vector<2x1x32xf32> to vector<2x32xf32>
    %671 = vector.extract_strided_slice %667 {offsets = [0, 0], sizes = [2, 32], strides = [1, 1]} : vector<2x96xf32> to vector<2x32xf32>
    %672 = arith.addf %670, %671 : vector<2x32xf32>
    %673 = arith.negf %672 : vector<2x32xf32>
    %674 = math.exp %673 : vector<2x32xf32>
    %cst_160 = arith.constant 1.000000e+00 : f32
    %675 = vector.broadcast %cst_160 : f32 to vector<2x32xf32>
    %676 = arith.addf %675, %674 : vector<2x32xf32>
    %677 = arith.divf %675, %676 : vector<2x32xf32>
    %678 = vector.extract_strided_slice %584 {offsets = [0, 1, 0], sizes = [2, 1, 32], strides = [1, 1, 1]} : vector<2x8x32xf32> to vector<2x1x32xf32>
    %679 = vector.shape_cast %678 : vector<2x1x32xf32> to vector<2x32xf32>
    %680 = vector.extract_strided_slice %667 {offsets = [0, 32], sizes = [2, 32], strides = [1, 1]} : vector<2x96xf32> to vector<2x32xf32>
    %681 = arith.addf %679, %680 : vector<2x32xf32>
    %682 = arith.negf %681 : vector<2x32xf32>
    %683 = math.exp %682 : vector<2x32xf32>
    %cst_161 = arith.constant 1.000000e+00 : f32
    %684 = vector.broadcast %cst_161 : f32 to vector<2x32xf32>
    %685 = arith.addf %684, %683 : vector<2x32xf32>
    %686 = arith.divf %684, %685 : vector<2x32xf32>
    %687 = vector.extract_strided_slice %585 {offsets = [0, 1, 0], sizes = [2, 1, 32], strides = [1, 1, 1]} : vector<2x8x32xf32> to vector<2x1x32xf32>
    %688 = vector.shape_cast %687 : vector<2x1x32xf32> to vector<2x32xf32>
    %689 = vector.extract_strided_slice %667 {offsets = [0, 64], sizes = [2, 32], strides = [1, 1]} : vector<2x96xf32> to vector<2x32xf32>
    %690 = arith.addf %689, %593 : vector<2x32xf32>
    %691 = arith.mulf %677, %690 : vector<2x32xf32>
    %692 = arith.addf %688, %691 : vector<2x32xf32>
    %693 = math.tanh %692 : vector<2x32xf32>
    %cst_162 = arith.constant 1.000000e+00 : f32
    %694 = vector.broadcast %cst_162 : f32 to vector<2x32xf32>
    %695 = arith.subf %694, %686 : vector<2x32xf32>
    %696 = arith.mulf %695, %693 : vector<2x32xf32>
    %697 = arith.mulf %686, %630 : vector<2x32xf32>
    %698 = arith.addf %696, %697 : vector<2x32xf32>
    %699 = vector.extract_strided_slice %586 {offsets = [0, 6, 0], sizes = [2, 1, 32], strides = [1, 1, 1]} : vector<2x8x32xf32> to vector<2x1x32xf32>
    %700 = vector.shape_cast %699 : vector<2x1x32xf32> to vector<2x32xf32>
    %701 = vector.extract_strided_slice %668 {offsets = [0, 0], sizes = [2, 32], strides = [1, 1]} : vector<2x96xf32> to vector<2x32xf32>
    %702 = arith.addf %700, %701 : vector<2x32xf32>
    %703 = arith.negf %702 : vector<2x32xf32>
    %704 = math.exp %703 : vector<2x32xf32>
    %cst_163 = arith.constant 1.000000e+00 : f32
    %705 = vector.broadcast %cst_163 : f32 to vector<2x32xf32>
    %706 = arith.addf %705, %704 : vector<2x32xf32>
    %707 = arith.divf %705, %706 : vector<2x32xf32>
    %708 = vector.extract_strided_slice %587 {offsets = [0, 6, 0], sizes = [2, 1, 32], strides = [1, 1, 1]} : vector<2x8x32xf32> to vector<2x1x32xf32>
    %709 = vector.shape_cast %708 : vector<2x1x32xf32> to vector<2x32xf32>
    %710 = vector.extract_strided_slice %668 {offsets = [0, 32], sizes = [2, 32], strides = [1, 1]} : vector<2x96xf32> to vector<2x32xf32>
    %711 = arith.addf %709, %710 : vector<2x32xf32>
    %712 = arith.negf %711 : vector<2x32xf32>
    %713 = math.exp %712 : vector<2x32xf32>
    %cst_164 = arith.constant 1.000000e+00 : f32
    %714 = vector.broadcast %cst_164 : f32 to vector<2x32xf32>
    %715 = arith.addf %714, %713 : vector<2x32xf32>
    %716 = arith.divf %714, %715 : vector<2x32xf32>
    %717 = vector.extract_strided_slice %588 {offsets = [0, 6, 0], sizes = [2, 1, 32], strides = [1, 1, 1]} : vector<2x8x32xf32> to vector<2x1x32xf32>
    %718 = vector.shape_cast %717 : vector<2x1x32xf32> to vector<2x32xf32>
    %719 = vector.extract_strided_slice %668 {offsets = [0, 64], sizes = [2, 32], strides = [1, 1]} : vector<2x96xf32> to vector<2x32xf32>
    %720 = arith.addf %719, %596 : vector<2x32xf32>
    %721 = arith.mulf %707, %720 : vector<2x32xf32>
    %722 = arith.addf %718, %721 : vector<2x32xf32>
    %723 = math.tanh %722 : vector<2x32xf32>
    %cst_165 = arith.constant 1.000000e+00 : f32
    %724 = vector.broadcast %cst_165 : f32 to vector<2x32xf32>
    %725 = arith.subf %724, %716 : vector<2x32xf32>
    %726 = arith.mulf %725, %723 : vector<2x32xf32>
    %727 = arith.mulf %716, %660 : vector<2x32xf32>
    %728 = arith.addf %726, %727 : vector<2x32xf32>
    %c0_166 = arith.constant 0 : index
    %c1_167 = arith.constant 1 : index
    %c0_168 = arith.constant 0 : index
    %729 = vector.load %arg16[%c0_166, %c1_167, %c0_168] : memref<2x8x64xf32, #tpu.memory_space<vmem>>, vector<2x1x32xf32>
    %730 = vector.shape_cast %729 : vector<2x1x32xf32> to vector<2x32xf32>
    %731 = vector.shape_cast %698 : vector<2x32xf32> to vector<2x1x32xf32>
    tpu.vector_store %arg16[%c0_166, %c1_167, %c0_168], %731 {strides = array<i32>} : memref<2x8x64xf32, #tpu.memory_space<vmem>>, vector<2x1x32xf32>,
    %c0_169 = arith.constant 0 : index
    %c6_170 = arith.constant 6 : index
    %c32_171 = arith.constant 32 : index
    %732 = vector.load %arg16[%c0_169, %c6_170, %c32_171] : memref<2x8x64xf32, #tpu.memory_space<vmem>>, vector<2x1x32xf32>
    %733 = vector.shape_cast %732 : vector<2x1x32xf32> to vector<2x32xf32>
    %734 = vector.shape_cast %728 : vector<2x32xf32> to vector<2x1x32xf32>
    tpu.vector_store %arg16[%c0_169, %c6_170, %c32_171], %734 {strides = array<i32>} : memref<2x8x64xf32, #tpu.memory_space<vmem>>, vector<2x1x32xf32>,
    %cst_172 = arith.constant dense<0.000000e+00> : vector<2x96xf32>
    %735 = tpu.matmul %698, %589, %cst_172 {dimension_numbers = #tpu.dot_dimension_numbers<[1], [0], [0], [1], [0, 0, 1, 1], [], []>} : vector<2x32xf32>, vector<32x96xf32>, vector<2x96xf32> -> vector<2x96xf32>
    %cst_173 = arith.constant dense<0.000000e+00> : vector<2x96xf32>
    %736 = tpu.matmul %728, %590, %cst_173 {dimension_numbers = #tpu.dot_dimension_numbers<[1], [0], [0], [1], [0, 0, 1, 1], [], []>} : vector<2x32xf32>, vector<32x96xf32>, vector<2x96xf32> -> vector<2x96xf32>
    %737 = vector.extract_strided_slice %583 {offsets = [0, 2, 0], sizes = [2, 1, 32], strides = [1, 1, 1]} : vector<2x8x32xf32> to vector<2x1x32xf32>
    %738 = vector.shape_cast %737 : vector<2x1x32xf32> to vector<2x32xf32>
    %739 = vector.extract_strided_slice %735 {offsets = [0, 0], sizes = [2, 32], strides = [1, 1]} : vector<2x96xf32> to vector<2x32xf32>
    %740 = arith.addf %738, %739 : vector<2x32xf32>
    %741 = arith.negf %740 : vector<2x32xf32>
    %742 = math.exp %741 : vector<2x32xf32>
    %cst_174 = arith.constant 1.000000e+00 : f32
    %743 = vector.broadcast %cst_174 : f32 to vector<2x32xf32>
    %744 = arith.addf %743, %742 : vector<2x32xf32>
    %745 = arith.divf %743, %744 : vector<2x32xf32>
    %746 = vector.extract_strided_slice %584 {offsets = [0, 2, 0], sizes = [2, 1, 32], strides = [1, 1, 1]} : vector<2x8x32xf32> to vector<2x1x32xf32>
    %747 = vector.shape_cast %746 : vector<2x1x32xf32> to vector<2x32xf32>
    %748 = vector.extract_strided_slice %735 {offsets = [0, 32], sizes = [2, 32], strides = [1, 1]} : vector<2x96xf32> to vector<2x32xf32>
    %749 = arith.addf %747, %748 : vector<2x32xf32>
    %750 = arith.negf %749 : vector<2x32xf32>
    %751 = math.exp %750 : vector<2x32xf32>
    %cst_175 = arith.constant 1.000000e+00 : f32
    %752 = vector.broadcast %cst_175 : f32 to vector<2x32xf32>
    %753 = arith.addf %752, %751 : vector<2x32xf32>
    %754 = arith.divf %752, %753 : vector<2x32xf32>
    %755 = vector.extract_strided_slice %585 {offsets = [0, 2, 0], sizes = [2, 1, 32], strides = [1, 1, 1]} : vector<2x8x32xf32> to vector<2x1x32xf32>
    %756 = vector.shape_cast %755 : vector<2x1x32xf32> to vector<2x32xf32>
    %757 = vector.extract_strided_slice %735 {offsets = [0, 64], sizes = [2, 32], strides = [1, 1]} : vector<2x96xf32> to vector<2x32xf32>
    %758 = arith.addf %757, %593 : vector<2x32xf32>
    %759 = arith.mulf %745, %758 : vector<2x32xf32>
    %760 = arith.addf %756, %759 : vector<2x32xf32>
    %761 = math.tanh %760 : vector<2x32xf32>
    %cst_176 = arith.constant 1.000000e+00 : f32
    %762 = vector.broadcast %cst_176 : f32 to vector<2x32xf32>
    %763 = arith.subf %762, %754 : vector<2x32xf32>
    %764 = arith.mulf %763, %761 : vector<2x32xf32>
    %765 = arith.mulf %754, %698 : vector<2x32xf32>
    %766 = arith.addf %764, %765 : vector<2x32xf32>
    %767 = vector.extract_strided_slice %586 {offsets = [0, 5, 0], sizes = [2, 1, 32], strides = [1, 1, 1]} : vector<2x8x32xf32> to vector<2x1x32xf32>
    %768 = vector.shape_cast %767 : vector<2x1x32xf32> to vector<2x32xf32>
    %769 = vector.extract_strided_slice %736 {offsets = [0, 0], sizes = [2, 32], strides = [1, 1]} : vector<2x96xf32> to vector<2x32xf32>
    %770 = arith.addf %768, %769 : vector<2x32xf32>
    %771 = arith.negf %770 : vector<2x32xf32>
    %772 = math.exp %771 : vector<2x32xf32>
    %cst_177 = arith.constant 1.000000e+00 : f32
    %773 = vector.broadcast %cst_177 : f32 to vector<2x32xf32>
    %774 = arith.addf %773, %772 : vector<2x32xf32>
    %775 = arith.divf %773, %774 : vector<2x32xf32>
    %776 = vector.extract_strided_slice %587 {offsets = [0, 5, 0], sizes = [2, 1, 32], strides = [1, 1, 1]} : vector<2x8x32xf32> to vector<2x1x32xf32>
    %777 = vector.shape_cast %776 : vector<2x1x32xf32> to vector<2x32xf32>
    %778 = vector.extract_strided_slice %736 {offsets = [0, 32], sizes = [2, 32], strides = [1, 1]} : vector<2x96xf32> to vector<2x32xf32>
    %779 = arith.addf %777, %778 : vector<2x32xf32>
    %780 = arith.negf %779 : vector<2x32xf32>
    %781 = math.exp %780 : vector<2x32xf32>
    %cst_178 = arith.constant 1.000000e+00 : f32
    %782 = vector.broadcast %cst_178 : f32 to vector<2x32xf32>
    %783 = arith.addf %782, %781 : vector<2x32xf32>
    %784 = arith.divf %782, %783 : vector<2x32xf32>
    %785 = vector.extract_strided_slice %588 {offsets = [0, 5, 0], sizes = [2, 1, 32], strides = [1, 1, 1]} : vector<2x8x32xf32> to vector<2x1x32xf32>
    %786 = vector.shape_cast %785 : vector<2x1x32xf32> to vector<2x32xf32>
    %787 = vector.extract_strided_slice %736 {offsets = [0, 64], sizes = [2, 32], strides = [1, 1]} : vector<2x96xf32> to vector<2x32xf32>
    %788 = arith.addf %787, %596 : vector<2x32xf32>
    %789 = arith.mulf %775, %788 : vector<2x32xf32>
    %790 = arith.addf %786, %789 : vector<2x32xf32>
    %791 = math.tanh %790 : vector<2x32xf32>
    %cst_179 = arith.constant 1.000000e+00 : f32
    %792 = vector.broadcast %cst_179 : f32 to vector<2x32xf32>
    %793 = arith.subf %792, %784 : vector<2x32xf32>
    %794 = arith.mulf %793, %791 : vector<2x32xf32>
    %795 = arith.mulf %784, %728 : vector<2x32xf32>
    %796 = arith.addf %794, %795 : vector<2x32xf32>
    %c0_180 = arith.constant 0 : index
    %c2_181 = arith.constant 2 : index
    %c0_182 = arith.constant 0 : index
    %797 = vector.load %arg16[%c0_180, %c2_181, %c0_182] : memref<2x8x64xf32, #tpu.memory_space<vmem>>, vector<2x1x32xf32>
    %798 = vector.shape_cast %797 : vector<2x1x32xf32> to vector<2x32xf32>
    %799 = vector.shape_cast %766 : vector<2x32xf32> to vector<2x1x32xf32>
    tpu.vector_store %arg16[%c0_180, %c2_181, %c0_182], %799 {strides = array<i32>} : memref<2x8x64xf32, #tpu.memory_space<vmem>>, vector<2x1x32xf32>,
    %c0_183 = arith.constant 0 : index
    %c5_184 = arith.constant 5 : index
    %c32_185 = arith.constant 32 : index
    %800 = vector.load %arg16[%c0_183, %c5_184, %c32_185] : memref<2x8x64xf32, #tpu.memory_space<vmem>>, vector<2x1x32xf32>
    %801 = vector.shape_cast %800 : vector<2x1x32xf32> to vector<2x32xf32>
    %802 = vector.shape_cast %796 : vector<2x32xf32> to vector<2x1x32xf32>
    tpu.vector_store %arg16[%c0_183, %c5_184, %c32_185], %802 {strides = array<i32>} : memref<2x8x64xf32, #tpu.memory_space<vmem>>, vector<2x1x32xf32>,
    %cst_186 = arith.constant dense<0.000000e+00> : vector<2x96xf32>
    %803 = tpu.matmul %766, %589, %cst_186 {dimension_numbers = #tpu.dot_dimension_numbers<[1], [0], [0], [1], [0, 0, 1, 1], [], []>} : vector<2x32xf32>, vector<32x96xf32>, vector<2x96xf32> -> vector<2x96xf32>
    %cst_187 = arith.constant dense<0.000000e+00> : vector<2x96xf32>
    %804 = tpu.matmul %796, %590, %cst_187 {dimension_numbers = #tpu.dot_dimension_numbers<[1], [0], [0], [1], [0, 0, 1, 1], [], []>} : vector<2x32xf32>, vector<32x96xf32>, vector<2x96xf32> -> vector<2x96xf32>
    %805 = vector.extract_strided_slice %583 {offsets = [0, 3, 0], sizes = [2, 1, 32], strides = [1, 1, 1]} : vector<2x8x32xf32> to vector<2x1x32xf32>
    %806 = vector.shape_cast %805 : vector<2x1x32xf32> to vector<2x32xf32>
    %807 = vector.extract_strided_slice %803 {offsets = [0, 0], sizes = [2, 32], strides = [1, 1]} : vector<2x96xf32> to vector<2x32xf32>
    %808 = arith.addf %806, %807 : vector<2x32xf32>
    %809 = arith.negf %808 : vector<2x32xf32>
    %810 = math.exp %809 : vector<2x32xf32>
    %cst_188 = arith.constant 1.000000e+00 : f32
    %811 = vector.broadcast %cst_188 : f32 to vector<2x32xf32>
    %812 = arith.addf %811, %810 : vector<2x32xf32>
    %813 = arith.divf %811, %812 : vector<2x32xf32>
    %814 = vector.extract_strided_slice %584 {offsets = [0, 3, 0], sizes = [2, 1, 32], strides = [1, 1, 1]} : vector<2x8x32xf32> to vector<2x1x32xf32>
    %815 = vector.shape_cast %814 : vector<2x1x32xf32> to vector<2x32xf32>
    %816 = vector.extract_strided_slice %803 {offsets = [0, 32], sizes = [2, 32], strides = [1, 1]} : vector<2x96xf32> to vector<2x32xf32>
    %817 = arith.addf %815, %816 : vector<2x32xf32>
    %818 = arith.negf %817 : vector<2x32xf32>
    %819 = math.exp %818 : vector<2x32xf32>
    %cst_189 = arith.constant 1.000000e+00 : f32
    %820 = vector.broadcast %cst_189 : f32 to vector<2x32xf32>
    %821 = arith.addf %820, %819 : vector<2x32xf32>
    %822 = arith.divf %820, %821 : vector<2x32xf32>
    %823 = vector.extract_strided_slice %585 {offsets = [0, 3, 0], sizes = [2, 1, 32], strides = [1, 1, 1]} : vector<2x8x32xf32> to vector<2x1x32xf32>
    %824 = vector.shape_cast %823 : vector<2x1x32xf32> to vector<2x32xf32>
    %825 = vector.extract_strided_slice %803 {offsets = [0, 64], sizes = [2, 32], strides = [1, 1]} : vector<2x96xf32> to vector<2x32xf32>
    %826 = arith.addf %825, %593 : vector<2x32xf32>
    %827 = arith.mulf %813, %826 : vector<2x32xf32>
    %828 = arith.addf %824, %827 : vector<2x32xf32>
    %829 = math.tanh %828 : vector<2x32xf32>
    %cst_190 = arith.constant 1.000000e+00 : f32
    %830 = vector.broadcast %cst_190 : f32 to vector<2x32xf32>
    %831 = arith.subf %830, %822 : vector<2x32xf32>
    %832 = arith.mulf %831, %829 : vector<2x32xf32>
    %833 = arith.mulf %822, %766 : vector<2x32xf32>
    %834 = arith.addf %832, %833 : vector<2x32xf32>
    %835 = vector.extract_strided_slice %586 {offsets = [0, 4, 0], sizes = [2, 1, 32], strides = [1, 1, 1]} : vector<2x8x32xf32> to vector<2x1x32xf32>
    %836 = vector.shape_cast %835 : vector<2x1x32xf32> to vector<2x32xf32>
    %837 = vector.extract_strided_slice %804 {offsets = [0, 0], sizes = [2, 32], strides = [1, 1]} : vector<2x96xf32> to vector<2x32xf32>
    %838 = arith.addf %836, %837 : vector<2x32xf32>
    %839 = arith.negf %838 : vector<2x32xf32>
    %840 = math.exp %839 : vector<2x32xf32>
    %cst_191 = arith.constant 1.000000e+00 : f32
    %841 = vector.broadcast %cst_191 : f32 to vector<2x32xf32>
    %842 = arith.addf %841, %840 : vector<2x32xf32>
    %843 = arith.divf %841, %842 : vector<2x32xf32>
    %844 = vector.extract_strided_slice %587 {offsets = [0, 4, 0], sizes = [2, 1, 32], strides = [1, 1, 1]} : vector<2x8x32xf32> to vector<2x1x32xf32>
    %845 = vector.shape_cast %844 : vector<2x1x32xf32> to vector<2x32xf32>
    %846 = vector.extract_strided_slice %804 {offsets = [0, 32], sizes = [2, 32], strides = [1, 1]} : vector<2x96xf32> to vector<2x32xf32>
    %847 = arith.addf %845, %846 : vector<2x32xf32>
    %848 = arith.negf %847 : vector<2x32xf32>
    %849 = math.exp %848 : vector<2x32xf32>
    %cst_192 = arith.constant 1.000000e+00 : f32
    %850 = vector.broadcast %cst_192 : f32 to vector<2x32xf32>
    %851 = arith.addf %850, %849 : vector<2x32xf32>
    %852 = arith.divf %850, %851 : vector<2x32xf32>
    %853 = vector.extract_strided_slice %588 {offsets = [0, 4, 0], sizes = [2, 1, 32], strides = [1, 1, 1]} : vector<2x8x32xf32> to vector<2x1x32xf32>
    %854 = vector.shape_cast %853 : vector<2x1x32xf32> to vector<2x32xf32>
    %855 = vector.extract_strided_slice %804 {offsets = [0, 64], sizes = [2, 32], strides = [1, 1]} : vector<2x96xf32> to vector<2x32xf32>
    %856 = arith.addf %855, %596 : vector<2x32xf32>
    %857 = arith.mulf %843, %856 : vector<2x32xf32>
    %858 = arith.addf %854, %857 : vector<2x32xf32>
    %859 = math.tanh %858 : vector<2x32xf32>
    %cst_193 = arith.constant 1.000000e+00 : f32
    %860 = vector.broadcast %cst_193 : f32 to vector<2x32xf32>
    %861 = arith.subf %860, %852 : vector<2x32xf32>
    %862 = arith.mulf %861, %859 : vector<2x32xf32>
    %863 = arith.mulf %852, %796 : vector<2x32xf32>
    %864 = arith.addf %862, %863 : vector<2x32xf32>
    %c0_194 = arith.constant 0 : index
    %c3_195 = arith.constant 3 : index
    %c0_196 = arith.constant 0 : index
    %865 = vector.load %arg16[%c0_194, %c3_195, %c0_196] : memref<2x8x64xf32, #tpu.memory_space<vmem>>, vector<2x1x32xf32>
    %866 = vector.shape_cast %865 : vector<2x1x32xf32> to vector<2x32xf32>
    %867 = vector.shape_cast %834 : vector<2x32xf32> to vector<2x1x32xf32>
    tpu.vector_store %arg16[%c0_194, %c3_195, %c0_196], %867 {strides = array<i32>} : memref<2x8x64xf32, #tpu.memory_space<vmem>>, vector<2x1x32xf32>,
    %c0_197 = arith.constant 0 : index
    %c4_198 = arith.constant 4 : index
    %c32_199 = arith.constant 32 : index
    %868 = vector.load %arg16[%c0_197, %c4_198, %c32_199] : memref<2x8x64xf32, #tpu.memory_space<vmem>>, vector<2x1x32xf32>
    %869 = vector.shape_cast %868 : vector<2x1x32xf32> to vector<2x32xf32>
    %870 = vector.shape_cast %864 : vector<2x32xf32> to vector<2x1x32xf32>
    tpu.vector_store %arg16[%c0_197, %c4_198, %c32_199], %870 {strides = array<i32>} : memref<2x8x64xf32, #tpu.memory_space<vmem>>, vector<2x1x32xf32>,
    %cst_200 = arith.constant dense<0.000000e+00> : vector<2x96xf32>
    %871 = tpu.matmul %834, %589, %cst_200 {dimension_numbers = #tpu.dot_dimension_numbers<[1], [0], [0], [1], [0, 0, 1, 1], [], []>} : vector<2x32xf32>, vector<32x96xf32>, vector<2x96xf32> -> vector<2x96xf32>
    %cst_201 = arith.constant dense<0.000000e+00> : vector<2x96xf32>
    %872 = tpu.matmul %864, %590, %cst_201 {dimension_numbers = #tpu.dot_dimension_numbers<[1], [0], [0], [1], [0, 0, 1, 1], [], []>} : vector<2x32xf32>, vector<32x96xf32>, vector<2x96xf32> -> vector<2x96xf32>
    %873 = vector.extract_strided_slice %583 {offsets = [0, 4, 0], sizes = [2, 1, 32], strides = [1, 1, 1]} : vector<2x8x32xf32> to vector<2x1x32xf32>
    %874 = vector.shape_cast %873 : vector<2x1x32xf32> to vector<2x32xf32>
    %875 = vector.extract_strided_slice %871 {offsets = [0, 0], sizes = [2, 32], strides = [1, 1]} : vector<2x96xf32> to vector<2x32xf32>
    %876 = arith.addf %874, %875 : vector<2x32xf32>
    %877 = arith.negf %876 : vector<2x32xf32>
    %878 = math.exp %877 : vector<2x32xf32>
    %cst_202 = arith.constant 1.000000e+00 : f32
    %879 = vector.broadcast %cst_202 : f32 to vector<2x32xf32>
    %880 = arith.addf %879, %878 : vector<2x32xf32>
    %881 = arith.divf %879, %880 : vector<2x32xf32>
    %882 = vector.extract_strided_slice %584 {offsets = [0, 4, 0], sizes = [2, 1, 32], strides = [1, 1, 1]} : vector<2x8x32xf32> to vector<2x1x32xf32>
    %883 = vector.shape_cast %882 : vector<2x1x32xf32> to vector<2x32xf32>
    %884 = vector.extract_strided_slice %871 {offsets = [0, 32], sizes = [2, 32], strides = [1, 1]} : vector<2x96xf32> to vector<2x32xf32>
    %885 = arith.addf %883, %884 : vector<2x32xf32>
    %886 = arith.negf %885 : vector<2x32xf32>
    %887 = math.exp %886 : vector<2x32xf32>
    %cst_203 = arith.constant 1.000000e+00 : f32
    %888 = vector.broadcast %cst_203 : f32 to vector<2x32xf32>
    %889 = arith.addf %888, %887 : vector<2x32xf32>
    %890 = arith.divf %888, %889 : vector<2x32xf32>
    %891 = vector.extract_strided_slice %585 {offsets = [0, 4, 0], sizes = [2, 1, 32], strides = [1, 1, 1]} : vector<2x8x32xf32> to vector<2x1x32xf32>
    %892 = vector.shape_cast %891 : vector<2x1x32xf32> to vector<2x32xf32>
    %893 = vector.extract_strided_slice %871 {offsets = [0, 64], sizes = [2, 32], strides = [1, 1]} : vector<2x96xf32> to vector<2x32xf32>
    %894 = arith.addf %893, %593 : vector<2x32xf32>
    %895 = arith.mulf %881, %894 : vector<2x32xf32>
    %896 = arith.addf %892, %895 : vector<2x32xf32>
    %897 = math.tanh %896 : vector<2x32xf32>
    %cst_204 = arith.constant 1.000000e+00 : f32
    %898 = vector.broadcast %cst_204 : f32 to vector<2x32xf32>
    %899 = arith.subf %898, %890 : vector<2x32xf32>
    %900 = arith.mulf %899, %897 : vector<2x32xf32>
    %901 = arith.mulf %890, %834 : vector<2x32xf32>
    %902 = arith.addf %900, %901 : vector<2x32xf32>
    %903 = vector.extract_strided_slice %586 {offsets = [0, 3, 0], sizes = [2, 1, 32], strides = [1, 1, 1]} : vector<2x8x32xf32> to vector<2x1x32xf32>
    %904 = vector.shape_cast %903 : vector<2x1x32xf32> to vector<2x32xf32>
    %905 = vector.extract_strided_slice %872 {offsets = [0, 0], sizes = [2, 32], strides = [1, 1]} : vector<2x96xf32> to vector<2x32xf32>
    %906 = arith.addf %904, %905 : vector<2x32xf32>
    %907 = arith.negf %906 : vector<2x32xf32>
    %908 = math.exp %907 : vector<2x32xf32>
    %cst_205 = arith.constant 1.000000e+00 : f32
    %909 = vector.broadcast %cst_205 : f32 to vector<2x32xf32>
    %910 = arith.addf %909, %908 : vector<2x32xf32>
    %911 = arith.divf %909, %910 : vector<2x32xf32>
    %912 = vector.extract_strided_slice %587 {offsets = [0, 3, 0], sizes = [2, 1, 32], strides = [1, 1, 1]} : vector<2x8x32xf32> to vector<2x1x32xf32>
    %913 = vector.shape_cast %912 : vector<2x1x32xf32> to vector<2x32xf32>
    %914 = vector.extract_strided_slice %872 {offsets = [0, 32], sizes = [2, 32], strides = [1, 1]} : vector<2x96xf32> to vector<2x32xf32>
    %915 = arith.addf %913, %914 : vector<2x32xf32>
    %916 = arith.negf %915 : vector<2x32xf32>
    %917 = math.exp %916 : vector<2x32xf32>
    %cst_206 = arith.constant 1.000000e+00 : f32
    %918 = vector.broadcast %cst_206 : f32 to vector<2x32xf32>
    %919 = arith.addf %918, %917 : vector<2x32xf32>
    %920 = arith.divf %918, %919 : vector<2x32xf32>
    %921 = vector.extract_strided_slice %588 {offsets = [0, 3, 0], sizes = [2, 1, 32], strides = [1, 1, 1]} : vector<2x8x32xf32> to vector<2x1x32xf32>
    %922 = vector.shape_cast %921 : vector<2x1x32xf32> to vector<2x32xf32>
    %923 = vector.extract_strided_slice %872 {offsets = [0, 64], sizes = [2, 32], strides = [1, 1]} : vector<2x96xf32> to vector<2x32xf32>
    %924 = arith.addf %923, %596 : vector<2x32xf32>
    %925 = arith.mulf %911, %924 : vector<2x32xf32>
    %926 = arith.addf %922, %925 : vector<2x32xf32>
    %927 = math.tanh %926 : vector<2x32xf32>
    %cst_207 = arith.constant 1.000000e+00 : f32
    %928 = vector.broadcast %cst_207 : f32 to vector<2x32xf32>
    %929 = arith.subf %928, %920 : vector<2x32xf32>
    %930 = arith.mulf %929, %927 : vector<2x32xf32>
    %931 = arith.mulf %920, %864 : vector<2x32xf32>
    %932 = arith.addf %930, %931 : vector<2x32xf32>
    %c0_208 = arith.constant 0 : index
    %c4_209 = arith.constant 4 : index
    %c0_210 = arith.constant 0 : index
    %933 = vector.load %arg16[%c0_208, %c4_209, %c0_210] : memref<2x8x64xf32, #tpu.memory_space<vmem>>, vector<2x1x32xf32>
    %934 = vector.shape_cast %933 : vector<2x1x32xf32> to vector<2x32xf32>
    %935 = vector.shape_cast %902 : vector<2x32xf32> to vector<2x1x32xf32>
    tpu.vector_store %arg16[%c0_208, %c4_209, %c0_210], %935 {strides = array<i32>} : memref<2x8x64xf32, #tpu.memory_space<vmem>>, vector<2x1x32xf32>,
    %c0_211 = arith.constant 0 : index
    %c3_212 = arith.constant 3 : index
    %c32_213 = arith.constant 32 : index
    %936 = vector.load %arg16[%c0_211, %c3_212, %c32_213] : memref<2x8x64xf32, #tpu.memory_space<vmem>>, vector<2x1x32xf32>
    %937 = vector.shape_cast %936 : vector<2x1x32xf32> to vector<2x32xf32>
    %938 = vector.shape_cast %932 : vector<2x32xf32> to vector<2x1x32xf32>
    tpu.vector_store %arg16[%c0_211, %c3_212, %c32_213], %938 {strides = array<i32>} : memref<2x8x64xf32, #tpu.memory_space<vmem>>, vector<2x1x32xf32>,
    %cst_214 = arith.constant dense<0.000000e+00> : vector<2x96xf32>
    %939 = tpu.matmul %902, %589, %cst_214 {dimension_numbers = #tpu.dot_dimension_numbers<[1], [0], [0], [1], [0, 0, 1, 1], [], []>} : vector<2x32xf32>, vector<32x96xf32>, vector<2x96xf32> -> vector<2x96xf32>
    %cst_215 = arith.constant dense<0.000000e+00> : vector<2x96xf32>
    %940 = tpu.matmul %932, %590, %cst_215 {dimension_numbers = #tpu.dot_dimension_numbers<[1], [0], [0], [1], [0, 0, 1, 1], [], []>} : vector<2x32xf32>, vector<32x96xf32>, vector<2x96xf32> -> vector<2x96xf32>
    %941 = vector.extract_strided_slice %583 {offsets = [0, 5, 0], sizes = [2, 1, 32], strides = [1, 1, 1]} : vector<2x8x32xf32> to vector<2x1x32xf32>
    %942 = vector.shape_cast %941 : vector<2x1x32xf32> to vector<2x32xf32>
    %943 = vector.extract_strided_slice %939 {offsets = [0, 0], sizes = [2, 32], strides = [1, 1]} : vector<2x96xf32> to vector<2x32xf32>
    %944 = arith.addf %942, %943 : vector<2x32xf32>
    %945 = arith.negf %944 : vector<2x32xf32>
    %946 = math.exp %945 : vector<2x32xf32>
    %cst_216 = arith.constant 1.000000e+00 : f32
    %947 = vector.broadcast %cst_216 : f32 to vector<2x32xf32>
    %948 = arith.addf %947, %946 : vector<2x32xf32>
    %949 = arith.divf %947, %948 : vector<2x32xf32>
    %950 = vector.extract_strided_slice %584 {offsets = [0, 5, 0], sizes = [2, 1, 32], strides = [1, 1, 1]} : vector<2x8x32xf32> to vector<2x1x32xf32>
    %951 = vector.shape_cast %950 : vector<2x1x32xf32> to vector<2x32xf32>
    %952 = vector.extract_strided_slice %939 {offsets = [0, 32], sizes = [2, 32], strides = [1, 1]} : vector<2x96xf32> to vector<2x32xf32>
    %953 = arith.addf %951, %952 : vector<2x32xf32>
    %954 = arith.negf %953 : vector<2x32xf32>
    %955 = math.exp %954 : vector<2x32xf32>
    %cst_217 = arith.constant 1.000000e+00 : f32
    %956 = vector.broadcast %cst_217 : f32 to vector<2x32xf32>
    %957 = arith.addf %956, %955 : vector<2x32xf32>
    %958 = arith.divf %956, %957 : vector<2x32xf32>
    %959 = vector.extract_strided_slice %585 {offsets = [0, 5, 0], sizes = [2, 1, 32], strides = [1, 1, 1]} : vector<2x8x32xf32> to vector<2x1x32xf32>
    %960 = vector.shape_cast %959 : vector<2x1x32xf32> to vector<2x32xf32>
    %961 = vector.extract_strided_slice %939 {offsets = [0, 64], sizes = [2, 32], strides = [1, 1]} : vector<2x96xf32> to vector<2x32xf32>
    %962 = arith.addf %961, %593 : vector<2x32xf32>
    %963 = arith.mulf %949, %962 : vector<2x32xf32>
    %964 = arith.addf %960, %963 : vector<2x32xf32>
    %965 = math.tanh %964 : vector<2x32xf32>
    %cst_218 = arith.constant 1.000000e+00 : f32
    %966 = vector.broadcast %cst_218 : f32 to vector<2x32xf32>
    %967 = arith.subf %966, %958 : vector<2x32xf32>
    %968 = arith.mulf %967, %965 : vector<2x32xf32>
    %969 = arith.mulf %958, %902 : vector<2x32xf32>
    %970 = arith.addf %968, %969 : vector<2x32xf32>
    %971 = vector.extract_strided_slice %586 {offsets = [0, 2, 0], sizes = [2, 1, 32], strides = [1, 1, 1]} : vector<2x8x32xf32> to vector<2x1x32xf32>
    %972 = vector.shape_cast %971 : vector<2x1x32xf32> to vector<2x32xf32>
    %973 = vector.extract_strided_slice %940 {offsets = [0, 0], sizes = [2, 32], strides = [1, 1]} : vector<2x96xf32> to vector<2x32xf32>
    %974 = arith.addf %972, %973 : vector<2x32xf32>
    %975 = arith.negf %974 : vector<2x32xf32>
    %976 = math.exp %975 : vector<2x32xf32>
    %cst_219 = arith.constant 1.000000e+00 : f32
    %977 = vector.broadcast %cst_219 : f32 to vector<2x32xf32>
    %978 = arith.addf %977, %976 : vector<2x32xf32>
    %979 = arith.divf %977, %978 : vector<2x32xf32>
    %980 = vector.extract_strided_slice %587 {offsets = [0, 2, 0], sizes = [2, 1, 32], strides = [1, 1, 1]} : vector<2x8x32xf32> to vector<2x1x32xf32>
    %981 = vector.shape_cast %980 : vector<2x1x32xf32> to vector<2x32xf32>
    %982 = vector.extract_strided_slice %940 {offsets = [0, 32], sizes = [2, 32], strides = [1, 1]} : vector<2x96xf32> to vector<2x32xf32>
    %983 = arith.addf %981, %982 : vector<2x32xf32>
    %984 = arith.negf %983 : vector<2x32xf32>
    %985 = math.exp %984 : vector<2x32xf32>
    %cst_220 = arith.constant 1.000000e+00 : f32
    %986 = vector.broadcast %cst_220 : f32 to vector<2x32xf32>
    %987 = arith.addf %986, %985 : vector<2x32xf32>
    %988 = arith.divf %986, %987 : vector<2x32xf32>
    %989 = vector.extract_strided_slice %588 {offsets = [0, 2, 0], sizes = [2, 1, 32], strides = [1, 1, 1]} : vector<2x8x32xf32> to vector<2x1x32xf32>
    %990 = vector.shape_cast %989 : vector<2x1x32xf32> to vector<2x32xf32>
    %991 = vector.extract_strided_slice %940 {offsets = [0, 64], sizes = [2, 32], strides = [1, 1]} : vector<2x96xf32> to vector<2x32xf32>
    %992 = arith.addf %991, %596 : vector<2x32xf32>
    %993 = arith.mulf %979, %992 : vector<2x32xf32>
    %994 = arith.addf %990, %993 : vector<2x32xf32>
    %995 = math.tanh %994 : vector<2x32xf32>
    %cst_221 = arith.constant 1.000000e+00 : f32
    %996 = vector.broadcast %cst_221 : f32 to vector<2x32xf32>
    %997 = arith.subf %996, %988 : vector<2x32xf32>
    %998 = arith.mulf %997, %995 : vector<2x32xf32>
    %999 = arith.mulf %988, %932 : vector<2x32xf32>
    %1000 = arith.addf %998, %999 : vector<2x32xf32>
    %c0_222 = arith.constant 0 : index
    %c5_223 = arith.constant 5 : index
    %c0_224 = arith.constant 0 : index
    %1001 = vector.load %arg16[%c0_222, %c5_223, %c0_224] : memref<2x8x64xf32, #tpu.memory_space<vmem>>, vector<2x1x32xf32>
    %1002 = vector.shape_cast %1001 : vector<2x1x32xf32> to vector<2x32xf32>
    %1003 = vector.shape_cast %970 : vector<2x32xf32> to vector<2x1x32xf32>
    tpu.vector_store %arg16[%c0_222, %c5_223, %c0_224], %1003 {strides = array<i32>} : memref<2x8x64xf32, #tpu.memory_space<vmem>>, vector<2x1x32xf32>,
    %c0_225 = arith.constant 0 : index
    %c2_226 = arith.constant 2 : index
    %c32_227 = arith.constant 32 : index
    %1004 = vector.load %arg16[%c0_225, %c2_226, %c32_227] : memref<2x8x64xf32, #tpu.memory_space<vmem>>, vector<2x1x32xf32>
    %1005 = vector.shape_cast %1004 : vector<2x1x32xf32> to vector<2x32xf32>
    %1006 = vector.shape_cast %1000 : vector<2x32xf32> to vector<2x1x32xf32>
    tpu.vector_store %arg16[%c0_225, %c2_226, %c32_227], %1006 {strides = array<i32>} : memref<2x8x64xf32, #tpu.memory_space<vmem>>, vector<2x1x32xf32>,
    %cst_228 = arith.constant dense<0.000000e+00> : vector<2x96xf32>
    %1007 = tpu.matmul %970, %589, %cst_228 {dimension_numbers = #tpu.dot_dimension_numbers<[1], [0], [0], [1], [0, 0, 1, 1], [], []>} : vector<2x32xf32>, vector<32x96xf32>, vector<2x96xf32> -> vector<2x96xf32>
    %cst_229 = arith.constant dense<0.000000e+00> : vector<2x96xf32>
    %1008 = tpu.matmul %1000, %590, %cst_229 {dimension_numbers = #tpu.dot_dimension_numbers<[1], [0], [0], [1], [0, 0, 1, 1], [], []>} : vector<2x32xf32>, vector<32x96xf32>, vector<2x96xf32> -> vector<2x96xf32>
    %1009 = vector.extract_strided_slice %583 {offsets = [0, 6, 0], sizes = [2, 1, 32], strides = [1, 1, 1]} : vector<2x8x32xf32> to vector<2x1x32xf32>
    %1010 = vector.shape_cast %1009 : vector<2x1x32xf32> to vector<2x32xf32>
    %1011 = vector.extract_strided_slice %1007 {offsets = [0, 0], sizes = [2, 32], strides = [1, 1]} : vector<2x96xf32> to vector<2x32xf32>
    %1012 = arith.addf %1010, %1011 : vector<2x32xf32>
    %1013 = arith.negf %1012 : vector<2x32xf32>
    %1014 = math.exp %1013 : vector<2x32xf32>
    %cst_230 = arith.constant 1.000000e+00 : f32
    %1015 = vector.broadcast %cst_230 : f32 to vector<2x32xf32>
    %1016 = arith.addf %1015, %1014 : vector<2x32xf32>
    %1017 = arith.divf %1015, %1016 : vector<2x32xf32>
    %1018 = vector.extract_strided_slice %584 {offsets = [0, 6, 0], sizes = [2, 1, 32], strides = [1, 1, 1]} : vector<2x8x32xf32> to vector<2x1x32xf32>
    %1019 = vector.shape_cast %1018 : vector<2x1x32xf32> to vector<2x32xf32>
    %1020 = vector.extract_strided_slice %1007 {offsets = [0, 32], sizes = [2, 32], strides = [1, 1]} : vector<2x96xf32> to vector<2x32xf32>
    %1021 = arith.addf %1019, %1020 : vector<2x32xf32>
    %1022 = arith.negf %1021 : vector<2x32xf32>
    %1023 = math.exp %1022 : vector<2x32xf32>
    %cst_231 = arith.constant 1.000000e+00 : f32
    %1024 = vector.broadcast %cst_231 : f32 to vector<2x32xf32>
    %1025 = arith.addf %1024, %1023 : vector<2x32xf32>
    %1026 = arith.divf %1024, %1025 : vector<2x32xf32>
    %1027 = vector.extract_strided_slice %585 {offsets = [0, 6, 0], sizes = [2, 1, 32], strides = [1, 1, 1]} : vector<2x8x32xf32> to vector<2x1x32xf32>
    %1028 = vector.shape_cast %1027 : vector<2x1x32xf32> to vector<2x32xf32>
    %1029 = vector.extract_strided_slice %1007 {offsets = [0, 64], sizes = [2, 32], strides = [1, 1]} : vector<2x96xf32> to vector<2x32xf32>
    %1030 = arith.addf %1029, %593 : vector<2x32xf32>
    %1031 = arith.mulf %1017, %1030 : vector<2x32xf32>
    %1032 = arith.addf %1028, %1031 : vector<2x32xf32>
    %1033 = math.tanh %1032 : vector<2x32xf32>
    %cst_232 = arith.constant 1.000000e+00 : f32
    %1034 = vector.broadcast %cst_232 : f32 to vector<2x32xf32>
    %1035 = arith.subf %1034, %1026 : vector<2x32xf32>
    %1036 = arith.mulf %1035, %1033 : vector<2x32xf32>
    %1037 = arith.mulf %1026, %970 : vector<2x32xf32>
    %1038 = arith.addf %1036, %1037 : vector<2x32xf32>
    %1039 = vector.extract_strided_slice %586 {offsets = [0, 1, 0], sizes = [2, 1, 32], strides = [1, 1, 1]} : vector<2x8x32xf32> to vector<2x1x32xf32>
    %1040 = vector.shape_cast %1039 : vector<2x1x32xf32> to vector<2x32xf32>
    %1041 = vector.extract_strided_slice %1008 {offsets = [0, 0], sizes = [2, 32], strides = [1, 1]} : vector<2x96xf32> to vector<2x32xf32>
    %1042 = arith.addf %1040, %1041 : vector<2x32xf32>
    %1043 = arith.negf %1042 : vector<2x32xf32>
    %1044 = math.exp %1043 : vector<2x32xf32>
    %cst_233 = arith.constant 1.000000e+00 : f32
    %1045 = vector.broadcast %cst_233 : f32 to vector<2x32xf32>
    %1046 = arith.addf %1045, %1044 : vector<2x32xf32>
    %1047 = arith.divf %1045, %1046 : vector<2x32xf32>
    %1048 = vector.extract_strided_slice %587 {offsets = [0, 1, 0], sizes = [2, 1, 32], strides = [1, 1, 1]} : vector<2x8x32xf32> to vector<2x1x32xf32>
    %1049 = vector.shape_cast %1048 : vector<2x1x32xf32> to vector<2x32xf32>
    %1050 = vector.extract_strided_slice %1008 {offsets = [0, 32], sizes = [2, 32], strides = [1, 1]} : vector<2x96xf32> to vector<2x32xf32>
    %1051 = arith.addf %1049, %1050 : vector<2x32xf32>
    %1052 = arith.negf %1051 : vector<2x32xf32>
    %1053 = math.exp %1052 : vector<2x32xf32>
    %cst_234 = arith.constant 1.000000e+00 : f32
    %1054 = vector.broadcast %cst_234 : f32 to vector<2x32xf32>
    %1055 = arith.addf %1054, %1053 : vector<2x32xf32>
    %1056 = arith.divf %1054, %1055 : vector<2x32xf32>
    %1057 = vector.extract_strided_slice %588 {offsets = [0, 1, 0], sizes = [2, 1, 32], strides = [1, 1, 1]} : vector<2x8x32xf32> to vector<2x1x32xf32>
    %1058 = vector.shape_cast %1057 : vector<2x1x32xf32> to vector<2x32xf32>
    %1059 = vector.extract_strided_slice %1008 {offsets = [0, 64], sizes = [2, 32], strides = [1, 1]} : vector<2x96xf32> to vector<2x32xf32>
    %1060 = arith.addf %1059, %596 : vector<2x32xf32>
    %1061 = arith.mulf %1047, %1060 : vector<2x32xf32>
    %1062 = arith.addf %1058, %1061 : vector<2x32xf32>
    %1063 = math.tanh %1062 : vector<2x32xf32>
    %cst_235 = arith.constant 1.000000e+00 : f32
    %1064 = vector.broadcast %cst_235 : f32 to vector<2x32xf32>
    %1065 = arith.subf %1064, %1056 : vector<2x32xf32>
    %1066 = arith.mulf %1065, %1063 : vector<2x32xf32>
    %1067 = arith.mulf %1056, %1000 : vector<2x32xf32>
    %1068 = arith.addf %1066, %1067 : vector<2x32xf32>
    %c0_236 = arith.constant 0 : index
    %c6_237 = arith.constant 6 : index
    %c0_238 = arith.constant 0 : index
    %1069 = vector.load %arg16[%c0_236, %c6_237, %c0_238] : memref<2x8x64xf32, #tpu.memory_space<vmem>>, vector<2x1x32xf32>
    %1070 = vector.shape_cast %1069 : vector<2x1x32xf32> to vector<2x32xf32>
    %1071 = vector.shape_cast %1038 : vector<2x32xf32> to vector<2x1x32xf32>
    tpu.vector_store %arg16[%c0_236, %c6_237, %c0_238], %1071 {strides = array<i32>} : memref<2x8x64xf32, #tpu.memory_space<vmem>>, vector<2x1x32xf32>,
    %c0_239 = arith.constant 0 : index
    %c1_240 = arith.constant 1 : index
    %c32_241 = arith.constant 32 : index
    %1072 = vector.load %arg16[%c0_239, %c1_240, %c32_241] : memref<2x8x64xf32, #tpu.memory_space<vmem>>, vector<2x1x32xf32>
    %1073 = vector.shape_cast %1072 : vector<2x1x32xf32> to vector<2x32xf32>
    %1074 = vector.shape_cast %1068 : vector<2x32xf32> to vector<2x1x32xf32>
    tpu.vector_store %arg16[%c0_239, %c1_240, %c32_241], %1074 {strides = array<i32>} : memref<2x8x64xf32, #tpu.memory_space<vmem>>, vector<2x1x32xf32>,
    %cst_242 = arith.constant dense<0.000000e+00> : vector<2x96xf32>
    %1075 = tpu.matmul %1038, %589, %cst_242 {dimension_numbers = #tpu.dot_dimension_numbers<[1], [0], [0], [1], [0, 0, 1, 1], [], []>} : vector<2x32xf32>, vector<32x96xf32>, vector<2x96xf32> -> vector<2x96xf32>
    %cst_243 = arith.constant dense<0.000000e+00> : vector<2x96xf32>
    %1076 = tpu.matmul %1068, %590, %cst_243 {dimension_numbers = #tpu.dot_dimension_numbers<[1], [0], [0], [1], [0, 0, 1, 1], [], []>} : vector<2x32xf32>, vector<32x96xf32>, vector<2x96xf32> -> vector<2x96xf32>
    %1077 = vector.extract_strided_slice %583 {offsets = [0, 7, 0], sizes = [2, 1, 32], strides = [1, 1, 1]} : vector<2x8x32xf32> to vector<2x1x32xf32>
    %1078 = vector.shape_cast %1077 : vector<2x1x32xf32> to vector<2x32xf32>
    %1079 = vector.extract_strided_slice %1075 {offsets = [0, 0], sizes = [2, 32], strides = [1, 1]} : vector<2x96xf32> to vector<2x32xf32>
    %1080 = arith.addf %1078, %1079 : vector<2x32xf32>
    %1081 = arith.negf %1080 : vector<2x32xf32>
    %1082 = math.exp %1081 : vector<2x32xf32>
    %cst_244 = arith.constant 1.000000e+00 : f32
    %1083 = vector.broadcast %cst_244 : f32 to vector<2x32xf32>
    %1084 = arith.addf %1083, %1082 : vector<2x32xf32>
    %1085 = arith.divf %1083, %1084 : vector<2x32xf32>
    %1086 = vector.extract_strided_slice %584 {offsets = [0, 7, 0], sizes = [2, 1, 32], strides = [1, 1, 1]} : vector<2x8x32xf32> to vector<2x1x32xf32>
    %1087 = vector.shape_cast %1086 : vector<2x1x32xf32> to vector<2x32xf32>
    %1088 = vector.extract_strided_slice %1075 {offsets = [0, 32], sizes = [2, 32], strides = [1, 1]} : vector<2x96xf32> to vector<2x32xf32>
    %1089 = arith.addf %1087, %1088 : vector<2x32xf32>
    %1090 = arith.negf %1089 : vector<2x32xf32>
    %1091 = math.exp %1090 : vector<2x32xf32>
    %cst_245 = arith.constant 1.000000e+00 : f32
    %1092 = vector.broadcast %cst_245 : f32 to vector<2x32xf32>
    %1093 = arith.addf %1092, %1091 : vector<2x32xf32>
    %1094 = arith.divf %1092, %1093 : vector<2x32xf32>
    %1095 = vector.extract_strided_slice %585 {offsets = [0, 7, 0], sizes = [2, 1, 32], strides = [1, 1, 1]} : vector<2x8x32xf32> to vector<2x1x32xf32>
    %1096 = vector.shape_cast %1095 : vector<2x1x32xf32> to vector<2x32xf32>
    %1097 = vector.extract_strided_slice %1075 {offsets = [0, 64], sizes = [2, 32], strides = [1, 1]} : vector<2x96xf32> to vector<2x32xf32>
    %1098 = arith.addf %1097, %593 : vector<2x32xf32>
    %1099 = arith.mulf %1085, %1098 : vector<2x32xf32>
    %1100 = arith.addf %1096, %1099 : vector<2x32xf32>
    %1101 = math.tanh %1100 : vector<2x32xf32>
    %cst_246 = arith.constant 1.000000e+00 : f32
    %1102 = vector.broadcast %cst_246 : f32 to vector<2x32xf32>
    %1103 = arith.subf %1102, %1094 : vector<2x32xf32>
    %1104 = arith.mulf %1103, %1101 : vector<2x32xf32>
    %1105 = arith.mulf %1094, %1038 : vector<2x32xf32>
    %1106 = arith.addf %1104, %1105 : vector<2x32xf32>
    %1107 = vector.extract_strided_slice %586 {offsets = [0, 0, 0], sizes = [2, 1, 32], strides = [1, 1, 1]} : vector<2x8x32xf32> to vector<2x1x32xf32>
    %1108 = vector.shape_cast %1107 : vector<2x1x32xf32> to vector<2x32xf32>
    %1109 = vector.extract_strided_slice %1076 {offsets = [0, 0], sizes = [2, 32], strides = [1, 1]} : vector<2x96xf32> to vector<2x32xf32>
    %1110 = arith.addf %1108, %1109 : vector<2x32xf32>
    %1111 = arith.negf %1110 : vector<2x32xf32>
    %1112 = math.exp %1111 : vector<2x32xf32>
    %cst_247 = arith.constant 1.000000e+00 : f32
    %1113 = vector.broadcast %cst_247 : f32 to vector<2x32xf32>
    %1114 = arith.addf %1113, %1112 : vector<2x32xf32>
    %1115 = arith.divf %1113, %1114 : vector<2x32xf32>
    %1116 = vector.extract_strided_slice %587 {offsets = [0, 0, 0], sizes = [2, 1, 32], strides = [1, 1, 1]} : vector<2x8x32xf32> to vector<2x1x32xf32>
    %1117 = vector.shape_cast %1116 : vector<2x1x32xf32> to vector<2x32xf32>
    %1118 = vector.extract_strided_slice %1076 {offsets = [0, 32], sizes = [2, 32], strides = [1, 1]} : vector<2x96xf32> to vector<2x32xf32>
    %1119 = arith.addf %1117, %1118 : vector<2x32xf32>
    %1120 = arith.negf %1119 : vector<2x32xf32>
    %1121 = math.exp %1120 : vector<2x32xf32>
    %cst_248 = arith.constant 1.000000e+00 : f32
    %1122 = vector.broadcast %cst_248 : f32 to vector<2x32xf32>
    %1123 = arith.addf %1122, %1121 : vector<2x32xf32>
    %1124 = arith.divf %1122, %1123 : vector<2x32xf32>
    %1125 = vector.extract_strided_slice %588 {offsets = [0, 0, 0], sizes = [2, 1, 32], strides = [1, 1, 1]} : vector<2x8x32xf32> to vector<2x1x32xf32>
    %1126 = vector.shape_cast %1125 : vector<2x1x32xf32> to vector<2x32xf32>
    %1127 = vector.extract_strided_slice %1076 {offsets = [0, 64], sizes = [2, 32], strides = [1, 1]} : vector<2x96xf32> to vector<2x32xf32>
    %1128 = arith.addf %1127, %596 : vector<2x32xf32>
    %1129 = arith.mulf %1115, %1128 : vector<2x32xf32>
    %1130 = arith.addf %1126, %1129 : vector<2x32xf32>
    %1131 = math.tanh %1130 : vector<2x32xf32>
    %cst_249 = arith.constant 1.000000e+00 : f32
    %1132 = vector.broadcast %cst_249 : f32 to vector<2x32xf32>
    %1133 = arith.subf %1132, %1124 : vector<2x32xf32>
    %1134 = arith.mulf %1133, %1131 : vector<2x32xf32>
    %1135 = arith.mulf %1124, %1068 : vector<2x32xf32>
    %1136 = arith.addf %1134, %1135 : vector<2x32xf32>
    %c0_250 = arith.constant 0 : index
    %c7_251 = arith.constant 7 : index
    %c0_252 = arith.constant 0 : index
    %1137 = vector.load %arg16[%c0_250, %c7_251, %c0_252] : memref<2x8x64xf32, #tpu.memory_space<vmem>>, vector<2x1x32xf32>
    %1138 = vector.shape_cast %1137 : vector<2x1x32xf32> to vector<2x32xf32>
    %1139 = vector.shape_cast %1106 : vector<2x32xf32> to vector<2x1x32xf32>
    tpu.vector_store %arg16[%c0_250, %c7_251, %c0_252], %1139 {strides = array<i32>} : memref<2x8x64xf32, #tpu.memory_space<vmem>>, vector<2x1x32xf32>,
    %c0_253 = arith.constant 0 : index
    %c0_254 = arith.constant 0 : index
    %c32_255 = arith.constant 32 : index
    %1140 = vector.load %arg16[%c0_253, %c0_254, %c32_255] : memref<2x8x64xf32, #tpu.memory_space<vmem>>, vector<2x1x32xf32>
    %1141 = vector.shape_cast %1140 : vector<2x1x32xf32> to vector<2x32xf32>
    %1142 = vector.shape_cast %1136 : vector<2x32xf32> to vector<2x1x32xf32>
    tpu.vector_store %arg16[%c0_253, %c0_254, %c32_255], %1142 {strides = array<i32>} : memref<2x8x64xf32, #tpu.memory_space<vmem>>, vector<2x1x32xf32>,
    %c0_256 = arith.constant 0 : index
    %c0_257 = arith.constant 0 : index
    %c0_258 = arith.constant 0 : index
    %1143 = vector.load %arg16[%c0_256, %c0_257, %c0_258] : memref<2x8x64xf32, #tpu.memory_space<vmem>>, vector<2x8x64xf32>
    %c0_259 = arith.constant 0 : index
    %c0_260 = arith.constant 0 : index
    %c0_261 = arith.constant 0 : index
    %1144 = vector.load %arg15[%c0_259, %c0_260, %c0_261] : memref<2x8x64xf32, #tpu.memory_space<vmem>>, vector<2x8x64xf32>
    tpu.vector_store %arg15[%c0_259, %c0_260, %c0_261], %1143 {strides = array<i32>} : memref<2x8x64xf32, #tpu.memory_space<vmem>>, vector<2x8x64xf32>,
    return
  }
}

</mosaic_0001>

<bundles_post_ra>
// kernel: tpu_custom_call.1
= control target key start
LH: loop header
LB: loop body
LE: loop exit
PB: predicated region body
PF: predicated region fallthrough
CT: control target
= control target key end

     0   :  { %s8660_s0 = inlined_call_operand.vmem [shape: f32[2,8,5], index: 0, kind: input, shape index: {}]   ;;  %s8661_s1 = inlined_call_operand.hbm [shape: f32[5,16], index: 1, kind: input, shape index: {}]   ;;  %s8662_s2 = inlined_call_operand.vmem [shape: f32[1,16], index: 2, kind: input, shape index: {}]   ;;  %s8663_s3 = inlined_call_operand.vmem [shape: f32[16,192], index: 3, kind: input, shape index: {}]   ;;  %s8664_s4 = inlined_call_operand.vmem [shape: f32[1,192], index: 4, kind: input, shape index: {}]   ;;  %s8665_s5 = inlined_call_operand.hbm [shape: f32[32,96], index: 5, kind: input, shape index: {}]   ;;  %s8666_s6 = inlined_call_operand.hbm [shape: f32[32,96], index: 6, kind: input, shape index: {}]   ;;  %s8667_s7 = inlined_call_operand.hbm [shape: f32[1,32], index: 7, kind: input, shape index: {}]   ;;  %s8668_s8 = inlined_call_operand.hbm [shape: f32[1,32], index: 8, kind: input, shape index: {}]   ;;  %s8669_s9 = inlined_call_operand.hbm [shape: f32[64,192], index: 9, kind: input, shape index: {}]   ;;  %s8670_s10 = inlined_call_operand.hbm [shape: f32[1,192], index: 10, kind: input, shape index: {}]   ;;  %s8671_s11 = inlined_call_operand.vmem [shape: f32[32,96], index: 11, kind: input, shape index: {}]   ;;  %s8672_s12 = inlined_call_operand.hbm [shape: f32[32,96], index: 12, kind: input, shape index: {}]   ;;  %s8673_s13 = inlined_call_operand.vmem [shape: f32[1,32], index: 13, kind: input, shape index: {}]   ;;  %s8674_s14 = inlined_call_operand.vmem [shape: f32[1,32], index: 14, kind: input, shape index: {}]   ;;  %s8675_s15 = inlined_call_operand.hbm [shape: f32[2,8,64], index: 15, kind: output, shape index: {}]  }
   0x1   :  { %8684 = sst [smem:[#allocation24_spill]] %s8675_s15 }
   0x2   :  { %20 = vsyncpa [#allocation4], 0 }
   0x3   :  { %21 = vsyncpa [#allocation7], 0 }
   0x4   :  { %22 = vsyncpa [#allocation10], 0 }
   0x5   :  { %23 = vsyncpa [#allocation13], 0 }
   0x6   :  { %24 = vsyncpa [#allocation16], 0 }
   0x7   :  { %25 = vsyncpa [#allocation5], 0  ;;  %s7159_s18 = smov [#allocation6]   ;;  %s6949_s22 = scalar_lea.hbm %s8665_s5, 512 }
   0x8   :  { %s49_s19 = sshll.u32 %s7159_s18, 4  ;;  %p6950_p0 = scmp.ne.s32.totalorder %s8665_s5, %s6949_s22  ;;  %s50_s19 = int_to_ptr.vmem [resolvable:$true] %s49_s19 }
   0x9   :  { %p6953_p1 = scmp.lt.u32.totalorder %s6949_s22, %s8665_s5 }
   0xb   :  { %p6955_p2 = pnand %p6953_p1, %p6950_p0 }
   0xd   :  { %6958 = shalt.err (!%p6955_p2)
}
   0xe   :  { %s6959_s27 = scalar_lea.vmem %s50_s19, 512  ;;  %p6964_p4 = scmp.lt.s32.totalorder %s50_s19, %s50_s19 }
   0xf   :  { %p6960_p3 = scmp.ne.s32.totalorder %s50_s19, %s6959_s27  ;;  %p6965_p5 = scmp.lt.s32.totalorder %s6959_s27, %s6959_s27 }
  0x11   :  { %p6966_p6 = por %p6965_p5, %p6964_p4 }
  0x13   :  { %p6967_p7 = pnand %p6966_p6, %p6960_p3 }
  0x15   :  { %6970 = shalt.err (!%p6967_p7)
}
  0x16   :  { %s7160_s28 = smov 128   ;;  %s7161_s29 = smov 8  }
  0x17   :  { %55 = dma.hbm_to_vmem [thread:$0]  %s8665_s5, 512, %s50_s19, [#allocation7], %s7160_s28, %s7160_s28, %s7161_s29  }
  0x18   :  { %s7162_s17 = smov [#allocation9]   ;;  %s7163_s20 = smov [#allocation12]  }
  0x19   :  { %s74_s18 = sshll.u32 %s7162_s17, 4  ;;  %s93_s21 = sshll.u32 %s7163_s20, 4  ;;  %s75_s18 = int_to_ptr.vmem [resolvable:$true] %s74_s18  ;;  %s94_s21 = int_to_ptr.vmem [resolvable:$true] %s93_s21 }
  0x1a   :  { %s6971_s24 = scalar_lea.hbm %s8667_s7, 16 }
  0x1b   :  { %p6972_p8 = scmp.ne.s32.totalorder %s8667_s7, %s6971_s24  ;;  %p6975_p9 = scmp.lt.u32.totalorder %s6971_s24, %s8667_s7 }
  0x1d   :  { %p6977_p10 = pnand %p6975_p9, %p6972_p8 }
  0x1f   :  { %6980 = shalt.err (!%p6977_p10)
}
  0x20   :  { %s6981_s5 = scalar_lea.vmem %s75_s18, 16  ;;  %s6985_s19 = scalar_lea.vmem %s75_s18, 32 }
  0x21   :  { %p6982_p11 = scmp.ne.s32.totalorder %s75_s18, %s6981_s5  ;;  %p6986_p12 = scmp.lt.s32.totalorder %s75_s18, %s75_s18 }
  0x22   :  { %p6987_p13 = scmp.lt.s32.totalorder %s6985_s19, %s6981_s5 }
  0x24   :  { %p6988_p0 = por %p6987_p13, %p6986_p12 }
  0x26   :  { %p6989_p1 = pnand %p6988_p0, %p6982_p11 }
  0x28   :  { %6992 = shalt.err (!%p6989_p1)
}
  0x29   :  { %77 = dma.hbm_to_vmem [thread:$0]  %s8667_s7, 16, %s75_s18, [#allocation10]  }
  0x2a   :  { %s6993_s15 = scalar_lea.hbm %s8669_s9, 2048 }
  0x2b   :  { %p6994_p2 = scmp.ne.s32.totalorder %s8669_s9, %s6993_s15  ;;  %p6997_p3 = scmp.lt.u32.totalorder %s6993_s15, %s8669_s9 }
  0x2d   :  { %p6999_p4 = pnand %p6997_p3, %p6994_p2 }
  0x2f   :  { %7002 = shalt.err (!%p6999_p4)
}
  0x30   :  { %s7003_s26 = scalar_lea.vmem %s94_s21, 2048  ;;  %p7008_p6 = scmp.lt.s32.totalorder %s94_s21, %s94_s21 }
  0x31   :  { %p7004_p5 = scmp.ne.s32.totalorder %s94_s21, %s7003_s26  ;;  %p7009_p7 = scmp.lt.s32.totalorder %s7003_s26, %s7003_s26 }
  0x33   :  { %p7010_p8 = por %p7009_p7, %p7008_p6 }
  0x35   :  { %p7011_p9 = pnand %p7010_p8, %p7004_p5 }
  0x37   :  { %7014 = shalt.err (!%p7011_p9)
}
  0x38   :  { %s7164_s7 = smov 256   ;;  %s7165_s18 = smov 16  }
  0x39   :  { %99 = dma.hbm_to_vmem [thread:$0]  %s8669_s9, 2048, %s94_s21, [#allocation13], %s7164_s7, %s7164_s7, %s7165_s18  }
  0x3a   :  { %s7166_s19 = smov [#allocation3]   ;;  %s7167_s16 = smov [#allocation8]  }
  0x3b   :  { %s34_s30 = sshll.u32 %s7166_s19, 4  ;;  %s61_s17 = sshll.u32 %s7167_s16, 4  ;;  %s35_s30 = int_to_ptr.vmem [resolvable:$true] %s34_s30  ;;  %s62_s17 = int_to_ptr.vmem [resolvable:$true] %s61_s17 }
  0x3c   :  { %s7015_s22 = scalar_lea.hbm %s8661_s1, 128 }
  0x3d   :  { %p7016_p10 = scmp.ne.s32.totalorder %s8661_s1, %s7015_s22  ;;  %p7019_p11 = scmp.lt.u32.totalorder %s7015_s22, %s8661_s1 }
  0x3f   :  { %p7021_p12 = pnand %p7019_p11, %p7016_p10 }
  0x41   :  { %7024 = shalt.err (!%p7021_p12)
}
  0x42   :  { %s7025_s9 = scalar_lea.vmem %s35_s30, 128  ;;  %p7030_p0 = scmp.lt.s32.totalorder %s35_s30, %s35_s30 }
  0x43   :  { %p7026_p13 = scmp.ne.s32.totalorder %s35_s30, %s7025_s9  ;;  %p7031_p1 = scmp.lt.s32.totalorder %s7025_s9, %s7025_s9 }
  0x45   :  { %p7032_p2 = por %p7031_p1, %p7030_p0 }
  0x47   :  { %p7033_p3 = pnand %p7032_p2, %p7026_p13 }
  0x49   :  { %7036 = shalt.err (!%p7033_p3)
}
  0x4a   :  { %37 = dma.hbm_to_vmem [thread:$0]  %s8661_s1, 128, %s35_s30, [#allocation4]  }
  0x4b   :  { %s7037_s5 = scalar_lea.hbm %s8666_s6, 512 }
  0x4c   :  { %p7038_p4 = scmp.ne.s32.totalorder %s8666_s6, %s7037_s5  ;;  %p7041_p5 = scmp.lt.u32.totalorder %s7037_s5, %s8666_s6 }
  0x4e   :  { %p7043_p6 = pnand %p7041_p5, %p7038_p4 }
  0x50   :  { %7046 = shalt.err (!%p7043_p6)
}
  0x51   :  { %s7047_s22 = scalar_lea.vmem %s62_s17, 512  ;;  %p7052_p8 = scmp.lt.s32.totalorder %s62_s17, %s62_s17 }
  0x52   :  { %p7048_p7 = scmp.ne.s32.totalorder %s62_s17, %s7047_s22  ;;  %p7053_p9 = scmp.lt.s32.totalorder %s7047_s22, %s7047_s22 }
  0x54   :  { %p7054_p10 = por %p7053_p9, %p7052_p8 }
  0x56   :  { %p7055_p11 = pnand %p7054_p10, %p7048_p7 }
  0x58   :  { %7058 = shalt.err (!%p7055_p11)
}
  0x59   :  { %67 = dma.hbm_to_vmem [thread:$0]  %s8666_s6, 512, %s62_s17, [#allocation7], %s7160_s28, %s7160_s28, %s7161_s29  }
  0x5a   :  { %s7168_s23 = smov [#allocation11]   ;;  %s7169_s25 = smov [#allocation14]  }
  0x5b   :  { %s84_s24 = sshll.u32 %s7168_s23, 4  ;;  %s106_s26 = sshll.u32 %s7169_s25, 4  ;;  %s85_s24 = int_to_ptr.vmem [resolvable:$true] %s84_s24  ;;  %s107_s26 = int_to_ptr.vmem [resolvable:$true] %s106_s26 }
  0x5c   :  { %s7059_s7 = scalar_lea.hbm %s8668_s8, 16 }
  0x5d   :  { %p7060_p12 = scmp.ne.s32.totalorder %s8668_s8, %s7059_s7  ;;  %p7063_p13 = scmp.lt.u32.totalorder %s7059_s7, %s8668_s8 }
  0x5f   :  { %p7065_p0 = pnand %p7063_p13, %p7060_p12 }
  0x61   :  { %7068 = shalt.err (!%p7065_p0)
}
  0x62   :  { %s7069_s6 = scalar_lea.vmem %s85_s24, 16  ;;  %s7073_s17 = scalar_lea.vmem %s85_s24, 32 }
  0x63   :  { %p7070_p1 = scmp.ne.s32.totalorder %s85_s24, %s7069_s6  ;;  %p7074_p2 = scmp.lt.s32.totalorder %s85_s24, %s85_s24 }
  0x64   :  { %p7075_p3 = scmp.lt.s32.totalorder %s7073_s17, %s7069_s6 }
  0x66   :  { %p7076_p4 = por %p7075_p3, %p7074_p2 }
  0x68   :  { %p7077_p5 = pnand %p7076_p4, %p7070_p1 }
  0x6a   :  { %7080 = shalt.err (!%p7077_p5)
}
  0x6b   :  { %87 = dma.hbm_to_vmem [thread:$0]  %s8668_s8, 16, %s85_s24, [#allocation10]  }
  0x6c   :  { %s7081_s1 = scalar_lea.hbm %s8670_s10, 32 }
  0x6d   :  { %p7082_p6 = scmp.ne.s32.totalorder %s8670_s10, %s7081_s1  ;;  %p7085_p7 = scmp.lt.u32.totalorder %s7081_s1, %s8670_s10 }
  0x6f   :  { %p7087_p8 = pnand %p7085_p7, %p7082_p6 }
  0x71   :  { %7090 = shalt.err (!%p7087_p8)
}
  0x72   :  { %s7091_s21 = scalar_lea.vmem %s107_s26, 32  ;;  %p7096_p10 = scmp.lt.s32.totalorder %s107_s26, %s107_s26 }
  0x73   :  { %p7092_p9 = scmp.ne.s32.totalorder %s107_s26, %s7091_s21  ;;  %p7097_p11 = scmp.lt.s32.totalorder %s7091_s21, %s7091_s21 }
  0x75   :  { %p7098_p12 = por %p7097_p11, %p7096_p10 }
  0x77   :  { %p7099_p13 = pnand %p7098_p12, %p7092_p9 }
  0x79   :  { %7102 = shalt.err (!%p7099_p13)
}
  0x7a   :  { %109 = dma.hbm_to_vmem [thread:$0]  %s8670_s10, 32, %s107_s26, [#allocation13]  }
  0x7b   :  { %s7170_s7 = smov [#allocation15]   ;;  %s7103_s19 = scalar_lea.hbm %s8672_s12, 512 }
  0x7c   :  { %s117_s18 = sshll.u32 %s7170_s7, 4  ;;  %p7104_p0 = scmp.ne.s32.totalorder %s8672_s12, %s7103_s19  ;;  %s118_s18 = int_to_ptr.vmem [resolvable:$true] %s117_s18 }
  0x7d   :  { %p7107_p1 = scmp.lt.u32.totalorder %s7103_s19, %s8672_s12 }
  0x7f   :  { %p7109_p2 = pnand %p7107_p1, %p7104_p0 }
  0x81   :  { %7112 = shalt.err (!%p7109_p2)
}
  0x82   :  { %s7113_s15 = scalar_lea.vmem %s118_s18, 512  ;;  %p7118_p4 = scmp.lt.s32.totalorder %s118_s18, %s118_s18 }
  0x83   :  { %p7114_p3 = scmp.ne.s32.totalorder %s118_s18, %s7113_s15  ;;  %p7119_p5 = scmp.lt.s32.totalorder %s7113_s15, %s7113_s15 }
  0x85   :  { %p7120_p6 = por %p7119_p5, %p7118_p4 }
  0x87   :  { %p7121_p7 = pnand %p7120_p6, %p7114_p3 }
  0x89   :  { %7124 = shalt.err (!%p7121_p7)
}
  0x8a   :  { %123 = dma.hbm_to_vmem [thread:$0]  %s8672_s12, 512, %s118_s18, [#allocation16], %s7160_s28, %s7160_s28, %s7161_s29  }
  0x8b   :  { %7147 = dma.done.wait [#allocation4], 128  }
  0x8c   :  { %7148 = vsyncadd [#allocation4], 4294967168 }
  0x8d   :  { %7149 = dma.done.wait [#allocation7], 1024  }
  0x8e   :  { %7150 = vsyncadd [#allocation7], 4294966272 }
  0x8f   :  { %7151 = dma.done.wait [#allocation10], 32  }
  0x90   :  { %7152 = vsyncadd [#allocation10], 4294967264 }
  0x91   :  { %7153 = dma.done.wait [#allocation13], 2080  }
  0x92   :  { %7154 = vsyncadd [#allocation13], 4294965216 }
  0x93   :  { %7155 = dma.done.wait [#allocation16], 512  }
  0x94   :  { %7156 = vsyncadd [#allocation16], 4294966784  ;;  %v7171_v0 = vmov 0.0   ;;  %vm169_vm0 = vcmask 1044480   ;;  %vm162_vm1 = vcmask 39936   ;;  %v152_v2 = vld [vmem:[%s8660_s0] sm:$0xff]  ;;  %v256_v36 = vlaneseq }
  0x95   :  { %337 = vmatprep.mubr.f32.mxu1 %v7171_v0  ;;  %v154_v1 = vld [vmem:[#allocation3] sm:$0x1f]  ;;  %v153_v3 = vld [vmem:[%s8660_s0 + $0x8] sm:$0xff]  ;;  %5851 = vmatprep.mubr.msk.f32.mxu0 %vm162_vm1, %v152_v2  ;;  %v350_v4 = vld [vmem:[#allocation6] sm:$0xff]  ;;  %v7172_v9 = vmov 0.0|0.0   ;;  %vm7173_vm2 = vmmov 0  }
  0x96   :  { %5849 = vmatprep.subr.msk.mxu0 %vm169_vm0, %v154_v1  ;;  %v351_v5 = vld [vmem:[#allocation6 + $0x8] sm:$0xff]  ;;  %v352_v6 = vld [vmem:[#allocation6 + $0x10] sm:$0xff]  ;;  %v353_v8 = vld [vmem:[#allocation6 + $0x18] sm:$0xff]  ;;  %s7174_s18 = smov 64   ;;  %vm266_vm3 = vcmask 130048   ;;  %v7430_v37 = vshrl.u32 %v256_v36, 7 }
  0x97   :  { %5850 = vmatpush3.msk.msra.mxu0 %vm169_vm0, %v154_v1  ;;  %v7370_v7 = vpack.c.bf16 %v351_v5, %v350_v4  ;;  %v7374_v10 = vpack.c.bf16 %v353_v8, %v352_v6  ;;  %v251_v11 = vld [vmem:[%s8663_s3 + $0x8] sm:$0xff]  ;;  %v253_v12 = vld [vmem:[%s8663_s3 + $0x18] sm:$0xff]  ;;  %v250_v14 = vld [vmem:[%s8663_s3] sm:$0xff]  ;;  %vm8678_vm4 = vcmask 1041409   ;;  %s7176_s19 = smov 32   ;;  %vm8677_vm5 = vcmask 261120  }
  0x98   :  { %5852 = vmatmul.mubr.msk.f32.vlgmr.msra.gmra.mrb[0].mxu0 %vm162_vm1, %v153_v3  ;;  %6210 = vmatprep.subr.bf16.mxu0 %v7172_v9  ;;  %v6206_v13 = vpack.c.bf16 %v253_v12, %v251_v11  ;;  %v252_v15 = vld [vmem:[%s8663_s3 + $0x10] sm:$0xff]  ;;  %v5556_v17 = vld [vmem:[#allocation9] ss:$0 sm:$0xff]  ;;  %v5550_v18 = vld [vmem:[%s8662_s2] ss:$0 sm:$0xff]  ;;  %v258_v38 = vsub.s32 0, %v7430_v37 }
  0x99   :  { %6212 = vmatpush3.bf16.msra.mxu0 %v7370_v7  ;;  %5862 = vmatprep.mubr.msk.f32.mxu0 %vm7173_vm2, %v7171_v0  ;;  %v6208_v16 = vpack.c.bf16 %v252_v15, %v250_v14  ;;  %v354_v20 = vld [vmem:[#allocation8] sm:$0xff]  ;;  %v355_v21 = vld [vmem:[#allocation8 + $0x8] sm:$0xff]  ;;  %v356_v27 = vld [vmem:[#allocation8 + $0x10] sm:$0xff]  ;;  %vm673_vm6 = vcmask 523527   ;;  %vm988_vm7 = vcmask 522502   ;;  %vm1305_vm8 = vcmask 521477  }
  0x9a   :  { %6213 = vmatprep.subr.bf16.mxu0 %v7172_v9  ;;  %6207 = vmatprep.subr.bf16.mxu1 %v6206_v13  ;;  %v7405_v24 = vpack.c.bf16 %v355_v21, %v354_v20  ;;  %v357_v28 = vld [vmem:[#allocation8 + $0x18] sm:$0xff]  ;;  %v7436_v39 = vld [vmem:[%s8664_s4] sm:$0x3]  ;;  %s7175_s4 = smov 96   ;;  %v5557_v8 = vld [vmem:[#allocation11] ss:$0 sm:$0xff] }
  0x9b   :  { %6209 = vmatpush1.bf16.msra.mxu1 %v6208_v16  ;;  %532 = vrot.lane.b32.xlu0 %v5556_v17, %s7174_s18  ;;  %v7412_v30 = vpack.c.bf16 %v357_v28, %v356_v27  ;;  %v259_v40 = vrot.slane %v7436_v39, %v258_v38  ;;  %vm1623_vm9 = vcmask 520452   ;;  %vm662_vm10 = vcmask 253952  }
  0x9c   :  { %6216 = vmatprep.subr.bf16.mxu1 %v7172_v9  ;;  %vm977_vm11 = vcmask 254977   ;;  %vm2574_vm12 = vcmask 517377   ;;  %vm1294_vm13 = vcmask 256002   ;;  %vm2259_vm14 = vcmask 518402  }
  0x9d   :  { %6215 = vmatpush3.bf16.msra.mxu0 %v7374_v10  ;;  %vm1612_vm15 = vcmask 257027   ;;  %vm1941_vm0 = vcmask 519427   ;;  %vm1930_vm1 = vcmask 258052  }
  0x9e   :  { %6222 = vmatprep.subr.bf16.mxu0 %v7172_v9 }
  0xa0   :  { %5863 = vmatmul.mubr.f32.vlgmr.msra.gmra.mrb[2].mxu0 %v7171_v0 }
  0xa1   :  { %6224 = vmatpush3.bf16.msra.mxu0 %v7370_v7  ;;  %5884 = vmatprep.mubr.msk.f32.mxu0 %vm7173_vm2, %v7171_v0 }
  0xa2   :  { %6225 = vmatprep.subr.bf16.mxu0 %v7172_v9 }
  0xa5   :  { %6227 = vmatpush3.bf16.msra.mxu0 %v7374_v10 }
  0xa6   :  { %6234 = vmatprep.subr.bf16.mxu0 %v7172_v9 }
 0x10d   :  { %v7408_v29 = vpop.permute.xlu0 %532 }
 0x16b   :  { %v5853_v19 = vpop.f32.mrb[0].mxu0 }
 0x16c   :  { %v239_v22 = vpop.f32.mrb[1].mxu0  ;;  %v245_v25 = vadd.f32 %v5853_v19, %v5550_v18 }
 0x16d   :  { %v240_v23 = vadd.f32 %v5550_v18, %v239_v22 }
 0x16e   :  { %v249_v31 = vmax.f32 %v245_v25, 0.0 }
 0x16f   :  { %v248_v26 = vmax.f32 %v240_v23, 0.0 }
 0x171   :  { %5554 = vmatmul.mubr.msk.f32.vlgmr.msra.gmra.mrb[0].mxu1 %vm266_vm3, %v248_v26 }
 0x172   :  { %343 = vmatprep.mubr.f32.mxu1 %v7171_v0  ;;  %6218 = vmatpush3.bf16.msra.mxu1 %v7405_v24 }
 0x173   :  { %v440_v32 = vpop.f32.mrb[2].mxu0  ;;  %6219 = vmatprep.subr.bf16.mxu1 %v7172_v9 }
 0x174   :  { %v5864_v33 = vpop.f32.mrb[3].mxu0  ;;  %v535_v34 = vadd.f32 %v7408_v29, %v440_v32  ;;  %v515_v46 = vrot.slane %v440_v32, 1 }
 0x175   :  { %5555 = vmatmul.mubr.msk.f32.gmra.mrb[2].mxu1 %vm266_vm3, %v249_v31  ;;  %vm8680_vm3 = vcmask 259077  }
 0x176   :  { %538 = vrot.lane.b32.xlu1 %v535_v34, %s7174_s18  ;;  %v537_v35 = vrot.slane %v535_v34, 1  ;;  %6221 = vmatpush3.bf16.msra.mxu1 %v7412_v30 }
 0x177   :  { %5873 = vmatprep.mubr.msk.f32.mxu1 %vm7173_vm2, %v7171_v0  ;;  %6228 = vmatprep.subr.bf16.mxu1 %v7172_v9 }
 0x178   :  { %540 = vrot.lane.b32.xlu0 %v537_v35, %s7174_s18 }
 0x179   :  { %5874 = vmatmul.mubr.f32.vlgmr.msra.gmra.mrb[4].mxu1 %v7171_v0 }
 0x17a   :  { %6230 = vmatpush3.bf16.msra.mxu1 %v7405_v24  ;;  %5895 = vmatprep.mubr.msk.f32.mxu1 %vm7173_vm2, %v7171_v0 }
 0x17b   :  { %6231 = vmatprep.subr.bf16.mxu1 %v7172_v9 }
 0x17e   :  { %6233 = vmatpush3.bf16.msra.mxu1 %v7412_v30 }
 0x17f   :  { %6240 = vmatprep.subr.bf16.mxu1 %v7172_v9 }
 0x1e8   :  { %v539_v56 = vpop.permute.xlu1 %538 }
 0x1ea   :  { %v541_v59 = vpop.permute.xlu0 %540 }
 0x244   :  { %v339_v41 = vpop.f32.mrb[0].mxu1 }
 0x245   :  { %v7441_v42 = vadd.f32 %v339_v41, %v259_v40  ;;  %v7443_v43 = vpop.f32.mrb[1].mxu1 }
 0x247   :  { %v518_v44 = vadd.f32 %v440_v32, %v7441_v42 }
 0x248   :  { %v345_v45 = vpop.f32.mrb[2].mxu1 }
 0x249   :  { %v7446_v47 = vadd.f32 %v345_v45, %v259_v40  ;;  %v7448_v48 = vpop.f32.mrb[3].mxu1  ;;  %v5558_v49 = vmul.f32 -1.442695, %v518_v44 }
 0x24b   :  { %6437 = vpow2.f32 %v5558_v49  ;;  %v519_v50 = vadd.f32 %v515_v46, %v7446_v47 }
 0x24c   :  { %v510_v62 = vpop.f32.mrb[4].mxu1 }
 0x24d   :  { %v5559_v51 = vmul.f32 -1.442695, %v519_v50  ;;  %v5875_v63 = vpop.f32.mrb[5].mxu1  ;;  %v575_v11 = vrot.slane %v510_v62, 1  ;;  %v576_v28 = vrot.slane %v510_v62, 2 }
 0x24f   :  { %6439 = vpow2.f32 %v5559_v51 }
 0x255   :  { %v6438_v52 = vpop.eup %6437 }
 0x256   :  { %v526_v53 = vadd.f32 1.0, %v6438_v52 }
 0x258   :  { %6441 = vrcp.f32 %v526_v53 }
 0x259   :  { %v6440_v54 = vpop.eup %6439 }
 0x25a   :  { %v527_v55 = vadd.f32 1.0, %v6440_v54 }
 0x25c   :  { %6443 = vrcp.f32 %v527_v55 }
 0x262   :  { %v6442_v57 = vpop.eup %6441 }
 0x263   :  { %v544_v58 = vmul.f32 %v6442_v57, %v539_v56  ;;  %v558_v13 = vsub.f32 1.0, %v6442_v57  ;;  %v570_v19 = vmul.f32 0.0, %v6442_v57  ;;  %v262_v56 = vsub.s32 1, %v7430_v37 }
 0x265   :  { %548 = vrot.lane.b32.xlu0 %v544_v58, %s7174_s18  ;;  %v263_v57 = vrot.slane %v7436_v39, %v262_v56 }
 0x266   :  { %v6444_v60 = vpop.eup %6443 }
 0x267   :  { %v545_v61 = vmul.f32 %v6444_v60, %v541_v59  ;;  %v559_v14 = vsub.f32 1.0, %v6444_v60  ;;  %v571_v17 = vmul.f32 0.0, %v6444_v60  ;;  %v7491_v58 = vadd.f32 %v7443_v43, %v263_v57 }
 0x269   :  { %550 = vrot.lane.b32.xlu1 %v545_v61, %s7174_s18 }
 0x2d7   :  { %v549_v1 = vpop.permute.xlu0 %548 }
 0x2d8   :  { %v554_v2 = vadd.f32 %v549_v1, %v7441_v42 }
 0x2da   :  { %6445 = vtanh.f32 %v554_v2 }
 0x2db   :  { %v551_v3 = vpop.permute.xlu1 %550 }
 0x2dc   :  { %v555_v4 = vadd.f32 %v551_v3, %v7446_v47 }
 0x2de   :  { %6447 = vtanh.f32 %v555_v4 }
 0x2e4   :  { %v6446_v5 = vpop.eup %6445 }
 0x2e5   :  { %562 = vrot.lane.b32.xlu0 %v6446_v5, %s7175_s4 }
 0x2e8   :  { %v6448_v6 = vpop.eup %6447 }
 0x2e9   :  { %564 = vrot.lane.b32.xlu1 %v6448_v6, %s7175_s4 }
 0x2ed   :  { %611 = vrot.lane.b32.xlu1 %v5557_v8, %s7174_s18 }
 0x2f1   :  { %577 = vrot.lane.b32.xlu1 %v575_v11, %s7175_s4 }
 0x357   :  { %v563_v12 = vpop.permute.xlu0 %562 }
 0x358   :  { %v568_v16 = vmul.f32 %v563_v12, %v558_v13 }
 0x35a   :  { %v7463_v22 = vadd.f32 %v570_v19, %v568_v16 }
 0x35b   :  { %v565_v15 = vpop.permute.xlu1 %564 }
 0x35c   :  { %v569_v18 = vmul.f32 %v565_v15, %v559_v14 }
 0x35e   :  { %v7459_v20 = vadd.f32 %v571_v17, %v569_v18 }
 0x35f   :  { %v7461_v21 = vpop.permute.xlu1 %611 }
 0x360   :  { %v676_v23 = vrot.slane %v7459_v20, 7  ;;  %v614_v25 = vadd.f32 %v7461_v21, %v510_v62  ;;  %v7496_v62 = vadd.f32 %v7448_v48, %v263_v57 }
 0x362   :  { %v678_v26 = vsel %vm8678_vm4, %v676_v23, %v7463_v22  ;;  %v616_v27 = vrot.slane %v614_v25, 1  ;;  %v617_v31 = vrot.slane %v614_v25, 2 }
 0x363   :  { %679 = vrot.lane.b32.xlu0 %v678_v26, %s7175_s4  ;;  %v578_v32 = vpop.permute.xlu1 %577 }
 0x364   :  { %618 = vrot.lane.b32.xlu1 %v616_v27, %s7176_s19  ;;  %v583_v33 = vadd.f32 %v578_v32, %v7441_v42  ;;  %v597_v5 = vadd.f32 %v578_v32, %v7491_v58 }
 0x366   :  { %v5560_v34 = vmul.f32 -1.442695, %v583_v33  ;;  %v5562_v48 = vmul.f32 -1.442695, %v597_v5 }
 0x367   :  { %579 = vrot.lane.b32.xlu0 %v576_v28, %s7175_s4 }
 0x368   :  { %6449 = vpow2.f32 %v5560_v34 }
 0x36b   :  { %620 = vrot.lane.b32.xlu0 %v617_v31, %s7176_s19 }
 0x372   :  { %v6450_v35 = vpop.eup %6449 }
 0x373   :  { %v591_v36 = vadd.f32 1.0, %v6450_v35 }
 0x375   :  { %6451 = vrcp.f32 %v591_v36 }
 0x37f   :  { %v6452_v41 = vpop.eup %6451 }
 0x3d5   :  { %v680_v40 = vpop.permute.xlu0 %679 }
 0x3d6   :  { %v619_v44 = vpop.permute.xlu1 %618  ;;  %5885 = vmatmul.mubr.msk.f32.vlgmr.msra.gmra.mrb[4].mxu0 %vm8677_vm5, %v680_v40 }
 0x3d7   :  { %v624_v45 = vmul.f32 %v6452_v41, %v619_v44  ;;  %6236 = vmatpush3.bf16.msra.mxu0 %v7370_v7  ;;  %5906 = vmatprep.mubr.msk.f32.mxu0 %vm7173_vm2, %v7171_v0 }
 0x3d8   :  { %6237 = vmatprep.subr.bf16.mxu0 %v7172_v9 }
 0x3d9   :  { %628 = vrot.lane.b32.xlu1 %v624_v45, %s7174_s18  ;;  %v580_v46 = vpop.permute.xlu0 %579 }
 0x3da   :  { %v584_v49 = vadd.f32 %v580_v46, %v7446_v47  ;;  %v598_v6 = vadd.f32 %v580_v46, %v7496_v62 }
 0x3db   :  { %6239 = vmatpush3.bf16.msra.mxu0 %v7374_v10 }
 0x3dc   :  { %v5561_v50 = vmul.f32 -1.442695, %v584_v49  ;;  %6246 = vmatprep.subr.bf16.mxu0 %v7172_v9  ;;  %v5563_v8 = vmul.f32 -1.442695, %v598_v6 }
 0x3dd   :  { %v621_v53 = vpop.permute.xlu0 %620 }
 0x3de   :  { %6453 = vpow2.f32 %v5561_v50 }
 0x3e8   :  { %v6454_v51 = vpop.eup %6453 }
 0x3e9   :  { %v592_v52 = vadd.f32 1.0, %v6454_v51 }
 0x3eb   :  { %6455 = vrcp.f32 %v592_v52 }
 0x3f5   :  { %v6456_v54 = vpop.eup %6455 }
 0x3f6   :  { %v625_v55 = vmul.f32 %v6456_v54, %v621_v53 }
 0x3f8   :  { %630 = vrot.lane.b32.xlu0 %v625_v55, %s7174_s18 }
 0x44b   :  { %v629_v59 = vpop.permute.xlu1 %628 }
 0x44c   :  { %v634_v60 = vadd.f32 %v629_v59, %v7491_v58 }
 0x44e   :  { %6457 = vtanh.f32 %v634_v60 }
 0x458   :  { %v6458_v61 = vpop.eup %6457 }
 0x459   :  { %642 = vrot.lane.b32.xlu1 %v6458_v61, %s7175_s4 }
 0x46a   :  { %v631_v63 = vpop.permute.xlu0 %630 }
 0x46b   :  { %v635_v1 = vadd.f32 %v631_v63, %v7496_v62 }
 0x46d   :  { %6459 = vtanh.f32 %v635_v1 }
 0x46e   :  { %6461 = vpow2.f32 %v5562_v48 }
 0x46f   :  { %6463 = vpow2.f32 %v5563_v8 }
 0x477   :  { %v6460_v2 = vpop.eup %6459 }
 0x478   :  { %644 = vrot.lane.b32.xlu0 %v6460_v2, %s7175_s4  ;;  %v6462_v11 = vpop.eup %6461 }
 0x479   :  { %v605_v12 = vadd.f32 1.0, %v6462_v11  ;;  %v6464_v13 = vpop.eup %6463 }
 0x47a   :  { %v606_v14 = vadd.f32 1.0, %v6464_v13 }
 0x47b   :  { %6465 = vrcp.f32 %v605_v12 }
 0x47c   :  { %6467 = vrcp.f32 %v606_v14 }
 0x485   :  { %v6466_v15 = vpop.eup %6465 }
 0x486   :  { %v638_v17 = vsub.f32 1.0, %v6466_v15  ;;  %v6468_v18 = vpop.eup %6467  ;;  %v650_v25 = vmul.f32 0.0, %v6466_v15  ;;  %v881_v15 = vrot.slane %v7463_v22, 7 }
 0x487   :  { %v639_v26 = vsub.f32 1.0, %v6468_v18  ;;  %v651_v31 = vmul.f32 0.0, %v6468_v18 }
 0x4a9   :  { %v749_v39 = vpop.f32.mrb[4].mxu0 }
 0x4aa   :  { %v846_v43 = vadd.f32 %v749_v39, %v7408_v29  ;;  %v5886_v3 = vpop.f32.mrb[5].mxu0  ;;  %v829_v40 = vrot.slane %v749_v39, 7  ;;  %v833_v41 = vadd.f32 %v749_v39, %v7446_v47 }
 0x4ac   :  { %851 = vrot.lane.b32.xlu0 %v846_v43, %s7174_s18  ;;  %v848_v4 = vrot.slane %v846_v43, 7  ;;  %v832_v44 = vadd.f32 %v829_v40, %v7441_v42  ;;  %v5567_v45 = vmul.f32 -1.442695, %v833_v41 }
 0x4ae   :  { %849 = vrot.lane.b32.xlu1 %v848_v4, %s7174_s18  ;;  %v5566_v46 = vmul.f32 -1.442695, %v832_v44  ;;  %6469 = vpow2.f32 %v5567_v45 }
 0x4b0   :  { %6471 = vpow2.f32 %v5566_v46 }
 0x4b8   :  { %v6470_v49 = vpop.eup %6469 }
 0x4b9   :  { %v841_v51 = vadd.f32 1.0, %v6470_v49 }
 0x4ba   :  { %v6472_v50 = vpop.eup %6471 }
 0x4bb   :  { %v840_v52 = vadd.f32 1.0, %v6472_v50  ;;  %6473 = vrcp.f32 %v841_v51 }
 0x4bd   :  { %6475 = vrcp.f32 %v840_v52 }
 0x4c5   :  { %v6474_v53 = vpop.eup %6473 }
 0x4c6   :  { %v870_v13 = vsub.f32 1.0, %v6474_v53 }
 0x4c7   :  { %v6476_v57 = vpop.eup %6475 }
 0x4c8   :  { %v869_v14 = vsub.f32 1.0, %v6476_v57  ;;  %v884_v18 = vmul.f32 %v6476_v57, %v881_v15 }
 0x4cb   :  { %v643_v16 = vpop.permute.xlu1 %642 }
 0x4cc   :  { %v648_v19 = vmul.f32 %v643_v16, %v638_v17 }
 0x4ce   :  { %v7505_v28 = vadd.f32 %v650_v25, %v648_v19  ;;  %v885_v25 = vmul.f32 %v6474_v53, %v676_v23 }
 0x4d0   :  { %v753_v34 = vrot.slane %v7505_v28, 7 }
 0x4ea   :  { %v645_v27 = vpop.permute.xlu0 %644 }
 0x4eb   :  { %v649_v32 = vmul.f32 %v645_v27, %v639_v26 }
 0x4ed   :  { %v7507_v33 = vadd.f32 %v651_v31, %v649_v32 }
 0x4ef   :  { %v754_v35 = vrot.slane %v7507_v33, 6 }
 0x4f1   :  { %v755_v36 = vsel %vm8678_vm4, %v754_v35, %v753_v34 }
 0x4f2   :  { %5896 = vmatmul.mubr.msk.f32.vlgmr.msra.gmra.mrb[6].mxu1 %vm8677_vm5, %v755_v36 }
 0x4f3   :  { %6242 = vmatpush3.bf16.msra.mxu1 %v7405_v24  ;;  %5917 = vmatprep.mubr.msk.f32.mxu1 %vm7173_vm2, %v7171_v0 }
 0x4f4   :  { %6243 = vmatprep.subr.bf16.mxu1 %v7172_v9 }
 0x4f7   :  { %6245 = vmatpush3.bf16.msra.mxu1 %v7412_v30 }
 0x4f8   :  { %6252 = vmatprep.subr.bf16.mxu1 %v7172_v9 }
 0x51e   :  { %v852_v54 = vpop.permute.xlu0 %851 }
 0x51f   :  { %v856_v55 = vmul.f32 %v6474_v53, %v852_v54 }
 0x520   :  { %v850_v59 = vpop.permute.xlu1 %849 }
 0x521   :  { %v855_v60 = vmul.f32 %v6476_v57, %v850_v59  ;;  %861 = vrot.lane.b32.xlu0 %v856_v55, %s7174_s18 }
 0x523   :  { %859 = vrot.lane.b32.xlu1 %v855_v60, %s7174_s18 }
 0x593   :  { %v862_v61 = vpop.permute.xlu0 %861 }
 0x594   :  { %v866_v63 = vadd.f32 %v862_v61, %v7446_v47 }
 0x595   :  { %v860_v1 = vpop.permute.xlu1 %859 }
 0x596   :  { %6477 = vtanh.f32 %v866_v63  ;;  %v865_v2 = vadd.f32 %v860_v1, %v7441_v42 }
 0x598   :  { %6479 = vtanh.f32 %v865_v2 }
 0x5a0   :  { %v6478_v39 = vpop.eup %6477 }
 0x5a1   :  { %875 = vrot.lane.b32.xlu0 %v6478_v39, %s7175_s4 }
 0x5a2   :  { %v6480_v43 = vpop.eup %6479 }
 0x5a3   :  { %873 = vrot.lane.b32.xlu1 %v6480_v43, %s7175_s4 }
 0x5c5   :  { %v824_v3 = vpop.f32.mrb[6].mxu1 }
 0x5c6   :  { %v889_v4 = vrot.slane %v824_v3, 2  ;;  %v890_v5 = vrot.slane %v824_v3, 3  ;;  %v925_v48 = vadd.f32 %v824_v3, %v7461_v21  ;;  %v5897_v6 = vpop.f32.mrb[7].mxu1 }
 0x5c8   :  { %891 = vrot.lane.b32.xlu1 %v889_v4, %s7175_s4  ;;  %893 = vrot.lane.b32.xlu0 %v890_v5, %s7175_s4  ;;  %v927_v8 = vrot.slane %v925_v48, 2  ;;  %v928_v11 = vrot.slane %v925_v48, 3 }
 0x5cc   :  { %929 = vrot.lane.b32.xlu1 %v927_v8, %s7176_s19  ;;  %931 = vrot.lane.b32.xlu0 %v928_v11, %s7176_s19 }
 0x613   :  { %v876_v12 = vpop.permute.xlu0 %875 }
 0x614   :  { %v880_v17 = vmul.f32 %v876_v12, %v870_v13 }
 0x615   :  { %v874_v16 = vpop.permute.xlu1 %873 }
 0x616   :  { %v879_v19 = vmul.f32 %v874_v16, %v869_v14  ;;  %v7537_v27 = vadd.f32 %v885_v25, %v880_v17  ;;  %v961_v14 = vrot.slane %v7505_v28, 1  ;;  %v962_v17 = vrot.slane %v7507_v33, 1 }
 0x618   :  { %v7535_v26 = vadd.f32 %v884_v18, %v879_v19 }
 0x61a   :  { %v991_v31 = vrot.slane %v7535_v26, 1 }
 0x61c   :  { %v992_v32 = vsel %vm8678_vm4, %v7537_v27, %v991_v31 }
 0x61d   :  { %993 = vrot.lane.b32.xlu1 %v992_v32, %s7175_s4 }
 0x63a   :  { %v892_v34 = vpop.permute.xlu1 %891  ;;  %v894_v35 = vpop.permute.xlu0 %893 }
 0x63b   :  { %v897_v36 = vadd.f32 %v892_v34, %v7441_v42  ;;  %v898_v40 = vadd.f32 %v894_v35, %v7446_v47  ;;  %v911_v39 = vadd.f32 %v892_v34, %v7491_v58  ;;  %v912_v43 = vadd.f32 %v894_v35, %v7496_v62 }
 0x63d   :  { %v5568_v41 = vmul.f32 -1.442695, %v897_v36  ;;  %v5569_v44 = vmul.f32 -1.442695, %v898_v40  ;;  %v5570_v3 = vmul.f32 -1.442695, %v911_v39 }
 0x63e   :  { %v930_v51 = vpop.permute.xlu1 %929  ;;  %v932_v54 = vpop.permute.xlu0 %931  ;;  %v5571_v4 = vmul.f32 -1.442695, %v912_v43 }
 0x63f   :  { %6481 = vpow2.f32 %v5568_v41 }
 0x640   :  { %6483 = vpow2.f32 %v5569_v44 }
 0x649   :  { %v6482_v23 = vpop.eup %6481 }
 0x64a   :  { %v905_v45 = vadd.f32 1.0, %v6482_v23  ;;  %v6484_v46 = vpop.eup %6483 }
 0x64b   :  { %v906_v49 = vadd.f32 1.0, %v6484_v46 }
 0x64c   :  { %6485 = vrcp.f32 %v905_v45 }
 0x64d   :  { %6487 = vrcp.f32 %v906_v49 }
 0x656   :  { %v6486_v50 = vpop.eup %6485 }
 0x657   :  { %v935_v52 = vmul.f32 %v6486_v50, %v930_v51  ;;  %v6488_v53 = vpop.eup %6487 }
 0x658   :  { %v936_v55 = vmul.f32 %v6488_v53, %v932_v54 }
 0x659   :  { %939 = vrot.lane.b32.xlu0 %v935_v52, %s7174_s18 }
 0x65a   :  { %941 = vrot.lane.b32.xlu1 %v936_v55, %s7174_s18 }
 0x68f   :  { %v994_v57 = vpop.permute.xlu1 %993 }
 0x690   :  { %5907 = vmatmul.mubr.msk.f32.vlgmr.msra.gmra.mrb[6].mxu0 %vm8677_vm5, %v994_v57 }
 0x691   :  { %6248 = vmatpush3.bf16.msra.mxu0 %v7370_v7  ;;  %5928 = vmatprep.mubr.msk.f32.mxu0 %vm7173_vm2, %v7171_v0 }
 0x692   :  { %6249 = vmatprep.subr.bf16.mxu0 %v7172_v9 }
 0x695   :  { %6251 = vmatpush3.bf16.msra.mxu0 %v7374_v10 }
 0x696   :  { %6258 = vmatprep.subr.bf16.mxu0 %v7172_v9 }
 0x6cb   :  { %v940_v59 = vpop.permute.xlu0 %939 }
 0x6cc   :  { %v945_v60 = vadd.f32 %v940_v59, %v7491_v58  ;;  %v942_v61 = vpop.permute.xlu1 %941 }
 0x6cd   :  { %v946_v63 = vadd.f32 %v942_v61, %v7496_v62 }
 0x6ce   :  { %6489 = vtanh.f32 %v945_v60 }
 0x6cf   :  { %6491 = vtanh.f32 %v946_v63 }
 0x6d0   :  { %6493 = vpow2.f32 %v5570_v3 }
 0x6d1   :  { %6495 = vpow2.f32 %v5571_v4 }
 0x6d8   :  { %v6490_v1 = vpop.eup %6489 }
 0x6d9   :  { %953 = vrot.lane.b32.xlu0 %v6490_v1, %s7175_s4  ;;  %v6492_v2 = vpop.eup %6491 }
 0x6da   :  { %955 = vrot.lane.b32.xlu1 %v6492_v2, %s7175_s4  ;;  %v6494_v5 = vpop.eup %6493 }
 0x6db   :  { %v6496_v48 = vpop.eup %6495  ;;  %v919_v6 = vadd.f32 1.0, %v6494_v5 }
 0x6dc   :  { %v920_v8 = vadd.f32 1.0, %v6496_v48 }
 0x6dd   :  { %6497 = vrcp.f32 %v919_v6 }
 0x6de   :  { %6499 = vrcp.f32 %v920_v8 }
 0x6e7   :  { %v6498_v11 = vpop.eup %6497 }
 0x6e8   :  { %v6500_v12 = vpop.eup %6499  ;;  %v949_v13 = vsub.f32 1.0, %v6498_v11  ;;  %v965_v18 = vmul.f32 %v6498_v11, %v961_v14 }
 0x6e9   :  { %v950_v16 = vsub.f32 1.0, %v6500_v12  ;;  %v966_v31 = vmul.f32 %v6500_v12, %v962_v17 }
 0x74b   :  { %v954_v15 = vpop.permute.xlu0 %953 }
 0x74c   :  { %v959_v19 = vmul.f32 %v954_v15, %v949_v13  ;;  %v956_v25 = vpop.permute.xlu1 %955 }
 0x74d   :  { %v960_v32 = vmul.f32 %v956_v25, %v950_v16  ;;  %v1198_v25 = vrot.slane %v7537_v27, 7 }
 0x74e   :  { %v7562_v34 = vadd.f32 %v965_v18, %v959_v19 }
 0x74f   :  { %v7564_v35 = vadd.f32 %v966_v31, %v960_v32 }
 0x750   :  { %v1067_v36 = vrot.slane %v7562_v34, 6 }
 0x751   :  { %v1068_v40 = vrot.slane %v7564_v35, 5 }
 0x753   :  { %v1069_v41 = vsel %vm8678_vm4, %v1068_v40, %v1067_v36  ;;  %v1197_v36 = vrot.slane %v7535_v26, 7 }
 0x754   :  { %5918 = vmatmul.mubr.msk.f32.vlgmr.msra.gmra.mrb[8].mxu1 %vm8677_vm5, %v1069_v41 }
 0x755   :  { %6254 = vmatpush3.bf16.msra.mxu1 %v7405_v24  ;;  %5939 = vmatprep.mubr.msk.f32.mxu1 %vm7173_vm2, %v7171_v0 }
 0x756   :  { %6255 = vmatprep.subr.bf16.mxu1 %v7172_v9 }
 0x759   :  { %6257 = vmatpush3.bf16.msra.mxu1 %v7412_v30 }
 0x75a   :  { %6264 = vmatprep.subr.bf16.mxu1 %v7172_v9 }
 0x763   :  { %v1063_v44 = vpop.f32.mrb[6].mxu0 }
 0x764   :  { %v1161_v23 = vadd.f32 %v1063_v44, %v7408_v29  ;;  %v5908_v45 = vpop.f32.mrb[7].mxu0  ;;  %v1143_v50 = vrot.slane %v1063_v44, 6  ;;  %v1144_v51 = vrot.slane %v1063_v44, 7 }
 0x766   :  { %v1164_v46 = vrot.slane %v1161_v23, 7  ;;  %v1163_v49 = vrot.slane %v1161_v23, 6  ;;  %v1147_v52 = vadd.f32 %v1143_v50, %v7441_v42  ;;  %v1148_v53 = vadd.f32 %v1144_v51, %v7446_v47 }
 0x768   :  { %1167 = vrot.lane.b32.xlu1 %v1164_v46, %s7174_s18  ;;  %1165 = vrot.lane.b32.xlu0 %v1163_v49, %s7174_s18  ;;  %v5574_v54 = vmul.f32 -1.442695, %v1147_v52  ;;  %v5575_v55 = vmul.f32 -1.442695, %v1148_v53 }
 0x76a   :  { %6501 = vpow2.f32 %v5574_v54 }
 0x76b   :  { %6503 = vpow2.f32 %v5575_v55 }
 0x774   :  { %v6502_v57 = vpop.eup %6501 }
 0x775   :  { %v6504_v59 = vpop.eup %6503  ;;  %v1155_v60 = vadd.f32 1.0, %v6502_v57 }
 0x776   :  { %v1156_v61 = vadd.f32 1.0, %v6504_v59 }
 0x777   :  { %6505 = vrcp.f32 %v1155_v60 }
 0x778   :  { %6507 = vrcp.f32 %v1156_v61 }
 0x781   :  { %v6506_v63 = vpop.eup %6505 }
 0x782   :  { %v6508_v1 = vpop.eup %6507  ;;  %v1185_v32 = vsub.f32 1.0, %v6506_v63  ;;  %v1201_v23 = vmul.f32 %v6506_v63, %v1197_v36 }
 0x783   :  { %v1186_v19 = vsub.f32 1.0, %v6508_v1  ;;  %v1202_v40 = vmul.f32 %v6508_v1, %v1198_v25 }
 0x7da   :  { %v1168_v2 = vpop.permute.xlu1 %1167  ;;  %v1166_v39 = vpop.permute.xlu0 %1165 }
 0x7db   :  { %v1172_v43 = vmul.f32 %v6508_v1, %v1168_v2  ;;  %v1171_v3 = vmul.f32 %v6506_v63, %v1166_v39 }
 0x7dd   :  { %1177 = vrot.lane.b32.xlu1 %v1172_v43, %s7174_s18  ;;  %1175 = vrot.lane.b32.xlu0 %v1171_v3, %s7174_s18 }
 0x827   :  { %v1138_v4 = vpop.f32.mrb[8].mxu1 }
 0x828   :  { %v5919_v5 = vpop.f32.mrb[9].mxu1  ;;  %v1207_v14 = vrot.slane %v1138_v4, 4  ;;  %v1242_v15 = vadd.f32 %v1138_v4, %v7461_v21  ;;  %v1206_v16 = vrot.slane %v1138_v4, 3 }
 0x82a   :  { %v1245_v17 = vrot.slane %v1242_v15, 4  ;;  %v1244_v18 = vrot.slane %v1242_v15, 3 }
 0x84f   :  { %v1178_v48 = vpop.permute.xlu1 %1177  ;;  %v1176_v6 = vpop.permute.xlu0 %1175 }
 0x850   :  { %v1182_v8 = vadd.f32 %v1178_v48, %v7446_v47  ;;  %v1181_v11 = vadd.f32 %v1176_v6, %v7441_v42 }
 0x852   :  { %6509 = vtanh.f32 %v1182_v8 }
 0x853   :  { %6511 = vtanh.f32 %v1181_v11 }
 0x85c   :  { %v6510_v12 = vpop.eup %6509 }
 0x85d   :  { %v6512_v13 = vpop.eup %6511  ;;  %1191 = vrot.lane.b32.xlu1 %v6510_v12, %s7175_s4 }
 0x85e   :  { %1189 = vrot.lane.b32.xlu0 %v6512_v13, %s7175_s4 }
 0x861   :  { %1210 = vrot.lane.b32.xlu1 %v1207_v14, %s7175_s4 }
 0x862   :  { %1208 = vrot.lane.b32.xlu0 %v1206_v16, %s7175_s4 }
 0x865   :  { %1248 = vrot.lane.b32.xlu1 %v1245_v17, %s7176_s19 }
 0x866   :  { %1246 = vrot.lane.b32.xlu0 %v1244_v18, %s7176_s19 }
 0x8cf   :  { %v1192_v31 = vpop.permute.xlu1 %1191 }
 0x8d0   :  { %v1196_v41 = vmul.f32 %v1192_v31, %v1186_v19  ;;  %v1190_v44 = vpop.permute.xlu0 %1189 }
 0x8d1   :  { %v1195_v45 = vmul.f32 %v1190_v44, %v1185_v32 }
 0x8d2   :  { %v7594_v46 = vadd.f32 %v1202_v40, %v1196_v41 }
 0x8d3   :  { %v7596_v49 = vadd.f32 %v1201_v23, %v1195_v45  ;;  %v1211_v50 = vpop.permute.xlu1 %1210  ;;  %v1279_v23 = vrot.slane %v7564_v35, 1 }
 0x8d4   :  { %v1215_v51 = vadd.f32 %v1211_v50, %v7446_v47  ;;  %v1209_v52 = vpop.permute.xlu0 %1208  ;;  %v1309_v53 = vrot.slane %v7594_v46, 1  ;;  %v1229_v16 = vadd.f32 %v1211_v50, %v7496_v62  ;;  %v1278_v50 = vrot.slane %v7562_v34, 1 }
 0x8d5   :  { %v1214_v54 = vadd.f32 %v1209_v52, %v7441_v42  ;;  %v1308_v55 = vrot.slane %v7596_v49, 2  ;;  %v1228_v17 = vadd.f32 %v1209_v52, %v7491_v58 }
 0x8d6   :  { %v5577_v57 = vmul.f32 -1.442695, %v1215_v51  ;;  %v5579_v18 = vmul.f32 -1.442695, %v1229_v16 }
 0x8d7   :  { %v5576_v59 = vmul.f32 -1.442695, %v1214_v54  ;;  %v1310_v60 = vsel %vm8678_vm4, %v1309_v53, %v1308_v55  ;;  %v1249_v43 = vpop.permute.xlu1 %1248  ;;  %v5578_v19 = vmul.f32 -1.442695, %v1228_v17 }
 0x8d8   :  { %6513 = vpow2.f32 %v5577_v57  ;;  %1311 = vrot.lane.b32.xlu0 %v1310_v60, %s7175_s4  ;;  %v1247_v5 = vpop.permute.xlu0 %1246 }
 0x8d9   :  { %6515 = vpow2.f32 %v5576_v59 }
 0x8e2   :  { %v6514_v61 = vpop.eup %6513 }
 0x8e3   :  { %v1223_v63 = vadd.f32 1.0, %v6514_v61  ;;  %v6516_v1 = vpop.eup %6515 }
 0x8e4   :  { %v1222_v2 = vadd.f32 1.0, %v6516_v1 }
 0x8e5   :  { %6517 = vrcp.f32 %v1223_v63 }
 0x8e6   :  { %6519 = vrcp.f32 %v1222_v2 }
 0x8ef   :  { %v6518_v39 = vpop.eup %6517 }
 0x8f0   :  { %v1253_v3 = vmul.f32 %v6518_v39, %v1249_v43  ;;  %v6520_v4 = vpop.eup %6519 }
 0x8f1   :  { %v1252_v48 = vmul.f32 %v6520_v4, %v1247_v5 }
 0x8f2   :  { %1258 = vrot.lane.b32.xlu0 %v1253_v3, %s7174_s18 }
 0x8f3   :  { %1256 = vrot.lane.b32.xlu1 %v1252_v48, %s7174_s18 }
 0x94a   :  { %v1312_v6 = vpop.permute.xlu0 %1311 }
 0x94b   :  { %5929 = vmatmul.mubr.msk.f32.vlgmr.msra.gmra.mrb[8].mxu0 %vm8677_vm5, %v1312_v6 }
 0x94c   :  { %6260 = vmatpush3.bf16.msra.mxu0 %v7370_v7  ;;  %5950 = vmatprep.mubr.msk.f32.mxu0 %vm7173_vm2, %v7171_v0 }
 0x94d   :  { %6261 = vmatprep.subr.bf16.mxu0 %v7172_v9 }
 0x950   :  { %6263 = vmatpush3.bf16.msra.mxu0 %v7374_v10 }
 0x951   :  { %6270 = vmatprep.subr.bf16.mxu0 %v7172_v9 }
 0x964   :  { %v1259_v8 = vpop.permute.xlu0 %1258 }
 0x965   :  { %v1263_v11 = vadd.f32 %v1259_v8, %v7496_v62  ;;  %v1257_v12 = vpop.permute.xlu1 %1256 }
 0x966   :  { %v1262_v13 = vadd.f32 %v1257_v12, %v7491_v58 }
 0x967   :  { %6521 = vtanh.f32 %v1263_v11 }
 0x968   :  { %6523 = vtanh.f32 %v1262_v13 }
 0x969   :  { %6525 = vpow2.f32 %v5579_v18 }
 0x96a   :  { %6527 = vpow2.f32 %v5578_v19 }
 0x971   :  { %v6522_v14 = vpop.eup %6521 }
 0x972   :  { %1272 = vrot.lane.b32.xlu0 %v6522_v14, %s7175_s4  ;;  %v6524_v15 = vpop.eup %6523 }
 0x973   :  { %1270 = vrot.lane.b32.xlu1 %v6524_v15, %s7175_s4  ;;  %v6526_v25 = vpop.eup %6525 }
 0x974   :  { %v6528_v31 = vpop.eup %6527  ;;  %v1237_v32 = vadd.f32 1.0, %v6526_v25 }
 0x975   :  { %v1236_v36 = vadd.f32 1.0, %v6528_v31 }
 0x976   :  { %6529 = vrcp.f32 %v1237_v32 }
 0x977   :  { %6531 = vrcp.f32 %v1236_v36 }
 0x980   :  { %v6530_v40 = vpop.eup %6529 }
 0x981   :  { %v6532_v41 = vpop.eup %6531  ;;  %v1267_v44 = vsub.f32 1.0, %v6530_v40  ;;  %v1283_v52 = vmul.f32 %v6530_v40, %v1279_v23 }
 0x982   :  { %v1266_v51 = vsub.f32 1.0, %v6532_v41  ;;  %v1282_v55 = vmul.f32 %v6532_v41, %v1278_v50 }
 0x9e4   :  { %v1273_v45 = vpop.permute.xlu0 %1272 }
 0x9e5   :  { %v1277_v53 = vmul.f32 %v1273_v45, %v1267_v44  ;;  %v1271_v54 = vpop.permute.xlu1 %1270 }
 0x9e6   :  { %v1276_v57 = vmul.f32 %v1271_v54, %v1266_v51 }
 0x9e7   :  { %v7621_v59 = vadd.f32 %v1283_v52, %v1277_v53 }
 0x9e8   :  { %v7623_v60 = vadd.f32 %v1282_v55, %v1276_v57 }
 0x9e9   :  { %v1386_v61 = vrot.slane %v7621_v59, 4 }
 0x9ea   :  { %v1385_v63 = vrot.slane %v7623_v60, 5 }
 0x9ec   :  { %v1387_v1 = vsel %vm8678_vm4, %v1386_v61, %v1385_v63 }
 0x9ed   :  { %5940 = vmatmul.mubr.msk.f32.vlgmr.msra.gmra.mrb[10].mxu1 %vm8677_vm5, %v1387_v1 }
 0x9ee   :  { %6266 = vmatpush3.bf16.msra.mxu1 %v7405_v24  ;;  %5961 = vmatprep.mubr.msk.f32.mxu1 %vm7173_vm2, %v7171_v0 }
 0x9ef   :  { %6267 = vmatprep.subr.bf16.mxu1 %v7172_v9 }
 0x9f2   :  { %6269 = vmatpush3.bf16.msra.mxu1 %v7412_v30 }
 0x9f3   :  { %6276 = vmatprep.subr.bf16.mxu1 %v7172_v9 }
 0xa1e   :  { %v1381_v2 = vpop.f32.mrb[8].mxu0 }
 0xa1f   :  { %v1479_v39 = vadd.f32 %v1381_v2, %v7408_v29  ;;  %v5930_v43 = vpop.f32.mrb[9].mxu0  ;;  %v1461_v5 = vrot.slane %v1381_v2, 5  ;;  %v1462_v48 = vrot.slane %v1381_v2, 6 }
 0xa21   :  { %v1481_v3 = vrot.slane %v1479_v39, 5  ;;  %v1482_v4 = vrot.slane %v1479_v39, 6  ;;  %v1465_v6 = vadd.f32 %v1461_v5, %v7441_v42  ;;  %v1466_v8 = vadd.f32 %v1462_v48, %v7446_v47 }
 0xa23   :  { %1483 = vrot.lane.b32.xlu1 %v1481_v3, %s7174_s18  ;;  %1485 = vrot.lane.b32.xlu0 %v1482_v4, %s7174_s18  ;;  %v5582_v11 = vmul.f32 -1.442695, %v1465_v6  ;;  %v5583_v12 = vmul.f32 -1.442695, %v1466_v8 }
 0xa25   :  { %6533 = vpow2.f32 %v5582_v11 }
 0xa26   :  { %6535 = vpow2.f32 %v5583_v12 }
 0xa2f   :  { %v6534_v13 = vpop.eup %6533 }
 0xa30   :  { %v6536_v14 = vpop.eup %6535  ;;  %v1473_v15 = vadd.f32 1.0, %v6534_v13 }
 0xa31   :  { %v1474_v16 = vadd.f32 1.0, %v6536_v14 }
 0xa32   :  { %6537 = vrcp.f32 %v1473_v15 }
 0xa33   :  { %6539 = vrcp.f32 %v1474_v16  ;;  %v1515_v16 = vrot.slane %v7596_v49, 7 }
 0xa3c   :  { %v6538_v17 = vpop.eup %6537 }
 0xa3d   :  { %v6540_v18 = vpop.eup %6539  ;;  %v1503_v15 = vsub.f32 1.0, %v6538_v17 }
 0xa95   :  { %v1484_v19 = vpop.permute.xlu1 %1483  ;;  %v1486_v25 = vpop.permute.xlu0 %1485 }
 0xa96   :  { %v1489_v31 = vmul.f32 %v6538_v17, %v1484_v19  ;;  %v1490_v32 = vmul.f32 %v6540_v18, %v1486_v25  ;;  %v1504_v25 = vsub.f32 1.0, %v6540_v18 }
 0xa98   :  { %1493 = vrot.lane.b32.xlu1 %v1489_v31, %s7174_s18  ;;  %1495 = vrot.lane.b32.xlu0 %v1490_v32, %s7174_s18  ;;  %v1516_v31 = vrot.slane %v7594_v46, 7  ;;  %v1519_v32 = vmul.f32 %v6538_v17, %v1515_v16 }
 0xac0   :  { %v1456_v36 = vpop.f32.mrb[10].mxu1 }
 0xac1   :  { %v1524_v40 = vrot.slane %v1456_v36, 4  ;;  %v1525_v41 = vrot.slane %v1456_v36, 5  ;;  %v1560_v44 = vadd.f32 %v1456_v36, %v7461_v21  ;;  %v5941_v23 = vpop.f32.mrb[11].mxu1 }
 0xac3   :  { %1526 = vrot.lane.b32.xlu1 %v1524_v40, %s7175_s4  ;;  %1528 = vrot.lane.b32.xlu0 %v1525_v41, %s7175_s4  ;;  %v1562_v45 = vrot.slane %v1560_v44, 4  ;;  %v1563_v51 = vrot.slane %v1560_v44, 5  ;;  %v1520_v41 = vmul.f32 %v6540_v18, %v1516_v31 }
 0xac7   :  { %1564 = vrot.lane.b32.xlu1 %v1562_v45, %s7176_s19  ;;  %1566 = vrot.lane.b32.xlu0 %v1563_v51, %s7176_s19 }
 0xb0a   :  { %v1494_v50 = vpop.permute.xlu1 %1493  ;;  %v1496_v52 = vpop.permute.xlu0 %1495 }
 0xb0b   :  { %v1499_v53 = vadd.f32 %v1494_v50, %v7441_v42  ;;  %v1500_v54 = vadd.f32 %v1496_v52, %v7446_v47 }
 0xb0d   :  { %6541 = vtanh.f32 %v1499_v53 }
 0xb0e   :  { %6543 = vtanh.f32 %v1500_v54 }
 0xb17   :  { %v6542_v55 = vpop.eup %6541 }
 0xb18   :  { %v6544_v57 = vpop.eup %6543  ;;  %1507 = vrot.lane.b32.xlu1 %v6542_v55, %s7175_s4 }
 0xb19   :  { %1509 = vrot.lane.b32.xlu0 %v6544_v57, %s7175_s4 }
 0xb35   :  { %v1527_v61 = vpop.permute.xlu1 %1526  ;;  %v1529_v63 = vpop.permute.xlu0 %1528 }
 0xb36   :  { %v1532_v1 = vadd.f32 %v1527_v61, %v7441_v42  ;;  %v1533_v2 = vadd.f32 %v1529_v63, %v7446_v47 }
 0xb38   :  { %v5584_v39 = vmul.f32 -1.442695, %v1532_v1  ;;  %v5585_v43 = vmul.f32 -1.442695, %v1533_v2  ;;  %v1546_v2 = vadd.f32 %v1527_v61, %v7491_v58  ;;  %v1597_v61 = vrot.slane %v7621_v59, 1 }
 0xb39   :  { %v1565_v8 = vpop.permute.xlu1 %1564  ;;  %v1567_v13 = vpop.permute.xlu0 %1566 }
 0xb3a   :  { %6545 = vpow2.f32 %v5584_v39  ;;  %v1547_v39 = vadd.f32 %v1529_v63, %v7496_v62 }
 0xb3b   :  { %6547 = vpow2.f32 %v5585_v43  ;;  %v5586_v43 = vmul.f32 -1.442695, %v1546_v2 }
 0xb44   :  { %v6546_v3 = vpop.eup %6545 }
 0xb45   :  { %v1540_v4 = vadd.f32 1.0, %v6546_v3  ;;  %v6548_v5 = vpop.eup %6547  ;;  %v5587_v3 = vmul.f32 -1.442695, %v1547_v39 }
 0xb46   :  { %v1541_v48 = vadd.f32 1.0, %v6548_v5 }
 0xb47   :  { %6549 = vrcp.f32 %v1540_v4 }
 0xb48   :  { %6551 = vrcp.f32 %v1541_v48 }
 0xb51   :  { %v6550_v6 = vpop.eup %6549 }
 0xb52   :  { %v1570_v11 = vmul.f32 %v6550_v6, %v1565_v8  ;;  %v6552_v12 = vpop.eup %6551 }
 0xb53   :  { %v1571_v14 = vmul.f32 %v6552_v12, %v1567_v13  ;;  %v1596_v13 = vrot.slane %v7623_v60, 1 }
 0xb54   :  { %1574 = vrot.lane.b32.xlu1 %v1570_v11, %s7174_s18 }
 0xb55   :  { %1576 = vrot.lane.b32.xlu0 %v1571_v14, %s7174_s18 }
 0xb8a   :  { %v1508_v19 = vpop.permute.xlu1 %1507 }
 0xb8b   :  { %v1513_v36 = vmul.f32 %v1508_v19, %v1503_v15  ;;  %v1510_v40 = vpop.permute.xlu0 %1509 }
 0xb8c   :  { %v1514_v44 = vmul.f32 %v1510_v40, %v1504_v25 }
 0xb8d   :  { %v7657_v23 = vadd.f32 %v1519_v32, %v1513_v36 }
 0xb8e   :  { %v7659_v45 = vadd.f32 %v1520_v41, %v1514_v44 }
 0xb8f   :  { %v1626_v51 = vrot.slane %v7657_v23, 3 }
 0xb90   :  { %v1627_v50 = vrot.slane %v7659_v45, 2 }
 0xb92   :  { %v1628_v52 = vsel %vm8678_vm4, %v1627_v50, %v1626_v51 }
 0xb93   :  { %1629 = vrot.lane.b32.xlu1 %v1628_v52, %s7175_s4 }
 0xbc6   :  { %v1575_v53 = vpop.permute.xlu1 %1574 }
 0xbc7   :  { %v1580_v54 = vadd.f32 %v1575_v53, %v7491_v58  ;;  %v1577_v17 = vpop.permute.xlu0 %1576 }
 0xbc8   :  { %v1581_v18 = vadd.f32 %v1577_v17, %v7496_v62 }
 0xbc9   :  { %6553 = vtanh.f32 %v1580_v54 }
 0xbca   :  { %6555 = vtanh.f32 %v1581_v18 }
 0xbcb   :  { %6557 = vpow2.f32 %v5586_v43 }
 0xbcc   :  { %6559 = vpow2.f32 %v5587_v3 }
 0xbd3   :  { %v6554_v55 = vpop.eup %6553 }
 0xbd4   :  { %1588 = vrot.lane.b32.xlu0 %v6554_v55, %s7175_s4  ;;  %v6556_v57 = vpop.eup %6555 }
 0xbd5   :  { %1590 = vrot.lane.b32.xlu1 %v6556_v57, %s7175_s4  ;;  %v6558_v4 = vpop.eup %6557 }
 0xbd6   :  { %v6560_v5 = vpop.eup %6559  ;;  %v1554_v48 = vadd.f32 1.0, %v6558_v4 }
 0xbd7   :  { %v1555_v6 = vadd.f32 1.0, %v6560_v5 }
 0xbd8   :  { %6561 = vrcp.f32 %v1554_v48 }
 0xbd9   :  { %6563 = vrcp.f32 %v1555_v6 }
 0xbe2   :  { %v6562_v8 = vpop.eup %6561 }
 0xbe3   :  { %v6564_v11 = vpop.eup %6563  ;;  %v1584_v12 = vsub.f32 1.0, %v6562_v8  ;;  %v1600_v63 = vmul.f32 %v6562_v8, %v1596_v13 }
 0xbe4   :  { %v1585_v15 = vsub.f32 1.0, %v6564_v11  ;;  %v1601_v25 = vmul.f32 %v6564_v11, %v1597_v61 }
 0xc05   :  { %v1630_v1 = vpop.permute.xlu1 %1629 }
 0xc06   :  { %5951 = vmatmul.mubr.msk.f32.vlgmr.msra.gmra.mrb[10].mxu0 %vm8677_vm5, %v1630_v1 }
 0xc07   :  { %6272 = vmatpush3.bf16.msra.mxu0 %v7370_v7  ;;  %5972 = vmatprep.mubr.msk.f32.mxu0 %vm7173_vm2, %v7171_v0 }
 0xc08   :  { %6273 = vmatprep.subr.bf16.mxu0 %v7172_v9 }
 0xc0b   :  { %6275 = vmatpush3.bf16.msra.mxu0 %v7374_v10 }
 0xc0c   :  { %6282 = vmatprep.subr.bf16.mxu0 %v7172_v9 }
 0xc46   :  { %v1589_v14 = vpop.permute.xlu0 %1588 }
 0xc47   :  { %v1594_v16 = vmul.f32 %v1589_v14, %v1584_v12  ;;  %v1591_v19 = vpop.permute.xlu1 %1590 }
 0xc48   :  { %v1595_v31 = vmul.f32 %v1591_v19, %v1585_v15 }
 0xc49   :  { %v7680_v32 = vadd.f32 %v1600_v63, %v1594_v16 }
 0xc4a   :  { %v7682_v36 = vadd.f32 %v1601_v25, %v1595_v31 }
 0xc4b   :  { %v1703_v40 = vrot.slane %v7680_v32, 4 }
 0xc4c   :  { %v1704_v41 = vrot.slane %v7682_v36, 3 }
 0xc4e   :  { %v1705_v44 = vsel %vm8678_vm4, %v1704_v41, %v1703_v40 }
 0xc4f   :  { %5962 = vmatmul.mubr.msk.f32.vlgmr.msra.gmra.mrb[12].mxu1 %vm8677_vm5, %v1705_v44 }
 0xc50   :  { %6278 = vmatpush3.bf16.msra.mxu1 %v7405_v24  ;;  %5983 = vmatprep.mubr.msk.f32.mxu1 %vm7173_vm2, %v7171_v0 }
 0xc51   :  { %6279 = vmatprep.subr.bf16.mxu1 %v7172_v9 }
 0xc54   :  { %6281 = vmatpush3.bf16.msra.mxu1 %v7412_v30 }
 0xc55   :  { %6288 = vmatprep.subr.bf16.mxu1 %v7172_v9 }
 0xcd9   :  { %v1699_v51 = vpop.f32.mrb[10].mxu0 }
 0xcda   :  { %v1797_v50 = vadd.f32 %v1699_v51, %v7408_v29  ;;  %v5952_v52 = vpop.f32.mrb[11].mxu0  ;;  %v1779_v55 = vrot.slane %v1699_v51, 4  ;;  %v1780_v57 = vrot.slane %v1699_v51, 5 }
 0xcdc   :  { %v1799_v53 = vrot.slane %v1797_v50, 4  ;;  %v1800_v54 = vrot.slane %v1797_v50, 5  ;;  %v1783_v1 = vadd.f32 %v1779_v55, %v7441_v42  ;;  %v1784_v2 = vadd.f32 %v1780_v57, %v7446_v47 }
 0xcde   :  { %1801 = vrot.lane.b32.xlu0 %v1799_v53, %s7174_s18  ;;  %1803 = vrot.lane.b32.xlu1 %v1800_v54, %s7174_s18  ;;  %v5590_v39 = vmul.f32 -1.442695, %v1783_v1  ;;  %v5591_v43 = vmul.f32 -1.442695, %v1784_v2 }
 0xce0   :  { %6565 = vpow2.f32 %v5590_v39 }
 0xce1   :  { %6567 = vpow2.f32 %v5591_v43 }
 0xcea   :  { %v6566_v3 = vpop.eup %6565 }
 0xceb   :  { %v6568_v4 = vpop.eup %6567  ;;  %v1791_v5 = vadd.f32 1.0, %v6566_v3 }
 0xcec   :  { %v1792_v48 = vadd.f32 1.0, %v6568_v4 }
 0xced   :  { %6569 = vrcp.f32 %v1791_v5 }
 0xcee   :  { %6571 = vrcp.f32 %v1792_v48 }
 0xcf7   :  { %v6570_v6 = vpop.eup %6569 }
 0xcf8   :  { %v6572_v8 = vpop.eup %6571 }
 0xd22   :  { %v1774_v17 = vpop.f32.mrb[12].mxu1 }
 0xd23   :  { %v5963_v18 = vpop.f32.mrb[13].mxu1  ;;  %v1842_v15 = vrot.slane %v1774_v17, 5  ;;  %v1843_v61 = vrot.slane %v1774_v17, 6  ;;  %v1878_v63 = vadd.f32 %v1774_v17, %v7461_v21 }
 0xd25   :  { %v1881_v16 = vrot.slane %v1878_v63, 6  ;;  %v1880_v19 = vrot.slane %v1878_v63, 5 }
 0xd50   :  { %v1804_v11 = vpop.permute.xlu1 %1803  ;;  %v1802_v12 = vpop.permute.xlu0 %1801 }
 0xd51   :  { %v1808_v13 = vmul.f32 %v6572_v8, %v1804_v11  ;;  %v1807_v14 = vmul.f32 %v6570_v6, %v1802_v12  ;;  %v1822_v11 = vsub.f32 1.0, %v6572_v8  ;;  %v1834_v12 = vrot.slane %v7659_v45, 7 }
 0xd53   :  { %1813 = vrot.lane.b32.xlu1 %v1808_v13, %s7174_s18  ;;  %1811 = vrot.lane.b32.xlu0 %v1807_v14, %s7174_s18  ;;  %v1821_v14 = vsub.f32 1.0, %v6570_v6 }
 0xd57   :  { %1846 = vrot.lane.b32.xlu1 %v1843_v61, %s7175_s4  ;;  %1844 = vrot.lane.b32.xlu0 %v1842_v15, %s7175_s4  ;;  %v1833_v15 = vrot.slane %v7657_v23, 7  ;;  %v1838_v61 = vmul.f32 %v6572_v8, %v1834_v12 }
 0xd5b   :  { %1884 = vrot.lane.b32.xlu1 %v1881_v16, %s7176_s19  ;;  %1882 = vrot.lane.b32.xlu0 %v1880_v19, %s7176_s19  ;;  %v1837_v19 = vmul.f32 %v6570_v6, %v1833_v15 }
 0xdc5   :  { %v1814_v25 = vpop.permute.xlu1 %1813  ;;  %v1812_v31 = vpop.permute.xlu0 %1811 }
 0xdc6   :  { %v1818_v40 = vadd.f32 %v1814_v25, %v7446_v47  ;;  %v1817_v41 = vadd.f32 %v1812_v31, %v7441_v42 }
 0xdc8   :  { %6573 = vtanh.f32 %v1818_v40 }
 0xdc9   :  { %6575 = vtanh.f32 %v1817_v41  ;;  %v1847_v44 = vpop.permute.xlu1 %1846  ;;  %v1845_v51 = vpop.permute.xlu0 %1844 }
 0xdca   :  { %v1851_v50 = vadd.f32 %v1847_v44, %v7446_v47  ;;  %v1850_v52 = vadd.f32 %v1845_v51, %v7441_v42 }
 0xdcc   :  { %v5593_v53 = vmul.f32 -1.442695, %v1851_v50  ;;  %v5592_v54 = vmul.f32 -1.442695, %v1850_v52 }
 0xdcd   :  { %v1885_v43 = vpop.permute.xlu1 %1884  ;;  %v1883_v5 = vpop.permute.xlu0 %1882 }
 0xdce   :  { %6577 = vpow2.f32 %v5593_v53 }
 0xdcf   :  { %6579 = vpow2.f32 %v5592_v54 }
 0xdd2   :  { %v6574_v17 = vpop.eup %6573 }
 0xdd3   :  { %v6576_v18 = vpop.eup %6575  ;;  %1827 = vrot.lane.b32.xlu1 %v6574_v17, %s7175_s4 }
 0xdd4   :  { %1825 = vrot.lane.b32.xlu0 %v6576_v18, %s7175_s4 }
 0xdd8   :  { %v6578_v55 = vpop.eup %6577 }
 0xdd9   :  { %v1859_v57 = vadd.f32 1.0, %v6578_v55  ;;  %v6580_v1 = vpop.eup %6579  ;;  %v1865_v55 = vadd.f32 %v1847_v44, %v7496_v62 }
 0xdda   :  { %v1858_v2 = vadd.f32 1.0, %v6580_v1 }
 0xddb   :  { %6581 = vrcp.f32 %v1859_v57  ;;  %v1864_v57 = vadd.f32 %v1845_v51, %v7491_v58  ;;  %v5595_v1 = vmul.f32 -1.442695, %v1865_v55 }
 0xddc   :  { %6583 = vrcp.f32 %v1858_v2 }
 0xddd   :  { %v5594_v2 = vmul.f32 -1.442695, %v1864_v57 }
 0xde5   :  { %v6582_v39 = vpop.eup %6581 }
 0xde6   :  { %v1889_v3 = vmul.f32 %v6582_v39, %v1885_v43  ;;  %v6584_v4 = vpop.eup %6583 }
 0xde7   :  { %v1888_v48 = vmul.f32 %v6584_v4, %v1883_v5 }
 0xde8   :  { %1894 = vrot.lane.b32.xlu1 %v1889_v3, %s7174_s18 }
 0xde9   :  { %1892 = vrot.lane.b32.xlu0 %v1888_v48, %s7174_s18 }
 0xe45   :  { %v1828_v13 = vpop.permute.xlu1 %1827 }
 0xe46   :  { %v1832_v63 = vmul.f32 %v1828_v13, %v1822_v11  ;;  %v1826_v16 = vpop.permute.xlu0 %1825  ;;  %v1915_v11 = vrot.slane %v7682_v36, 1 }
 0xe47   :  { %v1831_v25 = vmul.f32 %v1826_v16, %v1821_v14  ;;  %v1914_v14 = vrot.slane %v7680_v32, 1 }
 0xe48   :  { %v7716_v31 = vadd.f32 %v1838_v61, %v1832_v63 }
 0xe49   :  { %v7718_v40 = vadd.f32 %v1837_v19, %v1831_v25 }
 0xe4a   :  { %v1945_v41 = vrot.slane %v7716_v31, 3 }
 0xe4b   :  { %v1944_v50 = vrot.slane %v7718_v40, 4 }
 0xe4d   :  { %v1946_v52 = vsel %vm8678_vm4, %v1945_v41, %v1944_v50 }
 0xe4e   :  { %1947 = vrot.lane.b32.xlu0 %v1946_v52, %s7175_s4 }
 0xe5a   :  { %v1895_v53 = vpop.permute.xlu1 %1894 }
 0xe5b   :  { %v1899_v54 = vadd.f32 %v1895_v53, %v7496_v62  ;;  %v1893_v8 = vpop.permute.xlu0 %1892 }
 0xe5c   :  { %v1898_v6 = vadd.f32 %v1893_v8, %v7491_v58 }
 0xe5d   :  { %6585 = vtanh.f32 %v1899_v54 }
 0xe5e   :  { %6587 = vtanh.f32 %v1898_v6 }
 0xe5f   :  { %6589 = vpow2.f32 %v5595_v1 }
 0xe60   :  { %6591 = vpow2.f32 %v5594_v2 }
 0xe67   :  { %v6586_v17 = vpop.eup %6585 }
 0xe68   :  { %1908 = vrot.lane.b32.xlu0 %v6586_v17, %s7175_s4  ;;  %v6588_v18 = vpop.eup %6587 }
 0xe69   :  { %1906 = vrot.lane.b32.xlu1 %v6588_v18, %s7175_s4  ;;  %v6590_v43 = vpop.eup %6589 }
 0xe6a   :  { %v6592_v44 = vpop.eup %6591  ;;  %v1873_v51 = vadd.f32 1.0, %v6590_v43 }
 0xe6b   :  { %v1872_v3 = vadd.f32 1.0, %v6592_v44 }
 0xe6c   :  { %6593 = vrcp.f32 %v1873_v51 }
 0xe6d   :  { %6595 = vrcp.f32 %v1872_v3 }
 0xe76   :  { %v6594_v4 = vpop.eup %6593 }
 0xe77   :  { %v6596_v5 = vpop.eup %6595  ;;  %v1903_v48 = vsub.f32 1.0, %v6594_v4  ;;  %v1919_v15 = vmul.f32 %v6594_v4, %v1915_v11 }
 0xe78   :  { %v1902_v13 = vsub.f32 1.0, %v6596_v5  ;;  %v1918_v16 = vmul.f32 %v6596_v5, %v1914_v14 }
 0xec0   :  { %v1948_v39 = vpop.permute.xlu0 %1947 }
 0xec1   :  { %5973 = vmatmul.mubr.msk.f32.vlgmr.msra.gmra.mrb[12].mxu0 %vm8677_vm5, %v1948_v39 }
 0xec2   :  { %6284 = vmatpush3.bf16.msra.mxu0 %v7370_v7  ;;  %5994 = vmatprep.mubr.msk.f32.mxu0 %vm7173_vm2, %v7171_v0 }
 0xec3   :  { %6285 = vmatprep.subr.bf16.mxu0 %v7172_v9 }
 0xec6   :  { %6287 = vmatpush3.bf16.msra.mxu0 %v7374_v10 }
 0xec7   :  { %6294 = vmatprep.subr.bf16.mxu0 %v7172_v9 }
 0xeda   :  { %v1909_v12 = vpop.permute.xlu0 %1908 }
 0xedb   :  { %v1913_v61 = vmul.f32 %v1909_v12, %v1903_v48  ;;  %v1907_v63 = vpop.permute.xlu1 %1906 }
 0xedc   :  { %v1912_v19 = vmul.f32 %v1907_v63, %v1902_v13 }
 0xedd   :  { %v7739_v25 = vadd.f32 %v1919_v15, %v1913_v61 }
 0xede   :  { %v7741_v41 = vadd.f32 %v1918_v16, %v1912_v19 }
 0xedf   :  { %v2022_v50 = vrot.slane %v7739_v25, 2 }
 0xee0   :  { %v2021_v52 = vrot.slane %v7741_v41, 3 }
 0xee2   :  { %v2023_v53 = vsel %vm8678_vm4, %v2022_v50, %v2021_v52 }
 0xee3   :  { %5984 = vmatmul.mubr.msk.f32.vlgmr.msra.gmra.mrb[14].mxu1 %vm8677_vm5, %v2023_v53 }
 0xee4   :  { %6290 = vmatpush3.bf16.msra.mxu1 %v7405_v24  ;;  %6005 = vmatprep.mubr.msk.f32.mxu1 %vm7173_vm2, %v7171_v0 }
 0xee5   :  { %6291 = vmatprep.subr.bf16.mxu1 %v7172_v9 }
 0xee8   :  { %6293 = vmatpush3.bf16.msra.mxu1 %v7412_v30 }
 0xee9   :  { %6300 = vmatprep.subr.bf16.mxu1 %v7172_v9 }
 0xf94   :  { %v2017_v54 = vpop.f32.mrb[12].mxu0 }
 0xf95   :  { %v2115_v8 = vadd.f32 %v2017_v54, %v7408_v29  ;;  %v5974_v6 = vpop.f32.mrb[13].mxu0  ;;  %v2097_v39 = vrot.slane %v2017_v54, 3  ;;  %v2098_v43 = vrot.slane %v2017_v54, 4 }
 0xf97   :  { %v2118_v17 = vrot.slane %v2115_v8, 4  ;;  %v2117_v18 = vrot.slane %v2115_v8, 3  ;;  %v2101_v44 = vadd.f32 %v2097_v39, %v7441_v42  ;;  %v2102_v51 = vadd.f32 %v2098_v43, %v7446_v47 }
 0xf99   :  { %2121 = vrot.lane.b32.xlu0 %v2118_v17, %s7174_s18  ;;  %2119 = vrot.lane.b32.xlu1 %v2117_v18, %s7174_s18  ;;  %v5598_v3 = vmul.f32 -1.442695, %v2101_v44  ;;  %v5599_v4 = vmul.f32 -1.442695, %v2102_v51 }
 0xf9b   :  { %6597 = vpow2.f32 %v5598_v3 }
 0xf9c   :  { %6599 = vpow2.f32 %v5599_v4 }
 0xfa5   :  { %v6598_v5 = vpop.eup %6597 }
 0xfa6   :  { %v6600_v48 = vpop.eup %6599  ;;  %v2109_v11 = vadd.f32 1.0, %v6598_v5 }
 0xfa7   :  { %v2110_v12 = vadd.f32 1.0, %v6600_v48 }
 0xfa8   :  { %6601 = vrcp.f32 %v2109_v11 }
 0xfa9   :  { %6603 = vrcp.f32 %v2110_v12 }
 0xfb2   :  { %v6602_v13 = vpop.eup %6601 }
 0xfb3   :  { %v6604_v14 = vpop.eup %6603 }
 0xfb6   :  { %v2092_v55 = vpop.f32.mrb[14].mxu1 }
 0xfb7   :  { %v2160_v57 = vrot.slane %v2092_v55, 6  ;;  %v2161_v1 = vrot.slane %v2092_v55, 7  ;;  %v5985_v2 = vpop.f32.mrb[15].mxu1  ;;  %v2196_v63 = vadd.f32 %v2092_v55, %v7461_v21 }
 0xfb9   :  { %2164 = vrot.lane.b32.xlu0 %v2161_v1, %s7175_s4  ;;  %2162 = vrot.lane.b32.xlu1 %v2160_v57, %s7175_s4  ;;  %v2198_v50 = vrot.slane %v2196_v63, 6  ;;  %v2199_v52 = vrot.slane %v2196_v63, 7 }
0x100b   :  { %v2120_v15 = vpop.permute.xlu1 %2119  ;;  %v2122_v61 = vpop.permute.xlu0 %2121 }
0x100c   :  { %v2125_v16 = vmul.f32 %v6602_v13, %v2120_v15  ;;  %v2126_v19 = vmul.f32 %v6604_v14, %v2122_v61 }
0x100e   :  { %2129 = vrot.lane.b32.xlu1 %v2125_v16, %s7174_s18  ;;  %2131 = vrot.lane.b32.xlu0 %v2126_v19, %s7174_s18 }
0x1012   :  { %2200 = vrot.lane.b32.xlu1 %v2198_v50, %s7176_s19  ;;  %2202 = vrot.lane.b32.xlu0 %v2199_v52, %s7176_s19  ;;  %v2139_v52 = vsub.f32 1.0, %v6602_v13 }
0x102b   :  { %v2163_v53 = vpop.permute.xlu1 %2162  ;;  %v2165_v54 = vpop.permute.xlu0 %2164 }
0x102c   :  { %v2168_v8 = vadd.f32 %v2163_v53, %v7441_v42  ;;  %v2169_v6 = vadd.f32 %v2165_v54, %v7446_v47 }
0x102e   :  { %v5600_v17 = vmul.f32 -1.442695, %v2168_v8  ;;  %v5601_v18 = vmul.f32 -1.442695, %v2169_v6  ;;  %v2151_v8 = vrot.slane %v7718_v40, 7 }
0x1030   :  { %6605 = vpow2.f32 %v5600_v17  ;;  %v2140_v17 = vsub.f32 1.0, %v6604_v14 }
0x1031   :  { %6607 = vpow2.f32 %v5601_v18  ;;  %v2152_v18 = vrot.slane %v7716_v31, 7 }
0x103a   :  { %v6606_v55 = vpop.eup %6605 }
0x103b   :  { %v6608_v57 = vpop.eup %6607  ;;  %v2176_v1 = vadd.f32 1.0, %v6606_v55  ;;  %v2155_v55 = vmul.f32 %v6602_v13, %v2151_v8 }
0x103c   :  { %v2177_v2 = vadd.f32 1.0, %v6608_v57 }
0x103d   :  { %6609 = vrcp.f32 %v2176_v1 }
0x103e   :  { %6611 = vrcp.f32 %v2177_v2  ;;  %v2156_v2 = vmul.f32 %v6604_v14, %v2152_v18  ;;  %v2182_v14 = vadd.f32 %v2163_v53, %v7491_v58 }
0x1047   :  { %v6610_v3 = vpop.eup %6609 }
0x1048   :  { %v6612_v4 = vpop.eup %6611 }
0x1080   :  { %v2130_v39 = vpop.permute.xlu1 %2129  ;;  %v2132_v43 = vpop.permute.xlu0 %2131 }
0x1081   :  { %v2135_v44 = vadd.f32 %v2130_v39, %v7441_v42  ;;  %v2136_v51 = vadd.f32 %v2132_v43, %v7446_v47 }
0x1083   :  { %6613 = vtanh.f32 %v2135_v44 }
0x1084   :  { %6615 = vtanh.f32 %v2136_v51  ;;  %v2201_v5 = vpop.permute.xlu1 %2200  ;;  %v2203_v48 = vpop.permute.xlu0 %2202 }
0x1085   :  { %v2206_v11 = vmul.f32 %v6610_v3, %v2201_v5  ;;  %v2207_v12 = vmul.f32 %v6612_v4, %v2203_v48  ;;  %v5602_v48 = vmul.f32 -1.442695, %v2182_v14 }
0x1087   :  { %2210 = vrot.lane.b32.xlu1 %v2206_v11, %s7174_s18  ;;  %2212 = vrot.lane.b32.xlu0 %v2207_v12, %s7174_s18  ;;  %v2183_v11 = vadd.f32 %v2165_v54, %v7496_v62 }
0x1089   :  { %v5603_v12 = vmul.f32 -1.442695, %v2183_v11 }
0x108d   :  { %v6614_v15 = vpop.eup %6613 }
0x108e   :  { %v6616_v61 = vpop.eup %6615  ;;  %2143 = vrot.lane.b32.xlu1 %v6614_v15, %s7175_s4 }
0x108f   :  { %2145 = vrot.lane.b32.xlu0 %v6616_v61, %s7175_s4 }
0x10f9   :  { %v2211_v63 = vpop.permute.xlu1 %2210  ;;  %v2213_v19 = vpop.permute.xlu0 %2212 }
0x10fa   :  { %v2216_v16 = vadd.f32 %v2211_v63, %v7491_v58  ;;  %v2217_v50 = vadd.f32 %v2213_v19, %v7496_v62 }
0x10fc   :  { %6617 = vtanh.f32 %v2216_v16 }
0x10fd   :  { %6619 = vtanh.f32 %v2217_v50 }
0x10fe   :  { %6621 = vpow2.f32 %v5602_v48 }
0x10ff   :  { %6623 = vpow2.f32 %v5603_v12 }
0x1100   :  { %v2144_v6 = vpop.permute.xlu1 %2143 }
0x1101   :  { %v2149_v57 = vmul.f32 %v2144_v6, %v2139_v52  ;;  %v2146_v1 = vpop.permute.xlu0 %2145 }
0x1102   :  { %v2150_v39 = vmul.f32 %v2146_v1, %v2140_v17  ;;  %v2232_v17 = vrot.slane %v7741_v41, 1 }
0x1103   :  { %v7777_v43 = vadd.f32 %v2155_v55, %v2149_v57  ;;  %v2233_v55 = vrot.slane %v7739_v25, 1 }
0x1104   :  { %v7779_v44 = vadd.f32 %v2156_v2, %v2150_v39 }
0x1105   :  { %v2262_v51 = vrot.slane %v7777_v43, 5 }
0x1106   :  { %v6618_v3 = vpop.eup %6617  ;;  %v2263_v4 = vrot.slane %v7779_v44, 4 }
0x1107   :  { %2224 = vrot.lane.b32.xlu0 %v6618_v3, %s7175_s4  ;;  %v6620_v13 = vpop.eup %6619 }
0x1108   :  { %v2264_v5 = vsel %vm8678_vm4, %v2263_v4, %v2262_v51  ;;  %v6622_v15 = vpop.eup %6621 }
0x1109   :  { %2265 = vrot.lane.b32.xlu1 %v2264_v5, %s7175_s4  ;;  %v2190_v61 = vadd.f32 1.0, %v6622_v15  ;;  %v6624_v63 = vpop.eup %6623 }
0x110a   :  { %v2191_v16 = vadd.f32 1.0, %v6624_v63 }
0x110b   :  { %6625 = vrcp.f32 %v2190_v61 }
0x110c   :  { %6627 = vrcp.f32 %v2191_v16 }
0x110d   :  { %2226 = vrot.lane.b32.xlu1 %v6620_v13, %s7175_s4 }
0x1115   :  { %v6626_v19 = vpop.eup %6625 }
0x1116   :  { %v2220_v52 = vsub.f32 1.0, %v6626_v19  ;;  %v6628_v8 = vpop.eup %6627  ;;  %v2236_v54 = vmul.f32 %v6626_v19, %v2232_v17 }
0x1117   :  { %v2221_v18 = vsub.f32 1.0, %v6628_v8  ;;  %v2237_v2 = vmul.f32 %v6628_v8, %v2233_v55 }
0x1179   :  { %v2225_v50 = vpop.permute.xlu0 %2224 }
0x117a   :  { %v2230_v53 = vmul.f32 %v2225_v50, %v2220_v52 }
0x117b   :  { %v2266_v6 = vpop.permute.xlu1 %2265 }
0x117c   :  { %5995 = vmatmul.mubr.msk.f32.vlgmr.msra.gmra.mrb[14].mxu0 %vm8677_vm5, %v2266_v6  ;;  %v7796_v1 = vadd.f32 %v2236_v54, %v2230_v53 }
0x117d   :  { %6296 = vmatpush3.bf16.msra.mxu0 %v7370_v7  ;;  %6016 = vmatprep.mubr.msk.f32.mxu0 %vm7173_vm2, %v7171_v0 }
0x117e   :  { %6297 = vmatprep.subr.bf16.mxu0 %v7172_v9  ;;  %v2339_v7 = vrot.slane %v7796_v1, 2 }
0x117f   :  { %v2227_v57 = vpop.permute.xlu1 %2226 }
0x1180   :  { %v2231_v39 = vmul.f32 %v2227_v57, %v2221_v18 }
0x1181   :  { %6299 = vmatpush3.bf16.msra.mxu0 %v7374_v10 }
0x1182   :  { %v7799_v51 = vadd.f32 %v2237_v2, %v2231_v39 }
0x1184   :  { %v2340_v3 = vrot.slane %v7799_v51, 1 }
0x1186   :  { %v2341_v4 = vsel %vm8678_vm4, %v2340_v3, %v2339_v7 }
0x1187   :  { %6006 = vmatmul.mubr.msk.f32.vlgmr.msra.gmra.mrb[16].mxu1 %vm8677_vm5, %v2341_v4 }
0x1188   :  { %6302 = vmatpush3.bf16.msra.mxu1 %v7405_v24  ;;  %6027 = vmatprep.mubr.msk.f32.mxu1 %vm7173_vm2, %v7171_v0 }
0x1189   :  { %6303 = vmatprep.subr.bf16.mxu1 %v7172_v9 }
0x118c   :  { %6305 = vmatpush3.bf16.msra.mxu1 %v7412_v30 }
0x118d   :  { %6322 = vmatprep.subr.bf16.mxu1 %v7172_v9 }
0x124f   :  { %v2335_v10 = vpop.f32.mrb[14].mxu0 }
0x1250   :  { %v2433_v5 = vadd.f32 %v2335_v10, %v7408_v29  ;;  %v5996_v13 = vpop.f32.mrb[15].mxu0  ;;  %v2415_v61 = vrot.slane %v2335_v10, 2  ;;  %v2416_v63 = vrot.slane %v2335_v10, 3 }
0x1252   :  { %v2436_v14 = vrot.slane %v2433_v5, 3  ;;  %v2435_v48 = vrot.slane %v2433_v5, 2  ;;  %v2419_v16 = vadd.f32 %v2415_v61, %v7441_v42  ;;  %v2420_v19 = vadd.f32 %v2416_v63, %v7446_v47 }
0x1254   :  { %2439 = vrot.lane.b32.xlu1 %v2436_v14, %s7174_s18  ;;  %2437 = vrot.lane.b32.xlu0 %v2435_v48, %s7174_s18  ;;  %v5606_v50 = vmul.f32 -1.442695, %v2419_v16  ;;  %v5607_v52 = vmul.f32 -1.442695, %v2420_v19 }
0x1256   :  { %6629 = vpow2.f32 %v5606_v50 }
0x1257   :  { %6631 = vpow2.f32 %v5607_v52 }
0x125a   :  { %v2410_v24 = vpop.f32.mrb[16].mxu1 }
0x125b   :  { %v2478_v11 = vrot.slane %v2410_v24, 7  ;;  %v2513_v12 = vadd.f32 %v2410_v24, %v7461_v21  ;;  %2481 = vrot.lane.b32.xlu1 %v2410_v24, %s7175_s4  ;;  %v6007_v15 = vpop.f32.mrb[17].mxu1 }
0x125d   :  { %2479 = vrot.lane.b32.xlu0 %v2478_v11, %s7175_s4  ;;  %v2515_v30 = vrot.slane %v2513_v12, 7 }
0x125f   :  { %2518 = vrot.lane.b32.xlu1 %v2513_v12, %s7176_s19 }
0x1260   :  { %v6630_v8 = vpop.eup %6629 }
0x1261   :  { %2516 = vrot.lane.b32.xlu0 %v2515_v30, %s7176_s19  ;;  %v6632_v6 = vpop.eup %6631  ;;  %v2427_v17 = vadd.f32 1.0, %v6630_v8 }
0x1262   :  { %v2428_v53 = vadd.f32 1.0, %v6632_v6 }
0x1263   :  { %6633 = vrcp.f32 %v2427_v17 }
0x1264   :  { %6635 = vrcp.f32 %v2428_v53 }
0x126d   :  { %v7823_v54 = vpop.eup %6633 }
0x126e   :  { %v6636_v18 = vpop.eup %6635 }
0x12c6   :  { %v2440_v55 = vpop.permute.xlu1 %2439  ;;  %v2438_v57 = vpop.permute.xlu0 %2437 }
0x12c7   :  { %v2444_v2 = vmul.f32 %v6636_v18, %v2440_v55  ;;  %v2443_v39 = vmul.f32 %v7823_v54, %v2438_v57 }
0x12c9   :  { %2449 = vrot.lane.b32.xlu1 %v2444_v2, %s7174_s18  ;;  %2447 = vrot.lane.b32.xlu0 %v2443_v39, %s7174_s18 }
0x12cd   :  { %v2482_v7 = vpop.permute.xlu1 %2481 }
0x12ce   :  { %v2486_v4 = vadd.f32 %v2482_v7, %v7446_v47 }
0x12cf   :  { %v2480_v10 = vpop.permute.xlu0 %2479 }
0x12d0   :  { %v5609_v5 = vmul.f32 -1.442695, %v2486_v4  ;;  %v2485_v13 = vadd.f32 %v2480_v10, %v7441_v42 }
0x12d1   :  { %v2519_v30 = vpop.permute.xlu1 %2518 }
0x12d2   :  { %6637 = vpow2.f32 %v5609_v5  ;;  %v5608_v14 = vmul.f32 -1.442695, %v2485_v13  ;;  %v2500_v13 = vadd.f32 %v2482_v7, %v7496_v62 }
0x12d3   :  { %v2517_v16 = vpop.permute.xlu0 %2516 }
0x12d4   :  { %6639 = vpow2.f32 %v5608_v14  ;;  %v2499_v14 = vadd.f32 %v2480_v10, %v7491_v58 }
0x12dc   :  { %v6638_v48 = vpop.eup %6637 }
0x12dd   :  { %v2494_v24 = vadd.f32 1.0, %v6638_v48  ;;  %v2458_v48 = vsub.f32 1.0, %v6636_v18 }
0x12de   :  { %v6640_v11 = vpop.eup %6639 }
0x12df   :  { %6641 = vrcp.f32 %v2494_v24  ;;  %v2493_v12 = vadd.f32 1.0, %v6640_v11  ;;  %v2470_v24 = vrot.slane %v7779_v44, 7 }
0x12e1   :  { %6643 = vrcp.f32 %v2493_v12  ;;  %v2457_v12 = vsub.f32 1.0, %v7823_v54 }
0x12e9   :  { %v6642_v15 = vpop.eup %6641 }
0x12ea   :  { %v2523_v61 = vmul.f32 %v6642_v15, %v2519_v30  ;;  %v2469_v15 = vrot.slane %v7777_v43, 7  ;;  %v5611_v30 = vmul.f32 -1.442695, %v2500_v13  ;;  %v2548_v13 = vrot.slane %v7796_v1, 1 }
0x12eb   :  { %v6644_v63 = vpop.eup %6643 }
0x12ec   :  { %v2522_v19 = vmul.f32 %v6644_v63, %v2517_v16  ;;  %2528 = vrot.lane.b32.xlu1 %v2523_v61, %s7174_s18  ;;  %v2474_v61 = vmul.f32 %v6636_v18, %v2470_v24 }
0x12ee   :  { %2526 = vrot.lane.b32.xlu0 %v2522_v19, %s7174_s18  ;;  %v5610_v19 = vmul.f32 -1.442695, %v2499_v14 }
0x133b   :  { %v2450_v50 = vpop.permute.xlu1 %2449  ;;  %v2448_v52 = vpop.permute.xlu0 %2447 }
0x133c   :  { %v2454_v8 = vadd.f32 %v2450_v50, %v7446_v47  ;;  %v2453_v6 = vadd.f32 %v2448_v52, %v7441_v42  ;;  %v2473_v50 = vmul.f32 %v7823_v54, %v2469_v15 }
0x133e   :  { %6645 = vtanh.f32 %v2454_v8 }
0x133f   :  { %6647 = vtanh.f32 %v2453_v6 }
0x1348   :  { %v6646_v17 = vpop.eup %6645 }
0x1349   :  { %v6648_v53 = vpop.eup %6647  ;;  %2463 = vrot.lane.b32.xlu1 %v6646_v17, %s7175_s4 }
0x134a   :  { %2461 = vrot.lane.b32.xlu0 %v6648_v53, %s7175_s4 }
0x135e   :  { %v2529_v55 = vpop.permute.xlu1 %2528 }
0x135f   :  { %v2533_v57 = vadd.f32 %v2529_v55, %v7496_v62 }
0x1360   :  { %v2527_v2 = vpop.permute.xlu0 %2526 }
0x1361   :  { %6649 = vtanh.f32 %v2533_v57  ;;  %v2532_v39 = vadd.f32 %v2527_v2, %v7491_v58 }
0x1363   :  { %6651 = vtanh.f32 %v2532_v39 }
0x1364   :  { %6653 = vpow2.f32 %v5611_v30 }
0x1365   :  { %6655 = vpow2.f32 %v5610_v19 }
0x136b   :  { %v6650_v4 = vpop.eup %6649 }
0x136c   :  { %2542 = vrot.lane.b32.xlu1 %v6650_v4, %s7175_s4 }
0x136d   :  { %v6652_v5 = vpop.eup %6651 }
0x136e   :  { %2540 = vrot.lane.b32.xlu0 %v6652_v5, %s7175_s4  ;;  %v6654_v18 = vpop.eup %6653 }
0x136f   :  { %v6656_v53 = vpop.eup %6655  ;;  %v2508_v55 = vadd.f32 1.0, %v6654_v18 }
0x1370   :  { %v2507_v57 = vadd.f32 1.0, %v6656_v53 }
0x1371   :  { %6657 = vrcp.f32 %v2508_v55 }
0x1372   :  { %6659 = vrcp.f32 %v2507_v57 }
0x137b   :  { %v6658_v54 = vpop.eup %6657 }
0x137c   :  { %v6660_v2 = vpop.eup %6659  ;;  %v2537_v4 = vsub.f32 1.0, %v6658_v54 }
0x137d   :  { %v2536_v5 = vsub.f32 1.0, %v6660_v2  ;;  %v2551_v24 = vmul.f32 %v6660_v2, %v2548_v13 }
0x13bb   :  { %v2464_v11 = vpop.permute.xlu1 %2463 }
0x13bc   :  { %v2468_v63 = vmul.f32 %v2464_v11, %v2458_v48  ;;  %v2462_v16 = vpop.permute.xlu0 %2461 }
0x13bd   :  { %v2467_v52 = vmul.f32 %v2462_v16, %v2457_v12  ;;  %v2552_v12 = vmul.f32 %v6658_v54, %v2340_v3 }
0x13be   :  { %v7846_v8 = vadd.f32 %v2474_v61, %v2468_v63 }
0x13bf   :  { %v7848_v7 = vadd.f32 %v2473_v50, %v2467_v52 }
0x13c0   :  { %v2578_v10 = vrot.slane %v7846_v8, 5 }
0x13c1   :  { %v2577_v6 = vrot.slane %v7848_v7, 6 }
0x13c3   :  { %v2579_v17 = vsel %vm8678_vm4, %v2578_v10, %v2577_v6 }
0x13c4   :  { %2580 = vrot.lane.b32.xlu0 %v2579_v17, %s7175_s4 }
0x13de   :  { %v2543_v39 = vpop.permute.xlu1 %2542 }
0x13df   :  { %v2547_v48 = vmul.f32 %v2543_v39, %v2537_v4 }
0x13e0   :  { %v2541_v14 = vpop.permute.xlu0 %2540 }
0x13e1   :  { %v2546_v11 = vmul.f32 %v2541_v14, %v2536_v5  ;;  %v7859_v30 = vadd.f32 %v2552_v12, %v2547_v48 }
0x13e3   :  { %v7857_v15 = vadd.f32 %v2551_v24, %v2546_v11 }
0x13e5   :  { %v2654_v61 = vrot.slane %v7857_v15, 1 }
0x13e7   :  { %v2655_v63 = vsel %vm8678_vm4, %v7859_v30, %v2654_v61  ;;  %vm8682_vm4 = vcmask 516352  }
0x13e8   :  { %6028 = vmatmul.mubr.msk.f32.vlgmr.msra.gmra.mrb[18].mxu1 %vm8677_vm5, %v2655_v63 }
0x13e9   :  { %6038 = vmatprep.mubr.msk.f32.mxu1 %vm7173_vm2, %v7171_v0 }
0x1436   :  { %v2581_v16 = vpop.permute.xlu0 %2580 }
0x1437   :  { %6017 = vmatmul.mubr.msk.f32.vlgmr.msra.gmra.mrb[16].mxu0 %vm8677_vm5, %v2581_v16  ;;  %vm8679_vm5 = vcmask 260102  }
0x1438   :  { %2992 = vmatprep.mubr.f32.mxu0 %v7171_v0 }
0x14bb   :  { %v2724_v3 = vpop.f32.mrb[18].mxu1 }
0x14bc   :  { %v2792_v19 = vrot.slane %v2724_v3, 1  ;;  %2793 = vrot.lane.b32.xlu1 %v2724_v3, %s7175_s4  ;;  %v6029_v50 = vpop.f32.mrb[19].mxu1  ;;  %v2827_v52 = vadd.f32 %v2724_v3, %v7461_v21 }
0x14be   :  { %2795 = vrot.lane.b32.xlu0 %v2792_v19, %s7175_s4  ;;  %v2829_v10 = vrot.slane %v2827_v52, 1 }
0x14c2   :  { %2830 = vrot.lane.b32.xlu0 %v2827_v52, %s7176_s19 }
0x14c6   :  { %2832 = vrot.lane.b32.xlu0 %v2829_v10, %s7176_s19 }
0x150a   :  { %v2650_v6 = vpop.f32.mrb[16].mxu0 }
0x150b   :  { %v2747_v17 = vadd.f32 %v2650_v6, %v7408_v29  ;;  %v6018_v18 = vpop.f32.mrb[17].mxu0  ;;  %v2729_v3 = vrot.slane %v2650_v6, 1  ;;  %v2730_v19 = vrot.slane %v2650_v6, 2 }
0x150d   :  { %v2749_v53 = vrot.slane %v2747_v17, 1  ;;  %v2750_v55 = vrot.slane %v2747_v17, 2  ;;  %v2733_v50 = vadd.f32 %v2729_v3, %v7441_v42  ;;  %v2734_v52 = vadd.f32 %v2730_v19, %v7446_v47 }
0x150f   :  { %2751 = vrot.lane.b32.xlu1 %v2749_v53, %s7174_s18  ;;  %v5614_v10 = vmul.f32 -1.442695, %v2733_v50  ;;  %v5615_v17 = vmul.f32 -1.442695, %v2734_v52  ;;  %v2896_v52 = vld [vmem:[#allocation12 + $0x18] sm:$0xff] }
0x1513   :  { %2753 = vrot.lane.b32.xlu1 %v2750_v55, %s7174_s18 }
0x152e   :  { %v7879_v57 = vpop.permute.xlu1 %2793 }
0x152f   :  { %v2799_v21 = vadd.f32 %v7879_v57, %v7441_v42 }
0x1530   :  { %v7883_v54 = vpop.permute.xlu0 %2795 }
0x1531   :  { %v5616_v2 = vmul.f32 -1.442695, %v2799_v21  ;;  %v2800_v39 = vadd.f32 %v7883_v54, %v7446_v47 }
0x1533   :  { %6661 = vpow2.f32 %v5616_v2  ;;  %v5617_v29 = vmul.f32 -1.442695, %v2800_v39 }
0x1534   :  { %v2831_v48 = vpop.permute.xlu0 %2830 }
0x1535   :  { %6663 = vpow2.f32 %v5617_v29 }
0x1538   :  { %v2833_v63 = vpop.permute.xlu0 %2832 }
0x153d   :  { %v6662_v4 = vpop.eup %6661 }
0x153e   :  { %v2807_v5 = vadd.f32 1.0, %v6662_v4 }
0x153f   :  { %v6664_v13 = vpop.eup %6663 }
0x1540   :  { %6665 = vrcp.f32 %v2807_v5  ;;  %v2808_v14 = vadd.f32 1.0, %v6664_v13 }
0x1542   :  { %6667 = vrcp.f32 %v2808_v14 }
0x1543   :  { %6669 = vpow2.f32 %v5614_v10  ;;  %v2893_v10 = vld [vmem:[#allocation12] sm:$0xff] }
0x1544   :  { %6671 = vpow2.f32 %v5615_v17  ;;  %v2895_v17 = vld [vmem:[#allocation12 + $0x10] sm:$0xff] }
0x154a   :  { %v6666_v24 = vpop.eup %6665 }
0x154b   :  { %v2836_v11 = vmul.f32 %v6666_v24, %v2831_v48 }
0x154c   :  { %v6668_v12 = vpop.eup %6667 }
0x154d   :  { %2840 = vrot.lane.b32.xlu0 %v2836_v11, %s7174_s18  ;;  %v2837_v16 = vmul.f32 %v6668_v12, %v2833_v63  ;;  %v6670_v18 = vpop.eup %6669 }
0x154e   :  { %v2741_v53 = vadd.f32 1.0, %v6670_v18  ;;  %v6672_v55 = vpop.eup %6671  ;;  %v2898_v18 = vld [vmem:[#allocation12 + $0x28] sm:$0xff] }
0x154f   :  { %v2742_v21 = vadd.f32 1.0, %v6672_v55 }
0x1550   :  { %6673 = vrcp.f32 %v2741_v53  ;;  %v2900_v53 = vld [vmem:[#allocation12 + $0x38] sm:$0xff] }
0x1551   :  { %2842 = vrot.lane.b32.xlu0 %v2837_v16, %s7174_s18  ;;  %6675 = vrcp.f32 %v2742_v21  ;;  %v6308_v21 = vpack.c.bf16 %v2895_v17, %v2893_v10 }
0x155a   :  { %v7891_v2 = vpop.eup %6673 }
0x155b   :  { %v7895_v6 = vpop.eup %6675 }
0x1581   :  { %v2752_v39 = vpop.permute.xlu1 %2751 }
0x1582   :  { %v2757_v29 = vmul.f32 %v7891_v2, %v2752_v39  ;;  %v2897_v39 = vld [vmem:[#allocation12 + $0x20] sm:$0xff] }
0x1584   :  { %2761 = vrot.lane.b32.xlu1 %v2757_v29, %s7174_s18  ;;  %v2899_v29 = vld [vmem:[#allocation12 + $0x30] sm:$0xff] }
0x1585   :  { %v2754_v4 = vpop.permute.xlu1 %2753 }
0x1586   :  { %v2758_v5 = vmul.f32 %v7895_v6, %v2754_v4  ;;  %v6312_v4 = vpack.c.bf16 %v2899_v29, %v2897_v39 }
0x1588   :  { %2763 = vrot.lane.b32.xlu1 %v2758_v5, %s7174_s18 }
0x15bf   :  { %v2841_v13 = vpop.permute.xlu0 %2840 }
0x15c0   :  { %v2846_v14 = vadd.f32 %v2841_v13, %v7491_v58 }
0x15c2   :  { %6677 = vtanh.f32 %v2846_v14 }
0x15c3   :  { %v2843_v48 = vpop.permute.xlu0 %2842 }
0x15c4   :  { %v2847_v24 = vadd.f32 %v2843_v48, %v7496_v62  ;;  %v2902_v48 = vld [vmem:[#allocation12 + $0x48] sm:$0xff] }
0x15c6   :  { %6679 = vtanh.f32 %v2847_v24  ;;  %v2904_v24 = vld [vmem:[#allocation12 + $0x58] sm:$0xff] }
0x15cc   :  { %v6678_v11 = vpop.eup %6677 }
0x15cd   :  { %2854 = vrot.lane.b32.xlu0 %v6678_v11, %s7175_s4  ;;  %v6314_v11 = vpack.c.bf16 %v2904_v24, %v2902_v48 }
0x15d0   :  { %v6680_v12 = vpop.eup %6679 }
0x15d1   :  { %2856 = vrot.lane.b32.xlu0 %v6680_v12, %s7175_s4  ;;  %v2901_v12 = vld [vmem:[#allocation12 + $0x40] sm:$0xff] }
0x15d5   :  { %667 = vrot.lane.b32.xlu0 %v7505_v28, %s7176_s19 }
0x15d9   :  { %982 = vrot.lane.b32.xlu0 %v7562_v34, %s7176_s19 }
0x15dd   :  { %1299 = vrot.lane.b32.xlu0 %v7623_v60, %s7176_s19 }
0x15e1   :  { %1617 = vrot.lane.b32.xlu0 %v7680_v32, %s7176_s19 }
0x15e5   :  { %1935 = vrot.lane.b32.xlu0 %v7741_v41, %s7176_s19  ;;  %v2813_v41 = vadd.f32 %v7879_v57, %v7491_v58 }
0x15e9   :  { %2253 = vrot.lane.b32.xlu0 %v7796_v1, %s7176_s19  ;;  %v5618_v1 = vmul.f32 -1.442695, %v2813_v41 }
0x15ed   :  { %2568 = vrot.lane.b32.xlu0 %v7857_v15, %s7176_s19 }
0x15f6   :  { %v2762_v63 = vpop.permute.xlu1 %2761 }
0x15f7   :  { %v2767_v28 = vadd.f32 %v2762_v63, %v7441_v42  ;;  %v3005_v42 = vld [vmem:[%s8671_s11] sm:$0xff]  ;;  %v2903_v63 = vld [vmem:[#allocation12 + $0x50] sm:$0xff] }
0x15f9   :  { %6681 = vtanh.f32 %v2767_v28  ;;  %v6316_v28 = vpack.c.bf16 %v2903_v63, %v2901_v12 }
0x15fa   :  { %v2764_v34 = vpop.permute.xlu1 %2763 }
0x15fb   :  { %v2768_v16 = vadd.f32 %v2764_v34, %v7446_v47  ;;  %v3006_v47 = vld [vmem:[%s8671_s11 + $0x8] sm:$0xff]  ;;  %v2908_v34 = vld [vmem:[#allocation12 + $0x78] sm:$0xff] }
0x15fd   :  { %6683 = vtanh.f32 %v2768_v16 }
0x15fe   :  { %6685 = vpow2.f32 %v5618_v1 }
0x1603   :  { %v6682_v60 = vpop.eup %6681 }
0x1604   :  { %2775 = vrot.lane.b32.xlu1 %v6682_v60, %s7175_s4  ;;  %v2905_v60 = vld [vmem:[#allocation12 + $0x60] sm:$0xff] }
0x1607   :  { %v6684_v32 = vpop.eup %6683 }
0x1608   :  { %2777 = vrot.lane.b32.xlu1 %v6684_v32, %s7175_s4  ;;  %v2907_v32 = vld [vmem:[#allocation12 + $0x70] sm:$0xff] }
0x160c   :  { %656 = vrot.lane.b32.xlu1 %v7463_v22, %s7175_s4  ;;  %v7937_v22 = vpack.c.bf16 %v3006_v47, %v3005_v42  ;;  %v6320_v42 = vpack.c.bf16 %v2907_v32, %v2905_v60  ;;  %v2783_v47 = vrot.slane %v7848_v7, 7  ;;  %v8069_v60 = vld [vmem:[#allocation14] sm:$0x3] }
0x160d   :  { %v2914_v32 = vrot.slane %v8069_v60, %v258_v38 }
0x160e   :  { %6324 = vmatpush3.bf16.msra.mxu1 %v7937_v22 }
0x160f   :  { %6325 = vmatprep.subr.bf16.mxu1 %v7172_v9 }
0x1610   :  { %971 = vrot.lane.b32.xlu1 %v7535_v26, %s7175_s4  ;;  %v3007_v26 = vld [vmem:[%s8671_s11 + $0x10] sm:$0xff] }
0x1614   :  { %1288 = vrot.lane.b32.xlu1 %v7596_v49, %s7175_s4  ;;  %v3008_v49 = vld [vmem:[%s8671_s11 + $0x18] sm:$0xff] }
0x1615   :  { %v7949_v58 = vpack.c.bf16 %v3008_v49, %v3007_v26  ;;  %v2787_v49 = vmul.f32 %v7891_v2, %v2783_v47 }
0x1617   :  { %6327 = vmatpush3.bf16.msra.mxu1 %v7949_v58 }
0x1618   :  { %1606 = vrot.lane.b32.xlu1 %v7657_v23, %s7175_s4  ;;  %6328 = vmatprep.subr.bf16.mxu1 %v7172_v9  ;;  %v6686_v23 = vpop.eup %6685 }
0x161a   :  { %6039 = vmatmul.mubr.f32.vlgmr.msra.gmra.mrb[20].mxu1 %v7171_v0 }
0x161b   :  { %6049 = vmatprep.mubr.msk.f32.mxu1 %vm7173_vm2, %v7171_v0 }
0x161c   :  { %1924 = vrot.lane.b32.xlu1 %v7718_v40, %s7175_s4  ;;  %v2821_v40 = vadd.f32 1.0, %v6686_v23 }
0x161e   :  { %6687 = vrcp.f32 %v2821_v40  ;;  %v2772_v40 = vsub.f32 1.0, %v7895_v6 }
0x1620   :  { %2242 = vrot.lane.b32.xlu1 %v7777_v43, %s7175_s4  ;;  %v2814_v43 = vadd.f32 %v7883_v54, %v7496_v62 }
0x1622   :  { %v5619_v57 = vmul.f32 -1.442695, %v2814_v43  ;;  %v2784_v43 = vrot.slane %v7846_v8, 7 }
0x1624   :  { %2557 = vrot.lane.b32.xlu1 %v7848_v7, %s7175_s4  ;;  %6689 = vpow2.f32 %v5619_v57 }
0x1628   :  { %658 = vrot.lane.b32.xlu1 %v7459_v20, %s7175_s4  ;;  %v6688_v20 = vpop.eup %6687 }
0x162c   :  { %973 = vrot.lane.b32.xlu1 %v7537_v27, %s7175_s4  ;;  %v2850_v27 = vsub.f32 1.0, %v6688_v20 }
0x162e   :  { %v6690_v54 = vpop.eup %6689 }
0x1630   :  { %1290 = vrot.lane.b32.xlu1 %v7594_v46, %s7175_s4  ;;  %v2865_v46 = vmul.f32 %v6688_v20, %v2654_v61  ;;  %v3009_v20 = vld [vmem:[#allocation15] sm:$0xff] }
0x1634   :  { %1608 = vrot.lane.b32.xlu1 %v7659_v45, %s7175_s4 }
0x1638   :  { %1926 = vrot.lane.b32.xlu1 %v7716_v31, %s7175_s4 }
0x163c   :  { %2244 = vrot.lane.b32.xlu1 %v7779_v44, %s7175_s4  ;;  %v2822_v44 = vadd.f32 1.0, %v6690_v54 }
0x163e   :  { %6691 = vrcp.f32 %v2822_v44 }
0x163f   :  { %v2855_v3 = vpop.permute.xlu0 %2854 }
0x1640   :  { %2559 = vrot.lane.b32.xlu1 %v7846_v8, %s7175_s4  ;;  %v2860_v45 = vmul.f32 %v2855_v3, %v2850_v27  ;;  %v3010_v27 = vld [vmem:[#allocation15 + $0x8] sm:$0xff]  ;;  %v2788_v3 = vmul.f32 %v7895_v6, %v2784_v43  ;;  %v5622_v6 = vld [vmem:[%s8673_s13] ss:$0 sm:$0xff] }
0x1641   :  { %v8007_v7 = vpack.c.bf16 %v3010_v27, %v3009_v20 }
0x1642   :  { %v2867_v19 = vadd.f32 %v2865_v46, %v2860_v45  ;;  %v3011_v45 = vld [vmem:[#allocation15 + $0x10] sm:$0xff] }
0x1643   :  { %v2857_v62 = vpop.permute.xlu0 %2856  ;;  %6330 = vmatpush3.bf16.msra.mxu1 %v8007_v7 }
0x1644   :  { %2882 = vrot.lane.b32.xlu0 %v2867_v19, %s7176_s19  ;;  %v3012_v19 = vld [vmem:[#allocation15 + $0x18] sm:$0xff]  ;;  %6331 = vmatprep.subr.bf16.mxu1 %v7172_v9 }
0x1647   :  { %v668_v31 = vpop.permute.xlu0 %667 }
0x1648   :  { %674 = vst.msk [vmem:[#allocation2] sm:$0x80] %vm673_vm6, %v668_v31  ;;  %669 = vrot.lane.b32.xlu0 %v7507_v33, %s7176_s19  ;;  %v2894_v33 = vld [vmem:[#allocation12 + $0x8] sm:$0xff]  ;;  %v6692_v55 = vpop.eup %6691  ;;  %v8010_v31 = vpack.c.bf16 %v3012_v19, %v3011_v45 }
0x1649   :  { %v2851_v5 = vsub.f32 1.0, %v6692_v55 }
0x164a   :  { %6333 = vmatpush3.bf16.msra.mxu1 %v8010_v31 }
0x164b   :  { %v983_v50 = vpop.permute.xlu0 %982  ;;  %6340 = vmatprep.subr.bf16.mxu1 %v7172_v9 }
0x164c   :  { %989 = vst.msk [vmem:[#allocation2] sm:$0x40] %vm988_vm7, %v983_v50  ;;  %984 = vrot.lane.b32.xlu0 %v7564_v35, %s7176_s19  ;;  %v6306_v35 = vpack.c.bf16 %v2896_v52, %v2894_v33 }
0x164d   :  { %6050 = vmatmul.mubr.f32.vlgmr.msra.gmra.mrb[22].mxu1 %v7171_v0 }
0x164e   :  { %6307 = vmatprep.subr.bf16.mxu0 %v6306_v35  ;;  %6342 = vmatpush3.bf16.msra.mxu1 %v8007_v7 }
0x164f   :  { %v1300_v15 = vpop.permute.xlu0 %1299  ;;  %6309 = vmatpush1.bf16.msra.mxu0 %v6308_v21  ;;  %6071 = vmatprep.mubr.msk.f32.mxu1 %vm7173_vm2, %v7171_v0 }
0x1650   :  { %1306 = vst.msk [vmem:[#allocation2] sm:$0x20] %vm1305_vm8, %v1300_v15  ;;  %1301 = vrot.lane.b32.xlu0 %v7621_v59, %s7176_s19  ;;  %v6310_v59 = vpack.c.bf16 %v2900_v53, %v2898_v18  ;;  %6343 = vmatprep.subr.bf16.mxu1 %v7172_v9 }
0x1652   :  { %6311 = vmatprep.subr.bf16.mxu0 %v6310_v59  ;;  %6345 = vmatpush3.bf16.msra.mxu1 %v8010_v31 }
0x1653   :  { %v1618_v61 = vpop.permute.xlu0 %1617  ;;  %6313 = vmatpush1.bf16.msra.mxu0 %v6312_v4  ;;  %6352 = vmatprep.subr.bf16.mxu1 %v7172_v9 }
0x1654   :  { %1624 = vst.msk [vmem:[#allocation2] sm:$0x10] %vm1623_vm9, %v1618_v61  ;;  %1619 = vrot.lane.b32.xlu0 %v7682_v36, %s7176_s19  ;;  %v2862_v36 = vrot.slane %v7859_v30, 1  ;;  %6315 = vmatprep.subr.bf16.mxu0 %v6314_v11 }
0x1656   :  { %v2866_v13 = vmul.f32 %v6692_v55, %v2862_v36 }
0x1657   :  { %6317 = vmatpush1.bf16.msra.mxu0 %v6316_v28  ;;  %v1936_v26 = vpop.permute.xlu0 %1935 }
0x1658   :  { %1937 = vrot.lane.b32.xlu0 %v7739_v25, %s7176_s19  ;;  %v2861_v25 = vmul.f32 %v2857_v62, %v2851_v5 }
0x165a   :  { %v2868_v14 = vadd.f32 %v2866_v13, %v2861_v25 }
0x165c   :  { %2255 = vrot.lane.b32.xlu0 %v7799_v51, %s7176_s19  ;;  %v2906_v51 = vld [vmem:[#allocation12 + $0x68] sm:$0xff] }
0x165d   :  { %v6318_v16 = vpack.c.bf16 %v2908_v34, %v2906_v51 }
0x165f   :  { %6319 = vmatprep.subr.bf16.mxu0 %v6318_v16 }
0x1660   :  { %2570 = vrot.lane.b32.xlu0 %v7859_v30, %s7176_s19  ;;  %v2771_v30 = vsub.f32 1.0, %v7891_v2  ;;  %6321 = vmatpush1.bf16.msra.mxu0 %v6320_v42  ;;  %v2254_v2 = vpop.permute.xlu0 %2253 }
0x1661   :  { %6334 = vmatprep.subr.bf16.mxu0 %v7172_v9 }
0x1664   :  { %2884 = vrot.lane.b32.xlu0 %v2868_v14, %s7176_s19  ;;  %v2569_v44 = vpop.permute.xlu0 %2568 }
0x1676   :  { %v2776_v41 = vpop.permute.xlu1 %2775 }
0x1677   :  { %v2781_v1 = vmul.f32 %v2776_v41, %v2771_v30 }
0x1679   :  { %v2789_v23 = vadd.f32 %v2787_v49, %v2781_v1 }
0x167a   :  { %v2778_v57 = vpop.permute.xlu1 %2777 }
0x167b   :  { %v2782_v46 = vmul.f32 %v2778_v57, %v2772_v40  ;;  %2871 = vrot.lane.b32.xlu1 %v2789_v23, %s7175_s4 }
0x167d   :  { %v2790_v62 = vadd.f32 %v2788_v3, %v2782_v46 }
0x167e   :  { %v657_v8 = vpop.permute.xlu1 %656 }
0x167f   :  { %663 = vst.msk [vmem:[#allocation2] sm:$0x1] %vm662_vm10, %v657_v8  ;;  %2873 = vrot.lane.b32.xlu1 %v2790_v62, %s7175_s4 }
0x1682   :  { %v972_v54 = vpop.permute.xlu1 %971 }
0x1683   :  { %978 = vst.msk [vmem:[#allocation2] sm:$0x2] %vm977_vm11, %v972_v54  ;;  %3183 = vrot.lane.b32.xlu1 %v5622_v6, %s7174_s18 }
0x1684   :  { %2575 = vst.msk [vmem:[#allocation2] sm:$0x2] %vm2574_vm12, %v2569_v44 }
0x1686   :  { %v1289_v50 = vpop.permute.xlu1 %1288 }
0x1687   :  { %1295 = vst.msk [vmem:[#allocation2] sm:$0x4] %vm1294_vm13, %v1289_v50 }
0x1688   :  { %2260 = vst.msk [vmem:[#allocation2] sm:$0x4] %vm2259_vm14, %v2254_v2 }
0x168a   :  { %v1607_v15 = vpop.permute.xlu1 %1606 }
0x168b   :  { %1613 = vst.msk [vmem:[#allocation2] sm:$0x8] %vm1612_vm15, %v1607_v15 }
0x168c   :  { %1942 = vst.msk [vmem:[#allocation2] sm:$0x8] %vm1941_vm0, %v1936_v26 }
0x168e   :  { %v1925_v61 = vpop.permute.xlu1 %1924 }
0x168f   :  { %1931 = vst.msk [vmem:[#allocation2] sm:$0x10] %vm1930_vm1, %v1925_v61 }
0x1692   :  { %v2243_v33 = vpop.permute.xlu1 %2242 }
0x1693   :  { %2249 = vst.msk [vmem:[#allocation2] sm:$0x20] %vm8680_vm3, %v2243_v33 }
0x1696   :  { %v2558_v52 = vpop.permute.xlu1 %2557 }
0x1697   :  { %2564 = vst.msk [vmem:[#allocation2] sm:$0x40] %vm8679_vm5, %v2558_v52 }
0x169a   :  { %v659_v10 = vpop.permute.xlu1 %658 }
0x169b   :  { %664 = vst.msk [vmem:[#allocation2 + $0x8] sm:$0x1] %vm662_vm10, %v659_v10 }
0x169e   :  { %v974_v35 = vpop.permute.xlu1 %973 }
0x169f   :  { %979 = vst.msk [vmem:[#allocation2 + $0x8] sm:$0x2] %vm977_vm11, %v974_v35  ;;  %v5623_v35 = vld [vmem:[%s8674_s14] ss:$0 sm:$0xff]  ;;  %s7177_s14 = smov [#allocation17]  }
0x16a0   :  { %s5534_s30 = sshll.u32 %s7177_s14, 4  ;;  %s5535_s30 = int_to_ptr.vmem [resolvable:$true] %s5534_s30 }
0x16a1   :  { %s7125_s0 = scalar_lea.vmem %s5535_s30, 256  ;;  %p7130_p9 = scmp.lt.s32.totalorder %s5535_s30, %s5535_s30 }
0x16a2   :  { %v1291_v17 = vpop.permute.xlu1 %1290  ;;  %p7126_p8 = scmp.ne.s32.totalorder %s5535_s30, %s7125_s0  ;;  %p7131_p10 = scmp.lt.s32.totalorder %s7125_s0, %s7125_s0 }
0x16a3   :  { %1296 = vst.msk [vmem:[#allocation2 + $0x8] sm:$0x4] %vm1294_vm13, %v1291_v17 }
0x16a4   :  { %p7132_p11 = por %p7131_p10, %p7130_p9 }
0x16a6   :  { %v1609_v18 = vpop.permute.xlu1 %1608  ;;  %p7133_p12 = pnand %p7132_p11, %p7126_p8 }
0x16a7   :  { %1614 = vst.msk [vmem:[#allocation2 + $0x8] sm:$0x8] %vm1612_vm15, %v1609_v18 }
0x16aa   :  { %v1927_v53 = vpop.permute.xlu1 %1926 }
0x16ae   :  { %v2245_v21 = vpop.permute.xlu1 %2244 }
0x16b2   :  { %v2560_v29 = vpop.permute.xlu1 %2559 }
0x16b6   :  { %v2883_v55 = vpop.permute.xlu0 %2882 }
0x16b7   :  { %2889 = vst.msk [vmem:[#allocation2] sm:$0x1] %vm8682_vm4, %v2883_v55 }
0x16ba   :  { %v670_v59 = vpop.permute.xlu0 %669 }
0x16bb   :  { %675 = vst.msk [vmem:[#allocation2 + $0x8] sm:$0x80] %vm673_vm6, %v670_v59 }
0x16be   :  { %v985_v39 = vpop.permute.xlu0 %984 }
0x16bf   :  { %990 = vst.msk [vmem:[#allocation2 + $0x8] sm:$0x40] %vm988_vm7, %v985_v39 }
0x16c0   :  { %2565 = vst.msk [vmem:[#allocation2 + $0x8] sm:$0x40] %vm8679_vm5, %v2560_v29  ;;  %vm8683_vm5 = vcmask 261127  }
0x16c2   :  { %v1302_v4 = vpop.permute.xlu0 %1301 }
0x16c3   :  { %1307 = vst.msk [vmem:[#allocation2 + $0x8] sm:$0x20] %vm1305_vm8, %v1302_v4 }
0x16c4   :  { %2250 = vst.msk [vmem:[#allocation2 + $0x8] sm:$0x20] %vm8680_vm3, %v2245_v21  ;;  %vm8681_vm3 = vcmask 523264  }
0x16c6   :  { %v1620_v5 = vpop.permute.xlu0 %1619 }
0x16c7   :  { %1625 = vst.msk [vmem:[#allocation2 + $0x8] sm:$0x10] %vm1623_vm9, %v1620_v5 }
0x16c8   :  { %1932 = vst.msk [vmem:[#allocation2 + $0x8] sm:$0x10] %vm1930_vm1, %v1927_v53 }
0x16ca   :  { %v1938_v36 = vpop.permute.xlu0 %1937 }
0x16cb   :  { %1943 = vst.msk [vmem:[#allocation2 + $0x8] sm:$0x8] %vm1941_vm0, %v1938_v36 }
0x16ce   :  { %v2256_v25 = vpop.permute.xlu0 %2255 }
0x16cf   :  { %2261 = vst.msk [vmem:[#allocation2 + $0x8] sm:$0x4] %vm2259_vm14, %v2256_v25 }
0x16d2   :  { %v2571_v13 = vpop.permute.xlu0 %2570 }
0x16d3   :  { %2576 = vst.msk [vmem:[#allocation2 + $0x8] sm:$0x2] %vm2574_vm12, %v2571_v13 }
0x16d6   :  { %v2885_v14 = vpop.permute.xlu0 %2884 }
0x16d7   :  { %2890 = vst.msk [vmem:[#allocation2 + $0x8] sm:$0x1] %vm8682_vm4, %v2885_v14  ;;  %vm8688_vm4 = vcmask 261120  }
0x16ed   :  { %v2872_v48 = vpop.permute.xlu1 %2871  ;;  %v3091_v11 = vpop.f32.mrb[20].mxu1 }
0x16ee   :  { %2878 = vst.msk [vmem:[#allocation2] sm:$0x80] %vm8683_vm5, %v2872_v48  ;;  %v6040_v28 = vpop.f32.mrb[21].mxu1  ;;  %v3166_v49 = vrot.slane %v3091_v11, 1 }
0x16f1   :  { %v2874_v24 = vpop.permute.xlu1 %2873 }
0x16f2   :  { %2879 = vst.msk [vmem:[#allocation2 + $0x8] sm:$0x80] %vm8683_vm5, %v2874_v24 }
0x16f5   :  { %v2891_v12 = vld [vmem:[#allocation2] sm:$0xff]  ;;  %v8055_v63 = vpop.permute.xlu1 %3183 }
0x16f6   :  { %5620 = vmatmul.mubr.msk.f32.vlgmr.msra.gmra.mrb[18].mxu0 %vm8681_vm3, %v2891_v12  ;;  %v3186_v51 = vadd.f32 %v8055_v63, %v3091_v11 }
0x16f7   :  { %2998 = vmatprep.mubr.f32.mxu0 %v7171_v0  ;;  %6336 = vmatpush3.bf16.msra.mxu0 %v7937_v22 }
0x16f8   :  { %3189 = vrot.lane.b32.xlu1 %v3186_v51, %s7174_s18  ;;  %v3188_v34 = vrot.slane %v3186_v51, 1  ;;  %6337 = vmatprep.subr.bf16.mxu0 %v7172_v9 }
0x16f9   :  { %v2892_v16 = vld [vmem:[#allocation2 + $0x8] sm:$0xff] }
0x16fa   :  { %5621 = vmatmul.mubr.msk.f32.gmra.mrb[20].mxu0 %vm8681_vm3, %v2892_v16  ;;  %3191 = vrot.lane.b32.xlu0 %v3188_v34, %s7174_s18  ;;  %vm8685_vm3 = vcmask 1041409  }
0x16fb   :  { %6339 = vmatpush3.bf16.msra.mxu0 %v7949_v58  ;;  %6060 = vmatprep.mubr.msk.f32.mxu0 %vm7173_vm2, %v7171_v0 }
0x16fc   :  { %6346 = vmatprep.subr.bf16.mxu0 %v7172_v9 }
0x1720   :  { %v3161_v62 = vpop.f32.mrb[22].mxu1 }
0x1721   :  { %v6051_v6 = vpop.f32.mrb[23].mxu1  ;;  %v3226_v52 = vrot.slane %v3161_v62, 1  ;;  %v3227_v17 = vrot.slane %v3161_v62, 2 }
0x176a   :  { %v3190_v46 = vpop.permute.xlu1 %3189 }
0x176c   :  { %v3192_v2 = vpop.permute.xlu0 %3191 }
0x17c9   :  { %v2994_v42 = vpop.f32.mrb[18].mxu0 }
0x17ca   :  { %v8074_v30 = vadd.f32 %v2994_v42, %v2914_v32  ;;  %v8076_v47 = vpop.f32.mrb[19].mxu0 }
0x17cc   :  { %v3169_v41 = vadd.f32 %v3091_v11, %v8074_v30 }
0x17cd   :  { %v3000_v26 = vpop.f32.mrb[20].mxu0 }
0x17ce   :  { %v8079_v1 = vadd.f32 %v3000_v26, %v2914_v32  ;;  %v8081_v23 = vpop.f32.mrb[21].mxu0  ;;  %v5624_v40 = vmul.f32 -1.442695, %v3169_v41 }
0x17d0   :  { %6693 = vpow2.f32 %v5624_v40  ;;  %v3170_v43 = vadd.f32 %v3166_v49, %v8079_v1 }
0x17d2   :  { %v5625_v57 = vmul.f32 -1.442695, %v3170_v43 }
0x17d4   :  { %6695 = vpow2.f32 %v5625_v57 }
0x17da   :  { %v6694_v38 = vpop.eup %6693 }
0x17db   :  { %v3177_v20 = vadd.f32 1.0, %v6694_v38 }
0x17dd   :  { %6697 = vrcp.f32 %v3177_v20 }
0x17de   :  { %v6696_v27 = vpop.eup %6695 }
0x17df   :  { %v3178_v3 = vadd.f32 1.0, %v6696_v27 }
0x17e1   :  { %6699 = vrcp.f32 %v3178_v3 }
0x17e7   :  { %v6698_v45 = vpop.eup %6697 }
0x17e8   :  { %v3195_v19 = vmul.f32 %v6698_v45, %v3190_v46  ;;  %v3209_v53 = vsub.f32 1.0, %v6698_v45  ;;  %v3221_v4 = vmul.f32 0.0, %v6698_v45  ;;  %v2918_v46 = vrot.slane %v8069_v60, %v262_v56 }
0x17ea   :  { %3199 = vrot.lane.b32.xlu1 %v3195_v19, %s7174_s18  ;;  %v8126_v45 = vadd.f32 %v8076_v47, %v2918_v46 }
0x17eb   :  { %v6700_v8 = vpop.eup %6699 }
0x17ec   :  { %v3196_v54 = vmul.f32 %v6700_v8, %v3192_v2  ;;  %v3210_v55 = vsub.f32 1.0, %v6700_v8  ;;  %v3222_v39 = vmul.f32 0.0, %v6700_v8 }
0x17ee   :  { %3201 = vrot.lane.b32.xlu0 %v3196_v54, %s7174_s18 }
0x185c   :  { %v3200_v44 = vpop.permute.xlu1 %3199 }
0x185d   :  { %v3205_v50 = vadd.f32 %v3200_v44, %v8074_v30 }
0x185f   :  { %6701 = vtanh.f32 %v3205_v50 }
0x1860   :  { %v3202_v15 = vpop.permute.xlu0 %3201 }
0x1861   :  { %v3206_v61 = vadd.f32 %v3202_v15, %v8079_v1 }
0x1863   :  { %6703 = vtanh.f32 %v3206_v61 }
0x1869   :  { %v6702_v33 = vpop.eup %6701 }
0x186a   :  { %3213 = vrot.lane.b32.xlu1 %v6702_v33, %s7175_s4 }
0x186d   :  { %v6704_v10 = vpop.eup %6703 }
0x186e   :  { %3228 = vrot.lane.b32.xlu1 %v3226_v52, %s7175_s4  ;;  %3215 = vrot.lane.b32.xlu0 %v6704_v10, %s7175_s4 }
0x1872   :  { %3262 = vrot.lane.b32.xlu0 %v5623_v35, %s7174_s18 }
0x1876   :  { %3230 = vrot.lane.b32.xlu0 %v3227_v17, %s7175_s4 }
0x18dc   :  { %v3214_v18 = vpop.permute.xlu1 %3213 }
0x18dd   :  { %v3219_v59 = vmul.f32 %v3214_v18, %v3209_v53 }
0x18df   :  { %v8100_v25 = vadd.f32 %v3221_v4, %v3219_v59 }
0x18e0   :  { %v3216_v21 = vpop.permute.xlu0 %3215  ;;  %v3229_v12 = vpop.permute.xlu1 %3228 }
0x18e1   :  { %v3220_v29 = vmul.f32 %v3216_v21, %v3210_v55  ;;  %v3234_v28 = vadd.f32 %v3229_v12, %v8074_v30  ;;  %v3248_v56 = vadd.f32 %v3229_v12, %v8126_v45 }
0x18e3   :  { %v8096_v5 = vadd.f32 %v3222_v39, %v3220_v29  ;;  %v5626_v16 = vmul.f32 -1.442695, %v3234_v28  ;;  %v5628_v47 = vmul.f32 -1.442695, %v3248_v56 }
0x18e4   :  { %v8098_v36 = vpop.permute.xlu0 %3262 }
0x18e5   :  { %v3325_v13 = vrot.slane %v8096_v5, 7  ;;  %v3265_v14 = vadd.f32 %v8098_v36, %v3161_v62  ;;  %6705 = vpow2.f32 %v5626_v16  ;;  %v8130_v62 = vadd.f32 %v8081_v23, %v2918_v46 }
0x18e7   :  { %v3326_v48 = vsel %vm8685_vm3, %v3325_v13, %v8100_v25  ;;  %v3267_v24 = vrot.slane %v3265_v14, 1  ;;  %v3268_v11 = vrot.slane %v3265_v14, 2  ;;  %vm8686_vm3 = vcmask 261120  }
0x18e8   :  { %3327 = vrot.lane.b32.xlu1 %v3326_v48, %s7175_s4  ;;  %v3231_v51 = vpop.permute.xlu0 %3230 }
0x18e9   :  { %3269 = vrot.lane.b32.xlu0 %v3267_v24, %s7176_s19  ;;  %v3235_v34 = vadd.f32 %v3231_v51, %v8079_v1  ;;  %v3249_v60 = vadd.f32 %v3231_v51, %v8130_v62 }
0x18eb   :  { %v5627_v32 = vmul.f32 -1.442695, %v3235_v34  ;;  %v5629_v15 = vmul.f32 -1.442695, %v3249_v60 }
0x18ec   :  { %3271 = vrot.lane.b32.xlu1 %v3268_v11, %s7176_s19 }
0x18ed   :  { %6707 = vpow2.f32 %v5627_v32 }
0x18ef   :  { %v6706_v42 = vpop.eup %6705 }
0x18f0   :  { %v3242_v26 = vadd.f32 1.0, %v6706_v42 }
0x18f2   :  { %6709 = vrcp.f32 %v3242_v26 }
0x18f7   :  { %v6708_v41 = vpop.eup %6707 }
0x18f8   :  { %v3243_v49 = vadd.f32 1.0, %v6708_v41 }
0x18fa   :  { %6711 = vrcp.f32 %v3243_v49 }
0x18fc   :  { %v6710_v43 = vpop.eup %6709 }
0x1904   :  { %v6712_v20 = vpop.eup %6711 }
0x195a   :  { %v3328_v40 = vpop.permute.xlu1 %3327 }
0x195b   :  { %6061 = vmatmul.mubr.msk.f32.vlgmr.msra.gmra.mrb[22].mxu0 %vm8686_vm3, %v3328_v40  ;;  %v3270_v57 = vpop.permute.xlu0 %3269  ;;  %vm8687_vm3 = vcmask 1041409  }
0x195c   :  { %v3275_v38 = vmul.f32 %v6710_v43, %v3270_v57  ;;  %6348 = vmatpush3.bf16.msra.mxu0 %v7937_v22  ;;  %6082 = vmatprep.mubr.msk.f32.mxu0 %vm7173_vm2, %v7171_v0 }
0x195d   :  { %6349 = vmatprep.subr.bf16.mxu0 %v7172_v9 }
0x195e   :  { %v3272_v27 = vpop.permute.xlu1 %3271  ;;  %3279 = vrot.lane.b32.xlu0 %v3275_v38, %s7174_s18 }
0x195f   :  { %v3276_v3 = vmul.f32 %v6712_v20, %v3272_v27 }
0x1960   :  { %6351 = vmatpush3.bf16.msra.mxu0 %v7949_v58 }
0x1961   :  { %3281 = vrot.lane.b32.xlu1 %v3276_v3, %s7174_s18  ;;  %6358 = vmatprep.subr.bf16.mxu0 %v7172_v9 }
0x19d0   :  { %v3280_v19 = vpop.permute.xlu0 %3279 }
0x19d1   :  { %v3285_v2 = vadd.f32 %v3280_v19, %v8126_v45 }
0x19d3   :  { %6713 = vtanh.f32 %v3285_v2  ;;  %v3282_v8 = vpop.permute.xlu1 %3281 }
0x19d4   :  { %v3286_v6 = vadd.f32 %v3282_v8, %v8130_v62 }
0x19d6   :  { %6715 = vtanh.f32 %v3286_v6 }
0x19d7   :  { %6717 = vpow2.f32 %v5628_v47 }
0x19d8   :  { %6719 = vpow2.f32 %v5629_v15 }
0x19dd   :  { %v6714_v54 = vpop.eup %6713 }
0x19de   :  { %3293 = vrot.lane.b32.xlu0 %v6714_v54, %s7175_s4 }
0x19e0   :  { %v6716_v37 = vpop.eup %6715 }
0x19e1   :  { %3295 = vrot.lane.b32.xlu1 %v6716_v37, %s7175_s4  ;;  %v6718_v33 = vpop.eup %6717 }
0x19e2   :  { %v6720_v52 = vpop.eup %6719  ;;  %v3256_v10 = vadd.f32 1.0, %v6718_v33 }
0x19e3   :  { %v3257_v35 = vadd.f32 1.0, %v6720_v52  ;;  %v3529_v52 = vrot.slane %v8100_v25, 7 }
0x19e4   :  { %6721 = vrcp.f32 %v3256_v10 }
0x19e5   :  { %6723 = vrcp.f32 %v3257_v35 }
0x19ee   :  { %v6722_v17 = vpop.eup %6721 }
0x19ef   :  { %v6724_v18 = vpop.eup %6723  ;;  %v3289_v53 = vsub.f32 1.0, %v6722_v17  ;;  %v3301_v59 = vmul.f32 0.0, %v6722_v17 }
0x19f0   :  { %v3290_v39 = vsub.f32 1.0, %v6724_v18  ;;  %v3302_v14 = vmul.f32 0.0, %v6724_v18 }
0x1a2e   :  { %v3397_v44 = vpop.f32.mrb[22].mxu0 }
0x1a2f   :  { %v3494_v23 = vadd.f32 %v3397_v44, %v8055_v63  ;;  %v6062_v50 = vpop.f32.mrb[23].mxu0  ;;  %v3477_v51 = vrot.slane %v3397_v44, 7  ;;  %v3481_v34 = vadd.f32 %v3397_v44, %v8079_v1 }
0x1a31   :  { %v3496_v61 = vrot.slane %v3494_v23, 7  ;;  %3499 = vrot.lane.b32.xlu1 %v3494_v23, %s7174_s18  ;;  %v3480_v16 = vadd.f32 %v3477_v51, %v8074_v30  ;;  %v5633_v32 = vmul.f32 -1.442695, %v3481_v34 }
0x1a33   :  { %3497 = vrot.lane.b32.xlu0 %v3496_v61, %s7174_s18  ;;  %v5632_v42 = vmul.f32 -1.442695, %v3480_v16  ;;  %6725 = vpow2.f32 %v5633_v32 }
0x1a35   :  { %6727 = vpow2.f32 %v5632_v42 }
0x1a3d   :  { %v6726_v41 = vpop.eup %6725 }
0x1a3e   :  { %v3489_v49 = vadd.f32 1.0, %v6726_v41 }
0x1a3f   :  { %v6728_v26 = vpop.eup %6727 }
0x1a40   :  { %v3488_v40 = vadd.f32 1.0, %v6728_v26  ;;  %6729 = vrcp.f32 %v3489_v49 }
0x1a42   :  { %6731 = vrcp.f32 %v3488_v40 }
0x1a4a   :  { %v6730_v43 = vpop.eup %6729 }
0x1a4b   :  { %v3518_v61 = vsub.f32 1.0, %v6730_v43 }
0x1a4c   :  { %v6732_v20 = vpop.eup %6731 }
0x1a4d   :  { %v3517_v33 = vsub.f32 1.0, %v6732_v20  ;;  %v3532_v17 = vmul.f32 %v6732_v20, %v3529_v52 }
0x1a50   :  { %v3294_v55 = vpop.permute.xlu0 %3293 }
0x1a51   :  { %v3299_v21 = vmul.f32 %v3294_v55, %v3289_v53  ;;  %v3533_v53 = vmul.f32 %v6730_v43, %v3325_v13 }
0x1a53   :  { %v3296_v29 = vpop.permute.xlu1 %3295  ;;  %v8140_v4 = vadd.f32 %v3301_v59, %v3299_v21 }
0x1a54   :  { %v3300_v48 = vmul.f32 %v3296_v29, %v3290_v39 }
0x1a55   :  { %v3401_v11 = vrot.slane %v8140_v4, 7 }
0x1a56   :  { %v8142_v24 = vadd.f32 %v3302_v14, %v3300_v48 }
0x1a58   :  { %v3402_v12 = vrot.slane %v8142_v24, 6 }
0x1a5a   :  { %v3403_v28 = vsel %vm8687_vm3, %v3402_v12, %v3401_v11 }
0x1a5b   :  { %6072 = vmatmul.mubr.msk.f32.vlgmr.msra.gmra.mrb[24].mxu1 %vm8688_vm4, %v3403_v28  ;;  %vm8689_vm4 = vmmov %vm8687_vm3  ;;  %vm8690_vm3 = vcmask 261120  }
0x1a5c   :  { %6354 = vmatpush3.bf16.msra.mxu1 %v8007_v7  ;;  %6093 = vmatprep.mubr.msk.f32.mxu1 %vm7173_vm2, %v7171_v0  ;;  %vm8691_vm5 = vmmov %vm8690_vm3 }
0x1a5d   :  { %6355 = vmatprep.subr.bf16.mxu1 %v7172_v9 }
0x1a60   :  { %6357 = vmatpush3.bf16.msra.mxu1 %v8010_v31 }
0x1a61   :  { %6364 = vmatprep.subr.bf16.mxu1 %v7172_v9 }
0x1aa3   :  { %v3500_v57 = vpop.permute.xlu1 %3499 }
0x1aa4   :  { %v3504_v38 = vmul.f32 %v6730_v43, %v3500_v57 }
0x1aa5   :  { %v3498_v27 = vpop.permute.xlu0 %3497 }
0x1aa6   :  { %v3503_v3 = vmul.f32 %v6732_v20, %v3498_v27  ;;  %3509 = vrot.lane.b32.xlu1 %v3504_v38, %s7174_s18 }
0x1aa8   :  { %3507 = vrot.lane.b32.xlu0 %v3503_v3, %s7174_s18 }
0x1b18   :  { %v3510_v46 = vpop.permute.xlu1 %3509 }
0x1b19   :  { %v3514_v19 = vadd.f32 %v3510_v46, %v8079_v1 }
0x1b1a   :  { %v3508_v2 = vpop.permute.xlu0 %3507 }
0x1b1b   :  { %6733 = vtanh.f32 %v3514_v19  ;;  %v3513_v8 = vadd.f32 %v3508_v2, %v8074_v30 }
0x1b1d   :  { %6735 = vtanh.f32 %v3513_v8 }
0x1b25   :  { %v6734_v6 = vpop.eup %6733 }
0x1b26   :  { %3523 = vrot.lane.b32.xlu1 %v6734_v6, %s7175_s4 }
0x1b27   :  { %v6736_v54 = vpop.eup %6735 }
0x1b28   :  { %3521 = vrot.lane.b32.xlu0 %v6736_v54, %s7175_s4 }
0x1b2e   :  { %v3472_v37 = vpop.f32.mrb[24].mxu1 }
0x1b2f   :  { %v3537_v56 = vrot.slane %v3472_v37, 2  ;;  %v3538_v60 = vrot.slane %v3472_v37, 3  ;;  %v3573_v47 = vadd.f32 %v3472_v37, %v8098_v36  ;;  %v6073_v44 = vpop.f32.mrb[25].mxu1 }
0x1b31   :  { %3541 = vrot.lane.b32.xlu1 %v3538_v60, %s7175_s4  ;;  %3539 = vrot.lane.b32.xlu0 %v3537_v56, %s7175_s4  ;;  %v3575_v23 = vrot.slane %v3573_v47, 2  ;;  %v3576_v50 = vrot.slane %v3573_v47, 3 }
0x1b35   :  { %3579 = vrot.lane.b32.xlu1 %v3576_v50, %s7176_s19  ;;  %3577 = vrot.lane.b32.xlu0 %v3575_v23, %s7176_s19  ;;  %v3610_v50 = vrot.slane %v8142_v24, 1 }
0x1b98   :  { %v3524_v15 = vpop.permute.xlu1 %3523 }
0x1b99   :  { %v3528_v35 = vmul.f32 %v3524_v15, %v3518_v61 }
0x1b9a   :  { %v3522_v10 = vpop.permute.xlu0 %3521 }
0x1b9b   :  { %v3527_v18 = vmul.f32 %v3522_v10, %v3517_v33  ;;  %v8172_v21 = vadd.f32 %v3533_v53, %v3528_v35  ;;  %v3609_v33 = vrot.slane %v8140_v4, 1 }
0x1b9d   :  { %v8170_v55 = vadd.f32 %v3532_v17, %v3527_v18 }
0x1b9f   :  { %v3637_v59 = vrot.slane %v8170_v55, 1 }
0x1ba1   :  { %v3638_v39 = vsel %vm8689_vm4, %v8172_v21, %v3637_v59 }
0x1ba2   :  { %3639 = vrot.lane.b32.xlu0 %v3638_v39, %s7175_s4 }
0x1ba3   :  { %v3542_v29 = vpop.permute.xlu1 %3541  ;;  %v3540_v14 = vpop.permute.xlu0 %3539 }
0x1ba4   :  { %v3546_v48 = vadd.f32 %v3542_v29, %v8079_v1  ;;  %v3545_v11 = vadd.f32 %v3540_v14, %v8074_v30  ;;  %v3560_v19 = vadd.f32 %v3542_v29, %v8130_v62  ;;  %v3559_v2 = vadd.f32 %v3540_v14, %v8126_v45 }
0x1ba6   :  { %v5635_v12 = vmul.f32 -1.442695, %v3546_v48  ;;  %v5634_v28 = vmul.f32 -1.442695, %v3545_v11  ;;  %v5637_v8 = vmul.f32 -1.442695, %v3560_v19 }
0x1ba7   :  { %v3580_v42 = vpop.permute.xlu1 %3579  ;;  %v3578_v49 = vpop.permute.xlu0 %3577  ;;  %v5636_v6 = vmul.f32 -1.442695, %v3559_v2 }
0x1ba8   :  { %6737 = vpow2.f32 %v5635_v12 }
0x1ba9   :  { %6739 = vpow2.f32 %v5634_v28 }
0x1bb2   :  { %v6738_v13 = vpop.eup %6737 }
0x1bb3   :  { %v3554_v51 = vadd.f32 1.0, %v6738_v13  ;;  %v6740_v34 = vpop.eup %6739 }
0x1bb4   :  { %v3553_v16 = vadd.f32 1.0, %v6740_v34 }
0x1bb5   :  { %6741 = vrcp.f32 %v3554_v51 }
0x1bb6   :  { %6743 = vrcp.f32 %v3553_v16 }
0x1bbf   :  { %v6742_v32 = vpop.eup %6741 }
0x1bc0   :  { %v3584_v41 = vmul.f32 %v6742_v32, %v3580_v42  ;;  %v6744_v26 = vpop.eup %6743 }
0x1bc1   :  { %v3583_v40 = vmul.f32 %v6744_v26, %v3578_v49 }
0x1bc2   :  { %3589 = vrot.lane.b32.xlu0 %v3584_v41, %s7174_s18 }
0x1bc3   :  { %3587 = vrot.lane.b32.xlu1 %v3583_v40, %s7174_s18 }
0x1c14   :  { %v3640_v43 = vpop.permute.xlu0 %3639 }
0x1c15   :  { %6083 = vmatmul.mubr.msk.f32.vlgmr.msra.gmra.mrb[24].mxu0 %vm8690_vm3, %v3640_v43 }
0x1c16   :  { %6360 = vmatpush3.bf16.msra.mxu0 %v7937_v22  ;;  %6104 = vmatprep.mubr.msk.f32.mxu0 %vm7173_vm2, %v7171_v0 }
0x1c17   :  { %6361 = vmatprep.subr.bf16.mxu0 %v7172_v9 }
0x1c1a   :  { %6363 = vmatpush3.bf16.msra.mxu0 %v7949_v58 }
0x1c1b   :  { %6370 = vmatprep.subr.bf16.mxu0 %v7172_v9 }
0x1c34   :  { %v3590_v57 = vpop.permute.xlu0 %3589 }
0x1c35   :  { %v3594_v38 = vadd.f32 %v3590_v57, %v8130_v62  ;;  %v3588_v20 = vpop.permute.xlu1 %3587 }
0x1c36   :  { %v3593_v27 = vadd.f32 %v3588_v20, %v8126_v45 }
0x1c37   :  { %6745 = vtanh.f32 %v3594_v38 }
0x1c38   :  { %6747 = vtanh.f32 %v3593_v27 }
0x1c39   :  { %6749 = vpow2.f32 %v5637_v8 }
0x1c3a   :  { %6751 = vpow2.f32 %v5636_v6 }
0x1c41   :  { %v6746_v3 = vpop.eup %6745 }
0x1c42   :  { %3603 = vrot.lane.b32.xlu0 %v6746_v3, %s7175_s4  ;;  %v6748_v46 = vpop.eup %6747 }
0x1c43   :  { %3601 = vrot.lane.b32.xlu1 %v6748_v46, %s7175_s4  ;;  %v6750_v54 = vpop.eup %6749 }
0x1c44   :  { %v6752_v37 = vpop.eup %6751  ;;  %v3568_v56 = vadd.f32 1.0, %v6750_v54 }
0x1c45   :  { %v3567_v60 = vadd.f32 1.0, %v6752_v37 }
0x1c46   :  { %6753 = vrcp.f32 %v3568_v56 }
0x1c47   :  { %6755 = vrcp.f32 %v3567_v60 }
0x1c50   :  { %v6754_v47 = vpop.eup %6753 }
0x1c51   :  { %v6756_v44 = vpop.eup %6755  ;;  %v3598_v23 = vsub.f32 1.0, %v6754_v47  ;;  %v3614_v52 = vmul.f32 %v6754_v47, %v3610_v50 }
0x1c52   :  { %v3597_v61 = vsub.f32 1.0, %v6756_v44  ;;  %v3613_v17 = vmul.f32 %v6756_v44, %v3609_v33  ;;  %v3843_v33 = vrot.slane %v8170_v55, 7 }
0x1cb4   :  { %v3604_v15 = vpop.permute.xlu0 %3603 }
0x1cb5   :  { %v3608_v10 = vmul.f32 %v3604_v15, %v3598_v23  ;;  %v3602_v35 = vpop.permute.xlu1 %3601 }
0x1cb6   :  { %v3607_v18 = vmul.f32 %v3602_v35, %v3597_v61  ;;  %v3844_v35 = vrot.slane %v8172_v21, 7 }
0x1cb7   :  { %v8197_v53 = vadd.f32 %v3614_v52, %v3608_v10 }
0x1cb8   :  { %v8199_v59 = vadd.f32 %v3613_v17, %v3607_v18 }
0x1cb9   :  { %v3714_v39 = vrot.slane %v8197_v53, 5 }
0x1cba   :  { %v3713_v29 = vrot.slane %v8199_v59, 6 }
0x1cbc   :  { %v3715_v14 = vsel %vm8689_vm4, %v3714_v39, %v3713_v29 }
0x1cbd   :  { %6094 = vmatmul.mubr.msk.f32.vlgmr.msra.gmra.mrb[26].mxu1 %vm8690_vm3, %v3715_v14 }
0x1cbe   :  { %6366 = vmatpush3.bf16.msra.mxu1 %v8007_v7  ;;  %6115 = vmatprep.mubr.msk.f32.mxu1 %vm7173_vm2, %v7171_v0 }
0x1cbf   :  { %6367 = vmatprep.subr.bf16.mxu1 %v7172_v9 }
0x1cc2   :  { %6369 = vmatpush3.bf16.msra.mxu1 %v8010_v31 }
0x1cc3   :  { %6376 = vmatprep.subr.bf16.mxu1 %v7172_v9 }
0x1ce8   :  { %v3709_v48 = vpop.f32.mrb[24].mxu0 }
0x1ce9   :  { %v3807_v11 = vadd.f32 %v3709_v48, %v8055_v63  ;;  %v6084_v12 = vpop.f32.mrb[25].mxu0  ;;  %v3789_v51 = vrot.slane %v3709_v48, 6  ;;  %v3790_v34 = vrot.slane %v3709_v48, 7 }
0x1ceb   :  { %v3809_v28 = vrot.slane %v3807_v11, 6  ;;  %v3810_v13 = vrot.slane %v3807_v11, 7  ;;  %v3793_v16 = vadd.f32 %v3789_v51, %v8074_v30  ;;  %v3794_v32 = vadd.f32 %v3790_v34, %v8079_v1 }
0x1ced   :  { %3811 = vrot.lane.b32.xlu1 %v3809_v28, %s7174_s18  ;;  %3813 = vrot.lane.b32.xlu0 %v3810_v13, %s7174_s18  ;;  %v5640_v42 = vmul.f32 -1.442695, %v3793_v16  ;;  %v5641_v41 = vmul.f32 -1.442695, %v3794_v32 }
0x1cef   :  { %6757 = vpow2.f32 %v5640_v42 }
0x1cf0   :  { %6759 = vpow2.f32 %v5641_v41 }
0x1cf9   :  { %v6758_v26 = vpop.eup %6757 }
0x1cfa   :  { %v6760_v49 = vpop.eup %6759  ;;  %v3801_v40 = vadd.f32 1.0, %v6758_v26 }
0x1cfb   :  { %v3802_v43 = vadd.f32 1.0, %v6760_v49 }
0x1cfc   :  { %6761 = vrcp.f32 %v3801_v40 }
0x1cfd   :  { %6763 = vrcp.f32 %v3802_v43 }
0x1d06   :  { %v6762_v57 = vpop.eup %6761 }
0x1d07   :  { %v6764_v38 = vpop.eup %6763  ;;  %v3831_v61 = vsub.f32 1.0, %v6762_v57  ;;  %v3847_v17 = vmul.f32 %v6762_v57, %v3843_v33 }
0x1d08   :  { %v3832_v10 = vsub.f32 1.0, %v6764_v38  ;;  %v3848_v29 = vmul.f32 %v6764_v38, %v3844_v35 }
0x1d5f   :  { %v3812_v20 = vpop.permute.xlu1 %3811  ;;  %v3814_v27 = vpop.permute.xlu0 %3813 }
0x1d60   :  { %v3817_v3 = vmul.f32 %v6762_v57, %v3812_v20  ;;  %v3818_v46 = vmul.f32 %v6764_v38, %v3814_v27 }
0x1d62   :  { %3821 = vrot.lane.b32.xlu1 %v3817_v3, %s7174_s18  ;;  %3823 = vrot.lane.b32.xlu0 %v3818_v46, %s7174_s18 }
0x1d90   :  { %v3784_v19 = vpop.f32.mrb[26].mxu1 }
0x1d91   :  { %v6095_v2 = vpop.f32.mrb[27].mxu1  ;;  %v3852_v47 = vrot.slane %v3784_v19, 3  ;;  %v3888_v44 = vadd.f32 %v3784_v19, %v8098_v36  ;;  %v3853_v23 = vrot.slane %v3784_v19, 4 }
0x1d93   :  { %v3890_v50 = vrot.slane %v3888_v44, 3  ;;  %v3891_v15 = vrot.slane %v3888_v44, 4 }
0x1dd4   :  { %v3822_v8 = vpop.permute.xlu1 %3821  ;;  %v3824_v6 = vpop.permute.xlu0 %3823 }
0x1dd5   :  { %v3827_v54 = vadd.f32 %v3822_v8, %v8074_v30  ;;  %v3828_v37 = vadd.f32 %v3824_v6, %v8079_v1 }
0x1dd7   :  { %6765 = vtanh.f32 %v3827_v54 }
0x1dd8   :  { %6767 = vtanh.f32 %v3828_v37 }
0x1de1   :  { %v6766_v56 = vpop.eup %6765 }
0x1de2   :  { %v6768_v60 = vpop.eup %6767  ;;  %3835 = vrot.lane.b32.xlu1 %v6766_v56, %s7175_s4 }
0x1de3   :  { %3837 = vrot.lane.b32.xlu0 %v6768_v60, %s7175_s4 }
0x1de6   :  { %3854 = vrot.lane.b32.xlu1 %v3852_v47, %s7175_s4 }
0x1de7   :  { %3856 = vrot.lane.b32.xlu0 %v3853_v23, %s7175_s4 }
0x1dea   :  { %3892 = vrot.lane.b32.xlu1 %v3890_v50, %s7176_s19 }
0x1deb   :  { %3894 = vrot.lane.b32.xlu0 %v3891_v15, %s7176_s19 }
0x1e54   :  { %v3836_v52 = vpop.permute.xlu1 %3835 }
0x1e55   :  { %v3841_v18 = vmul.f32 %v3836_v52, %v3831_v61  ;;  %v3838_v39 = vpop.permute.xlu0 %3837 }
0x1e56   :  { %v3842_v14 = vmul.f32 %v3838_v39, %v3832_v10 }
0x1e57   :  { %v8229_v48 = vadd.f32 %v3847_v17, %v3841_v18  ;;  %v3924_v17 = vrot.slane %v8199_v59, 1 }
0x1e58   :  { %v8231_v11 = vadd.f32 %v3848_v29, %v3842_v14  ;;  %v3855_v12 = vpop.permute.xlu1 %3854  ;;  %v3925_v29 = vrot.slane %v8197_v53, 1 }
0x1e59   :  { %v3860_v28 = vadd.f32 %v3855_v12, %v8074_v30  ;;  %v3857_v13 = vpop.permute.xlu0 %3856  ;;  %v3952_v51 = vrot.slane %v8229_v48, 2  ;;  %v3874_v60 = vadd.f32 %v3855_v12, %v8126_v45 }
0x1e5a   :  { %v3861_v34 = vadd.f32 %v3857_v13, %v8079_v1  ;;  %v3953_v16 = vrot.slane %v8231_v11, 1  ;;  %v3875_v47 = vadd.f32 %v3857_v13, %v8130_v62 }
0x1e5b   :  { %v5642_v32 = vmul.f32 -1.442695, %v3860_v28  ;;  %v5644_v44 = vmul.f32 -1.442695, %v3874_v60 }
0x1e5c   :  { %v5643_v42 = vmul.f32 -1.442695, %v3861_v34  ;;  %v3954_v41 = vsel %vm8689_vm4, %v3953_v16, %v3952_v51  ;;  %v3893_v38 = vpop.permute.xlu1 %3892  ;;  %v5645_v23 = vmul.f32 -1.442695, %v3875_v47 }
0x1e5d   :  { %6769 = vpow2.f32 %v5642_v32  ;;  %3955 = vrot.lane.b32.xlu1 %v3954_v41, %s7175_s4  ;;  %v3895_v3 = vpop.permute.xlu0 %3894 }
0x1e5e   :  { %6771 = vpow2.f32 %v5643_v42 }
0x1e67   :  { %v6770_v26 = vpop.eup %6769 }
0x1e68   :  { %v3868_v49 = vadd.f32 1.0, %v6770_v26  ;;  %v6772_v40 = vpop.eup %6771 }
0x1e69   :  { %v3869_v43 = vadd.f32 1.0, %v6772_v40 }
0x1e6a   :  { %6773 = vrcp.f32 %v3868_v49 }
0x1e6b   :  { %6775 = vrcp.f32 %v3869_v43 }
0x1e74   :  { %v6774_v57 = vpop.eup %6773 }
0x1e75   :  { %v3898_v20 = vmul.f32 %v6774_v57, %v3893_v38  ;;  %v6776_v27 = vpop.eup %6775 }
0x1e76   :  { %v3899_v46 = vmul.f32 %v6776_v27, %v3895_v3 }
0x1e77   :  { %3902 = vrot.lane.b32.xlu0 %v3898_v20, %s7174_s18 }
0x1e78   :  { %3904 = vrot.lane.b32.xlu1 %v3899_v46, %s7174_s18 }
0x1ecf   :  { %v3956_v19 = vpop.permute.xlu1 %3955 }
0x1ed0   :  { %6105 = vmatmul.mubr.msk.f32.vlgmr.msra.gmra.mrb[26].mxu0 %vm8690_vm3, %v3956_v19 }
0x1ed1   :  { %6372 = vmatpush3.bf16.msra.mxu0 %v7937_v22  ;;  %6126 = vmatprep.mubr.msk.f32.mxu0 %vm7173_vm2, %v7171_v0 }
0x1ed2   :  { %6373 = vmatprep.subr.bf16.mxu0 %v7172_v9 }
0x1ed5   :  { %6375 = vmatpush3.bf16.msra.mxu0 %v7949_v58 }
0x1ed6   :  { %6382 = vmatprep.subr.bf16.mxu0 %v7172_v9 }
0x1ee9   :  { %v3903_v2 = vpop.permute.xlu0 %3902 }
0x1eea   :  { %v3908_v8 = vadd.f32 %v3903_v2, %v8126_v45  ;;  %v3905_v6 = vpop.permute.xlu1 %3904 }
0x1eeb   :  { %v3909_v54 = vadd.f32 %v3905_v6, %v8130_v62 }
0x1eec   :  { %6777 = vtanh.f32 %v3908_v8 }
0x1eed   :  { %6779 = vtanh.f32 %v3909_v54 }
0x1eee   :  { %6781 = vpow2.f32 %v5644_v44 }
0x1eef   :  { %6783 = vpow2.f32 %v5645_v23 }
0x1ef6   :  { %v6778_v37 = vpop.eup %6777 }
0x1ef7   :  { %3916 = vrot.lane.b32.xlu0 %v6778_v37, %s7175_s4  ;;  %v6780_v56 = vpop.eup %6779 }
0x1ef8   :  { %3918 = vrot.lane.b32.xlu1 %v6780_v56, %s7175_s4  ;;  %v6782_v50 = vpop.eup %6781 }
0x1ef9   :  { %v6784_v15 = vpop.eup %6783  ;;  %v3882_v61 = vadd.f32 1.0, %v6782_v50 }
0x1efa   :  { %v3883_v33 = vadd.f32 1.0, %v6784_v15 }
0x1efb   :  { %6785 = vrcp.f32 %v3882_v61 }
0x1efc   :  { %6787 = vrcp.f32 %v3883_v33 }
0x1f05   :  { %v6786_v52 = vpop.eup %6785 }
0x1f06   :  { %v6788_v10 = vpop.eup %6787  ;;  %v3912_v35 = vsub.f32 1.0, %v6786_v52  ;;  %v3928_v14 = vmul.f32 %v6786_v52, %v3924_v17 }
0x1f07   :  { %v3913_v39 = vsub.f32 1.0, %v6788_v10  ;;  %v3929_v13 = vmul.f32 %v6788_v10, %v3925_v29 }
0x1f69   :  { %v3917_v18 = vpop.permute.xlu0 %3916 }
0x1f6a   :  { %v3922_v12 = vmul.f32 %v3917_v18, %v3912_v35  ;;  %v3919_v28 = vpop.permute.xlu1 %3918 }
0x1f6b   :  { %v3923_v51 = vmul.f32 %v3919_v28, %v3913_v39 }
0x1f6c   :  { %v8256_v34 = vadd.f32 %v3928_v14, %v3922_v12 }
0x1f6d   :  { %v8258_v16 = vadd.f32 %v3929_v13, %v3923_v51 }
0x1f6e   :  { %v4029_v32 = vrot.slane %v8256_v34, 5 }
0x1f6f   :  { %v4030_v42 = vrot.slane %v8258_v16, 4 }
0x1f71   :  { %v4031_v41 = vsel %vm8689_vm4, %v4030_v42, %v4029_v32 }
0x1f72   :  { %6116 = vmatmul.mubr.msk.f32.vlgmr.msra.gmra.mrb[28].mxu1 %vm8690_vm3, %v4031_v41 }
0x1f73   :  { %6378 = vmatpush3.bf16.msra.mxu1 %v8007_v7  ;;  %6137 = vmatprep.mubr.msk.f32.mxu1 %vm7173_vm2, %v7171_v0 }
0x1f74   :  { %6379 = vmatprep.subr.bf16.mxu1 %v7172_v9 }
0x1f77   :  { %6381 = vmatpush3.bf16.msra.mxu1 %v8010_v31 }
0x1f78   :  { %6388 = vmatprep.subr.bf16.mxu1 %v7172_v9 }
0x1fa3   :  { %v4025_v26 = vpop.f32.mrb[26].mxu0 }
0x1fa4   :  { %v4123_v49 = vadd.f32 %v4025_v26, %v8055_v63  ;;  %v6106_v40 = vpop.f32.mrb[27].mxu0  ;;  %v4105_v38 = vrot.slane %v4025_v26, 5  ;;  %v4106_v20 = vrot.slane %v4025_v26, 6 }
0x1fa6   :  { %v4125_v43 = vrot.slane %v4123_v49, 5  ;;  %v4126_v57 = vrot.slane %v4123_v49, 6  ;;  %v4109_v27 = vadd.f32 %v4105_v38, %v8074_v30  ;;  %v4110_v3 = vadd.f32 %v4106_v20, %v8079_v1 }
0x1fa8   :  { %4129 = vrot.lane.b32.xlu1 %v4126_v57, %s7174_s18  ;;  %4127 = vrot.lane.b32.xlu0 %v4125_v43, %s7174_s18  ;;  %v5648_v46 = vmul.f32 -1.442695, %v4109_v27  ;;  %v5649_v19 = vmul.f32 -1.442695, %v4110_v3 }
0x1faa   :  { %6789 = vpow2.f32 %v5648_v46 }
0x1fab   :  { %6791 = vpow2.f32 %v5649_v19 }
0x1fb4   :  { %v6790_v2 = vpop.eup %6789 }
0x1fb5   :  { %v6792_v8 = vpop.eup %6791  ;;  %v4117_v6 = vadd.f32 1.0, %v6790_v2  ;;  %v4160_v2 = vrot.slane %v8231_v11, 7 }
0x1fb6   :  { %v4118_v54 = vadd.f32 1.0, %v6792_v8 }
0x1fb7   :  { %6793 = vrcp.f32 %v4117_v6 }
0x1fb8   :  { %6795 = vrcp.f32 %v4118_v54  ;;  %v4159_v54 = vrot.slane %v8229_v48, 7 }
0x1fc1   :  { %v6794_v37 = vpop.eup %6793 }
0x1fc2   :  { %v6796_v56 = vpop.eup %6795  ;;  %v4147_v6 = vsub.f32 1.0, %v6794_v37 }
0x1fc3   :  { %v4148_v19 = vsub.f32 1.0, %v6796_v56 }
0x201a   :  { %v4130_v60 = vpop.permute.xlu1 %4129  ;;  %v4128_v47 = vpop.permute.xlu0 %4127 }
0x201b   :  { %v4134_v44 = vmul.f32 %v6796_v56, %v4130_v60  ;;  %v4133_v23 = vmul.f32 %v6794_v37, %v4128_v47  ;;  %v4164_v60 = vmul.f32 %v6796_v56, %v4160_v2 }
0x201d   :  { %4139 = vrot.lane.b32.xlu1 %v4134_v44, %s7174_s18  ;;  %4137 = vrot.lane.b32.xlu0 %v4133_v23, %s7174_s18  ;;  %v4163_v23 = vmul.f32 %v6794_v37, %v4159_v54 }
0x2045   :  { %v4100_v50 = vpop.f32.mrb[28].mxu1 }
0x2046   :  { %v4168_v15 = vrot.slane %v4100_v50, 4  ;;  %v4169_v61 = vrot.slane %v4100_v50, 5  ;;  %v4204_v33 = vadd.f32 %v4100_v50, %v8098_v36  ;;  %v6117_v52 = vpop.f32.mrb[29].mxu1 }
0x2048   :  { %4172 = vrot.lane.b32.xlu1 %v4169_v61, %s7175_s4  ;;  %4170 = vrot.lane.b32.xlu0 %v4168_v15, %s7175_s4  ;;  %v4206_v10 = vrot.slane %v4204_v33, 4  ;;  %v4207_v35 = vrot.slane %v4204_v33, 5 }
0x204c   :  { %4210 = vrot.lane.b32.xlu1 %v4207_v35, %s7176_s19  ;;  %4208 = vrot.lane.b32.xlu0 %v4206_v10, %s7176_s19 }
0x208f   :  { %v4140_v17 = vpop.permute.xlu1 %4139  ;;  %v4138_v18 = vpop.permute.xlu0 %4137 }
0x2090   :  { %v4144_v39 = vadd.f32 %v4140_v17, %v8079_v1  ;;  %v4143_v29 = vadd.f32 %v4138_v18, %v8074_v30 }
0x2092   :  { %6797 = vtanh.f32 %v4144_v39 }
0x2093   :  { %6799 = vtanh.f32 %v4143_v29 }
0x209c   :  { %v6798_v14 = vpop.eup %6797 }
0x209d   :  { %v6800_v12 = vpop.eup %6799  ;;  %4153 = vrot.lane.b32.xlu1 %v6798_v14, %s7175_s4 }
0x209e   :  { %4151 = vrot.lane.b32.xlu0 %v6800_v12, %s7175_s4 }
0x20ba   :  { %v4173_v28 = vpop.permute.xlu1 %4172  ;;  %v4171_v13 = vpop.permute.xlu0 %4170 }
0x20bb   :  { %v4177_v51 = vadd.f32 %v4173_v28, %v8079_v1  ;;  %v4176_v32 = vadd.f32 %v4171_v13, %v8074_v30  ;;  %v4191_v14 = vadd.f32 %v4173_v28, %v8130_v62  ;;  %v4190_v12 = vadd.f32 %v4171_v13, %v8126_v45 }
0x20bc   :  { %v4240_v28 = vrot.slane %v8256_v34, 1 }
0x20bd   :  { %v5651_v42 = vmul.f32 -1.442695, %v4177_v51  ;;  %v5650_v41 = vmul.f32 -1.442695, %v4176_v32  ;;  %v5653_v51 = vmul.f32 -1.442695, %v4191_v14 }
0x20be   :  { %v4211_v38 = vpop.permute.xlu1 %4210  ;;  %v4209_v3 = vpop.permute.xlu0 %4208  ;;  %v5652_v32 = vmul.f32 -1.442695, %v4190_v12 }
0x20bf   :  { %6801 = vpow2.f32 %v5651_v42 }
0x20c0   :  { %6803 = vpow2.f32 %v5650_v41 }
0x20c9   :  { %v6802_v26 = vpop.eup %6801 }
0x20ca   :  { %v4185_v49 = vadd.f32 1.0, %v6802_v26  ;;  %v6804_v40 = vpop.eup %6803 }
0x20cb   :  { %v4184_v43 = vadd.f32 1.0, %v6804_v40 }
0x20cc   :  { %6805 = vrcp.f32 %v4185_v49 }
0x20cd   :  { %6807 = vrcp.f32 %v4184_v43 }
0x20d6   :  { %v6806_v57 = vpop.eup %6805 }
0x20d7   :  { %v4215_v20 = vmul.f32 %v6806_v57, %v4211_v38  ;;  %v6808_v27 = vpop.eup %6807  ;;  %v4241_v38 = vrot.slane %v8258_v16, 1 }
0x20d8   :  { %v4214_v46 = vmul.f32 %v6808_v27, %v4209_v3 }
0x20d9   :  { %4220 = vrot.lane.b32.xlu1 %v4215_v20, %s7174_s18 }
0x20da   :  { %4218 = vrot.lane.b32.xlu0 %v4214_v46, %s7174_s18 }
0x210f   :  { %v4154_v8 = vpop.permute.xlu1 %4153 }
0x2110   :  { %v4158_v47 = vmul.f32 %v4154_v8, %v4148_v19  ;;  %v4152_v44 = vpop.permute.xlu0 %4151 }
0x2111   :  { %v4157_v50 = vmul.f32 %v4152_v44, %v4147_v6 }
0x2112   :  { %v8292_v15 = vadd.f32 %v4164_v60, %v4158_v47 }
0x2113   :  { %v8294_v61 = vadd.f32 %v4163_v23, %v4157_v50 }
0x2114   :  { %v4269_v33 = vrot.slane %v8292_v15, 2 }
0x2115   :  { %v4268_v52 = vrot.slane %v8294_v61, 3 }
0x2117   :  { %v4270_v10 = vsel %vm8689_vm4, %v4269_v33, %v4268_v52 }
0x2118   :  { %4271 = vrot.lane.b32.xlu0 %v4270_v10, %s7175_s4 }
0x214b   :  { %v4221_v35 = vpop.permute.xlu1 %4220 }
0x214c   :  { %v4225_v17 = vadd.f32 %v4221_v35, %v8130_v62  ;;  %v4219_v56 = vpop.permute.xlu0 %4218 }
0x214d   :  { %v4224_v37 = vadd.f32 %v4219_v56, %v8126_v45 }
0x214e   :  { %6809 = vtanh.f32 %v4225_v17 }
0x214f   :  { %6811 = vtanh.f32 %v4224_v37 }
0x2150   :  { %6813 = vpow2.f32 %v5653_v51 }
0x2151   :  { %6815 = vpow2.f32 %v5652_v32 }
0x2158   :  { %v6810_v18 = vpop.eup %6809 }
0x2159   :  { %4234 = vrot.lane.b32.xlu0 %v6810_v18, %s7175_s4  ;;  %v6812_v39 = vpop.eup %6811 }
0x215a   :  { %4232 = vrot.lane.b32.xlu1 %v6812_v39, %s7175_s4  ;;  %v6814_v42 = vpop.eup %6813 }
0x215b   :  { %v6816_v41 = vpop.eup %6815  ;;  %v4199_v26 = vadd.f32 1.0, %v6814_v42 }
0x215c   :  { %v4198_v49 = vadd.f32 1.0, %v6816_v41 }
0x215d   :  { %6817 = vrcp.f32 %v4199_v26 }
0x215e   :  { %6819 = vrcp.f32 %v4198_v49 }
0x2167   :  { %v6818_v40 = vpop.eup %6817 }
0x2168   :  { %v6820_v43 = vpop.eup %6819  ;;  %v4229_v57 = vsub.f32 1.0, %v6818_v40  ;;  %v4245_v13 = vmul.f32 %v6818_v40, %v4241_v38 }
0x2169   :  { %v4228_v27 = vsub.f32 1.0, %v6820_v43  ;;  %v4244_v19 = vmul.f32 %v6820_v43, %v4240_v28 }
0x218a   :  { %v4272_v29 = vpop.permute.xlu0 %4271 }
0x218b   :  { %6127 = vmatmul.mubr.msk.f32.vlgmr.msra.gmra.mrb[28].mxu0 %vm8690_vm3, %v4272_v29 }
0x218c   :  { %6384 = vmatpush3.bf16.msra.mxu0 %v7937_v22  ;;  %6148 = vmatprep.mubr.msk.f32.mxu0 %vm7173_vm2, %v7171_v0 }
0x218d   :  { %6385 = vmatprep.subr.bf16.mxu0 %v7172_v9 }
0x2190   :  { %6387 = vmatpush3.bf16.msra.mxu0 %v7949_v58 }
0x2191   :  { %6394 = vmatprep.subr.bf16.mxu0 %v7172_v9 }
0x21cb   :  { %v4235_v20 = vpop.permute.xlu0 %4234 }
0x21cc   :  { %v4239_v3 = vmul.f32 %v4235_v20, %v4229_v57  ;;  %v4233_v46 = vpop.permute.xlu1 %4232 }
0x21cd   :  { %v4238_v2 = vmul.f32 %v4233_v46, %v4228_v27 }
0x21ce   :  { %v8315_v8 = vadd.f32 %v4245_v13, %v4239_v3 }
0x21cf   :  { %v8317_v6 = vadd.f32 %v4244_v19, %v4238_v2 }
0x21d0   :  { %v4346_v54 = vrot.slane %v8315_v8, 3 }
0x21d1   :  { %v4345_v60 = vrot.slane %v8317_v6, 4 }
0x21d3   :  { %v4347_v47 = vsel %vm8689_vm4, %v4346_v54, %v4345_v60 }
0x21d4   :  { %6138 = vmatmul.mubr.msk.f32.vlgmr.msra.gmra.mrb[30].mxu1 %vm8690_vm3, %v4347_v47 }
0x21d5   :  { %6390 = vmatpush3.bf16.msra.mxu1 %v8007_v7  ;;  %6159 = vmatprep.mubr.msk.f32.mxu1 %vm7173_vm2, %v7171_v0 }
0x21d6   :  { %6391 = vmatprep.subr.bf16.mxu1 %v7172_v9 }
0x21d9   :  { %6393 = vmatpush3.bf16.msra.mxu1 %v8010_v31 }
0x21da   :  { %6400 = vmatprep.subr.bf16.mxu1 %v7172_v9 }
0x225e   :  { %v4341_v44 = vpop.f32.mrb[28].mxu0 }
0x225f   :  { %v4439_v23 = vadd.f32 %v4341_v44, %v8055_v63  ;;  %v6128_v50 = vpop.f32.mrb[29].mxu0  ;;  %v4421_v17 = vrot.slane %v4341_v44, 4  ;;  %v4422_v56 = vrot.slane %v4341_v44, 5 }
0x2261   :  { %v4441_v33 = vrot.slane %v4439_v23, 4  ;;  %v4442_v52 = vrot.slane %v4439_v23, 5  ;;  %v4425_v37 = vadd.f32 %v4421_v17, %v8074_v30  ;;  %v4426_v18 = vadd.f32 %v4422_v56, %v8079_v1 }
0x2263   :  { %4445 = vrot.lane.b32.xlu0 %v4442_v52, %s7174_s18  ;;  %4443 = vrot.lane.b32.xlu1 %v4441_v33, %s7174_s18  ;;  %v5656_v39 = vmul.f32 -1.442695, %v4425_v37  ;;  %v5657_v29 = vmul.f32 -1.442695, %v4426_v18 }
0x2265   :  { %6821 = vpow2.f32 %v5656_v39 }
0x2266   :  { %6823 = vpow2.f32 %v5657_v29 }
0x226f   :  { %v6822_v14 = vpop.eup %6821 }
0x2270   :  { %v6824_v12 = vpop.eup %6823  ;;  %v4433_v51 = vadd.f32 1.0, %v6822_v14 }
0x2271   :  { %v4434_v32 = vadd.f32 1.0, %v6824_v12 }
0x2272   :  { %6825 = vrcp.f32 %v4433_v51  ;;  %v4475_v51 = vrot.slane %v8294_v61, 7 }
0x2273   :  { %6827 = vrcp.f32 %v4434_v32 }
0x227c   :  { %v6826_v42 = vpop.eup %6825 }
0x227d   :  { %v6828_v41 = vpop.eup %6827  ;;  %v4463_v12 = vsub.f32 1.0, %v6826_v42 }
0x22a7   :  { %v4416_v10 = vpop.f32.mrb[30].mxu1 }
0x22a8   :  { %v6139_v35 = vpop.f32.mrb[31].mxu1  ;;  %v4484_v57 = vrot.slane %v4416_v10, 5  ;;  %v4485_v38 = vrot.slane %v4416_v10, 6  ;;  %v4520_v20 = vadd.f32 %v4416_v10, %v8098_v36 }
0x22aa   :  { %v4522_v27 = vrot.slane %v4520_v20, 5  ;;  %v4523_v28 = vrot.slane %v4520_v20, 6 }
0x22d5   :  { %v4444_v26 = vpop.permute.xlu1 %4443  ;;  %v4446_v49 = vpop.permute.xlu0 %4445 }
0x22d6   :  { %v4449_v40 = vmul.f32 %v6826_v42, %v4444_v26  ;;  %v4450_v43 = vmul.f32 %v6828_v41, %v4446_v49  ;;  %v4464_v26 = vsub.f32 1.0, %v6828_v41  ;;  %v4476_v49 = vrot.slane %v8292_v15, 7 }
0x22d8   :  { %4453 = vrot.lane.b32.xlu1 %v4449_v40, %s7174_s18  ;;  %4455 = vrot.lane.b32.xlu0 %v4450_v43, %s7174_s18  ;;  %v4479_v40 = vmul.f32 %v6826_v42, %v4475_v51 }
0x22dc   :  { %4486 = vrot.lane.b32.xlu1 %v4484_v57, %s7175_s4  ;;  %4488 = vrot.lane.b32.xlu0 %v4485_v38, %s7175_s4  ;;  %v4480_v38 = vmul.f32 %v6828_v41, %v4476_v49 }
0x22e0   :  { %4524 = vrot.lane.b32.xlu1 %v4522_v27, %s7176_s19  ;;  %4526 = vrot.lane.b32.xlu0 %v4523_v28, %s7176_s19 }
0x234a   :  { %v4454_v13 = vpop.permute.xlu1 %4453  ;;  %v4456_v3 = vpop.permute.xlu0 %4455 }
0x234b   :  { %v4459_v46 = vadd.f32 %v4454_v13, %v8074_v30  ;;  %v4460_v19 = vadd.f32 %v4456_v3, %v8079_v1 }
0x234d   :  { %6829 = vtanh.f32 %v4459_v46 }
0x234e   :  { %6831 = vtanh.f32 %v4460_v19  ;;  %v4487_v2 = vpop.permute.xlu1 %4486  ;;  %v4489_v54 = vpop.permute.xlu0 %4488 }
0x234f   :  { %v4492_v60 = vadd.f32 %v4487_v2, %v8074_v30  ;;  %v4493_v47 = vadd.f32 %v4489_v54, %v8079_v1 }
0x2351   :  { %v5658_v44 = vmul.f32 -1.442695, %v4492_v60  ;;  %v5659_v23 = vmul.f32 -1.442695, %v4493_v47 }
0x2352   :  { %v4525_v37 = vpop.permute.xlu1 %4524  ;;  %v4527_v29 = vpop.permute.xlu0 %4526 }
0x2353   :  { %6833 = vpow2.f32 %v5658_v44 }
0x2354   :  { %6835 = vpow2.f32 %v5659_v23  ;;  %v4506_v23 = vadd.f32 %v4487_v2, %v8126_v45 }
0x2357   :  { %v6830_v50 = vpop.eup %6829 }
0x2358   :  { %v6832_v33 = vpop.eup %6831  ;;  %4467 = vrot.lane.b32.xlu1 %v6830_v50, %s7175_s4  ;;  %v4507_v50 = vadd.f32 %v4489_v54, %v8130_v62 }
0x2359   :  { %4469 = vrot.lane.b32.xlu0 %v6832_v33, %s7175_s4  ;;  %v5660_v33 = vmul.f32 -1.442695, %v4506_v23 }
0x235d   :  { %v6834_v52 = vpop.eup %6833 }
0x235e   :  { %v4500_v10 = vadd.f32 1.0, %v6834_v52  ;;  %v6836_v35 = vpop.eup %6835  ;;  %v5661_v52 = vmul.f32 -1.442695, %v4507_v50 }
0x235f   :  { %v4501_v17 = vadd.f32 1.0, %v6836_v35 }
0x2360   :  { %6837 = vrcp.f32 %v4500_v10 }
0x2361   :  { %6839 = vrcp.f32 %v4501_v17 }
0x236a   :  { %v6838_v56 = vpop.eup %6837 }
0x236b   :  { %v4530_v18 = vmul.f32 %v6838_v56, %v4525_v37  ;;  %v6840_v39 = vpop.eup %6839 }
0x236c   :  { %v4531_v14 = vmul.f32 %v6840_v39, %v4527_v29  ;;  %v4556_v39 = vrot.slane %v8317_v6, 1 }
0x236d   :  { %4534 = vrot.lane.b32.xlu1 %v4530_v18, %s7174_s18 }
0x236e   :  { %4536 = vrot.lane.b32.xlu0 %v4531_v14, %s7174_s18 }
0x23ca   :  { %v4468_v32 = vpop.permute.xlu1 %4467 }
0x23cb   :  { %v4473_v43 = vmul.f32 %v4468_v32, %v4463_v12  ;;  %v4470_v57 = vpop.permute.xlu0 %4469  ;;  %v4557_v12 = vrot.slane %v8315_v8, 1 }
0x23cc   :  { %v4474_v20 = vmul.f32 %v4470_v57, %v4464_v26 }
0x23cd   :  { %v8351_v27 = vadd.f32 %v4479_v40, %v4473_v43 }
0x23ce   :  { %v8353_v28 = vadd.f32 %v4480_v38, %v4474_v20 }
0x23cf   :  { %v4584_v13 = vrot.slane %v8351_v27, 4 }
0x23d0   :  { %v4585_v3 = vrot.slane %v8353_v28, 3 }
0x23d2   :  { %v4586_v46 = vsel %vm8689_vm4, %v4585_v3, %v4584_v13 }
0x23d3   :  { %4587 = vrot.lane.b32.xlu1 %v4586_v46, %s7175_s4 }
0x23df   :  { %v4535_v19 = vpop.permute.xlu1 %4534 }
0x23e0   :  { %v4540_v60 = vadd.f32 %v4535_v19, %v8126_v45  ;;  %v4537_v42 = vpop.permute.xlu0 %4536 }
0x23e1   :  { %v4541_v41 = vadd.f32 %v4537_v42, %v8130_v62 }
0x23e2   :  { %6841 = vtanh.f32 %v4540_v60 }
0x23e3   :  { %6843 = vtanh.f32 %v4541_v41 }
0x23e4   :  { %6845 = vpow2.f32 %v5660_v33 }
0x23e5   :  { %6847 = vpow2.f32 %v5661_v52 }
0x23ec   :  { %v6842_v47 = vpop.eup %6841 }
0x23ed   :  { %4548 = vrot.lane.b32.xlu0 %v6842_v47, %s7175_s4  ;;  %v6844_v44 = vpop.eup %6843 }
0x23ee   :  { %4550 = vrot.lane.b32.xlu1 %v6844_v44, %s7175_s4  ;;  %v6846_v35 = vpop.eup %6845 }
0x23ef   :  { %v6848_v2 = vpop.eup %6847  ;;  %v4514_v54 = vadd.f32 1.0, %v6846_v35 }
0x23f0   :  { %v4515_v17 = vadd.f32 1.0, %v6848_v2 }
0x23f1   :  { %6849 = vrcp.f32 %v4514_v54 }
0x23f2   :  { %6851 = vrcp.f32 %v4515_v17 }
0x23fb   :  { %v6850_v56 = vpop.eup %6849 }
0x23fc   :  { %v6852_v37 = vpop.eup %6851  ;;  %v4544_v18 = vsub.f32 1.0, %v6850_v56  ;;  %v4560_v51 = vmul.f32 %v6850_v56, %v4556_v39 }
0x23fd   :  { %v4545_v14 = vsub.f32 1.0, %v6852_v37  ;;  %v4561_v49 = vmul.f32 %v6852_v37, %v4557_v12 }
0x2445   :  { %v4588_v10 = vpop.permute.xlu1 %4587 }
0x2446   :  { %6149 = vmatmul.mubr.msk.f32.vlgmr.msra.gmra.mrb[30].mxu0 %vm8690_vm3, %v4588_v10 }
0x2447   :  { %6396 = vmatpush3.bf16.msra.mxu0 %v7937_v22  ;;  %6170 = vmatprep.mubr.msk.f32.mxu0 %vm7173_vm2, %v7171_v0 }
0x2448   :  { %6397 = vmatprep.subr.bf16.mxu0 %v7172_v9 }
0x244b   :  { %6399 = vmatpush3.bf16.msra.mxu0 %v7949_v58 }
0x244c   :  { %6406 = vmatprep.subr.bf16.mxu0 %v7172_v9 }
0x245f   :  { %v4549_v29 = vpop.permute.xlu0 %4548 }
0x2460   :  { %v4554_v32 = vmul.f32 %v4549_v29, %v4544_v18  ;;  %v4551_v26 = vpop.permute.xlu1 %4550 }
0x2461   :  { %v4555_v40 = vmul.f32 %v4551_v26, %v4545_v14 }
0x2462   :  { %v8374_v43 = vadd.f32 %v4560_v51, %v4554_v32 }
0x2463   :  { %v8376_v57 = vadd.f32 %v4561_v49, %v4555_v40 }
0x2464   :  { %v4661_v38 = vrot.slane %v8374_v43, 3 }
0x2465   :  { %v4662_v20 = vrot.slane %v8376_v57, 2 }
0x2467   :  { %v4663_v13 = vsel %vm8689_vm4, %v4662_v20, %v4661_v38 }
0x2468   :  { %6160 = vmatmul.mubr.msk.f32.vlgmr.msra.gmra.mrb[32].mxu1 %vm8690_vm3, %v4663_v13 }
0x2469   :  { %6402 = vmatpush3.bf16.msra.mxu1 %v8007_v7  ;;  %6181 = vmatprep.mubr.msk.f32.mxu1 %vm7173_vm2, %v7171_v0 }
0x246a   :  { %6403 = vmatprep.subr.bf16.mxu1 %v7172_v9 }
0x246d   :  { %6405 = vmatpush3.bf16.msra.mxu1 %v8010_v31 }
0x246e   :  { %6412 = vmatprep.subr.bf16.mxu1 %v7172_v9 }
0x2519   :  { %v4657_v3 = vpop.f32.mrb[30].mxu0 }
0x251a   :  { %v4755_v46 = vadd.f32 %v4657_v3, %v8055_v63  ;;  %v6150_v19 = vpop.f32.mrb[31].mxu0  ;;  %v4737_v50 = vrot.slane %v4657_v3, 3  ;;  %v4738_v33 = vrot.slane %v4657_v3, 4 }
0x251c   :  { %v4757_v60 = vrot.slane %v4755_v46, 3  ;;  %v4758_v42 = vrot.slane %v4755_v46, 4  ;;  %v4741_v52 = vadd.f32 %v4737_v50, %v8074_v30  ;;  %v4742_v10 = vadd.f32 %v4738_v33, %v8079_v1 }
0x251e   :  { %4759 = vrot.lane.b32.xlu0 %v4757_v60, %s7174_s18  ;;  %4761 = vrot.lane.b32.xlu1 %v4758_v42, %s7174_s18  ;;  %v5664_v35 = vmul.f32 -1.442695, %v4741_v52  ;;  %v5665_v2 = vmul.f32 -1.442695, %v4742_v10 }
0x2520   :  { %6853 = vpow2.f32 %v5664_v35 }
0x2521   :  { %6855 = vpow2.f32 %v5665_v2 }
0x252a   :  { %v6854_v54 = vpop.eup %6853 }
0x252b   :  { %v6856_v17 = vpop.eup %6855  ;;  %v4749_v56 = vadd.f32 1.0, %v6854_v54 }
0x252c   :  { %v4750_v37 = vadd.f32 1.0, %v6856_v17 }
0x252d   :  { %6857 = vrcp.f32 %v4749_v56 }
0x252e   :  { %6859 = vrcp.f32 %v4750_v37 }
0x2537   :  { %v6858_v18 = vpop.eup %6857 }
0x2538   :  { %v6860_v39 = vpop.eup %6859 }
0x253b   :  { %v4732_v41 = vpop.f32.mrb[32].mxu1 }
0x253c   :  { %v4800_v47 = vrot.slane %v4732_v41, 6  ;;  %v4801_v44 = vrot.slane %v4732_v41, 7  ;;  %v6161_v23 = vpop.f32.mrb[33].mxu1  ;;  %v4836_v12 = vadd.f32 %v4732_v41, %v8098_v36 }
0x253e   :  { %4804 = vrot.lane.b32.xlu1 %v4801_v44, %s7175_s4  ;;  %4802 = vrot.lane.b32.xlu0 %v4800_v47, %s7175_s4  ;;  %v4838_v26 = vrot.slane %v4836_v12, 6  ;;  %v4839_v49 = vrot.slane %v4836_v12, 7 }
0x2590   :  { %v4762_v29 = vpop.permute.xlu1 %4761  ;;  %v4760_v14 = vpop.permute.xlu0 %4759 }
0x2591   :  { %v4766_v51 = vmul.f32 %v6860_v39, %v4762_v29  ;;  %v4765_v32 = vmul.f32 %v6858_v18, %v4760_v14 }
0x2593   :  { %4771 = vrot.lane.b32.xlu1 %v4766_v51, %s7174_s18  ;;  %4769 = vrot.lane.b32.xlu0 %v4765_v32, %s7174_s18  ;;  %v4780_v51 = vsub.f32 1.0, %v6860_v39  ;;  %v4792_v32 = vrot.slane %v8353_v28, 7 }
0x2597   :  { %4842 = vrot.lane.b32.xlu1 %v4839_v49, %s7176_s19  ;;  %4840 = vrot.lane.b32.xlu0 %v4838_v26, %s7176_s19  ;;  %v4779_v49 = vsub.f32 1.0, %v6858_v18 }
0x25b0   :  { %v4805_v40 = vpop.permute.xlu1 %4804  ;;  %v4803_v38 = vpop.permute.xlu0 %4802 }
0x25b1   :  { %v4809_v20 = vadd.f32 %v4805_v40, %v8079_v1  ;;  %v4808_v13 = vadd.f32 %v4803_v38, %v8074_v30 }
0x25b3   :  { %v5667_v3 = vmul.f32 -1.442695, %v4809_v20  ;;  %v5666_v46 = vmul.f32 -1.442695, %v4808_v13  ;;  %v4791_v20 = vrot.slane %v8351_v27, 7  ;;  %v4796_v13 = vmul.f32 %v6860_v39, %v4792_v32 }
0x25b5   :  { %6861 = vpow2.f32 %v5667_v3 }
0x25b6   :  { %6863 = vpow2.f32 %v5666_v46 }
0x25bf   :  { %v6862_v19 = vpop.eup %6861 }
0x25c0   :  { %v6864_v60 = vpop.eup %6863  ;;  %v4817_v42 = vadd.f32 1.0, %v6862_v19  ;;  %v4795_v19 = vmul.f32 %v6858_v18, %v4791_v20  ;;  %v4823_v18 = vadd.f32 %v4805_v40, %v8130_v62  ;;  %v4872_v40 = vrot.slane %v8374_v43, 1 }
0x25c1   :  { %v4816_v41 = vadd.f32 1.0, %v6864_v60 }
0x25c2   :  { %6865 = vrcp.f32 %v4817_v42 }
0x25c3   :  { %6867 = vrcp.f32 %v4816_v41 }
0x25cc   :  { %v6866_v33 = vpop.eup %6865 }
0x25cd   :  { %v6868_v52 = vpop.eup %6867 }
0x2605   :  { %v4772_v47 = vpop.permute.xlu1 %4771  ;;  %v4770_v44 = vpop.permute.xlu0 %4769 }
0x2606   :  { %v4776_v23 = vadd.f32 %v4772_v47, %v8079_v1  ;;  %v4775_v50 = vadd.f32 %v4770_v44, %v8074_v30 }
0x2608   :  { %6869 = vtanh.f32 %v4776_v23 }
0x2609   :  { %6871 = vtanh.f32 %v4775_v50  ;;  %v4843_v10 = vpop.permute.xlu1 %4842  ;;  %v4841_v35 = vpop.permute.xlu0 %4840 }
0x260a   :  { %v4847_v2 = vmul.f32 %v6866_v33, %v4843_v10  ;;  %v4846_v54 = vmul.f32 %v6868_v52, %v4841_v35  ;;  %v4822_v33 = vadd.f32 %v4803_v38, %v8126_v45  ;;  %v5669_v52 = vmul.f32 -1.442695, %v4823_v18 }
0x260c   :  { %4852 = vrot.lane.b32.xlu1 %v4847_v2, %s7174_s18  ;;  %4850 = vrot.lane.b32.xlu0 %v4846_v54, %s7174_s18  ;;  %v5668_v10 = vmul.f32 -1.442695, %v4822_v33 }
0x2612   :  { %v6870_v17 = vpop.eup %6869 }
0x2613   :  { %v6872_v56 = vpop.eup %6871  ;;  %4785 = vrot.lane.b32.xlu1 %v6870_v17, %s7175_s4 }
0x2614   :  { %4783 = vrot.lane.b32.xlu0 %v6872_v56, %s7175_s4 }
0x267e   :  { %v4853_v37 = vpop.permute.xlu1 %4852  ;;  %v4851_v29 = vpop.permute.xlu0 %4850 }
0x267f   :  { %v4857_v14 = vadd.f32 %v4853_v37, %v8130_v62  ;;  %v4856_v12 = vadd.f32 %v4851_v29, %v8126_v45 }
0x2681   :  { %6873 = vtanh.f32 %v4857_v14  ;;  %v4873_v14 = vrot.slane %v8376_v57, 1 }
0x2682   :  { %6875 = vtanh.f32 %v4856_v12 }
0x2683   :  { %6877 = vpow2.f32 %v5669_v52 }
0x2684   :  { %6879 = vpow2.f32 %v5668_v10 }
0x2685   :  { %v4786_v26 = vpop.permute.xlu1 %4785 }
0x2686   :  { %v4790_v3 = vmul.f32 %v4786_v26, %v4780_v51  ;;  %v4784_v46 = vpop.permute.xlu0 %4783 }
0x2687   :  { %v4789_v60 = vmul.f32 %v4784_v46, %v4779_v49 }
0x2688   :  { %v8412_v42 = vadd.f32 %v4796_v13, %v4790_v3 }
0x2689   :  { %v8414_v41 = vadd.f32 %v4795_v19, %v4789_v60 }
0x268a   :  { %v4901_v23 = vrot.slane %v8412_v42, 4 }
0x268b   :  { %v6874_v47 = vpop.eup %6873  ;;  %v4900_v50 = vrot.slane %v8414_v41, 5 }
0x268c   :  { %v6876_v44 = vpop.eup %6875  ;;  %4866 = vrot.lane.b32.xlu1 %v6874_v47, %s7175_s4 }
0x268d   :  { %4864 = vrot.lane.b32.xlu0 %v6876_v44, %s7175_s4  ;;  %v4902_v39 = vsel %vm8689_vm4, %v4901_v23, %v4900_v50  ;;  %v6878_v35 = vpop.eup %6877 }
0x268e   :  { %v6880_v2 = vpop.eup %6879  ;;  %v4831_v54 = vadd.f32 1.0, %v6878_v35 }
0x268f   :  { %v4830_v17 = vadd.f32 1.0, %v6880_v2 }
0x2690   :  { %6881 = vrcp.f32 %v4831_v54 }
0x2691   :  { %4903 = vrot.lane.b32.xlu0 %v4902_v39, %s7175_s4  ;;  %6883 = vrcp.f32 %v4830_v17 }
0x269a   :  { %v6882_v56 = vpop.eup %6881 }
0x269b   :  { %v6884_v37 = vpop.eup %6883  ;;  %v4861_v29 = vsub.f32 1.0, %v6882_v56  ;;  %v4877_v38 = vmul.f32 %v6882_v56, %v4873_v14 }
0x269c   :  { %v4860_v51 = vsub.f32 1.0, %v6884_v37  ;;  %v4876_v49 = vmul.f32 %v6884_v37, %v4872_v40 }
0x26fe   :  { %v4867_v12 = vpop.permute.xlu1 %4866 }
0x26ff   :  { %v4871_v32 = vmul.f32 %v4867_v12, %v4861_v29  ;;  %v4865_v26 = vpop.permute.xlu0 %4864 }
0x2700   :  { %v4870_v20 = vmul.f32 %v4865_v26, %v4860_v51 }
0x2701   :  { %v8426_v13 = vadd.f32 %v4877_v38, %v4871_v32 }
0x2702   :  { %v8428_v3 = vadd.f32 %v4876_v49, %v4870_v20 }
0x2703   :  { %v4978_v46 = vrot.slane %v8426_v13, 1  ;;  %v4904_v19 = vpop.permute.xlu0 %4903 }
0x2704   :  { %v4977_v60 = vrot.slane %v8428_v3, 2  ;;  %6171 = vmatmul.mubr.msk.f32.vlgmr.msra.gmra.mrb[32].mxu0 %vm8690_vm3, %v4904_v19 }
0x2705   :  { %6408 = vmatpush3.bf16.msra.mxu0 %v7937_v22  ;;  %6192 = vmatprep.mubr.msk.f32.mxu0 %vm7173_vm2, %v7171_v0 }
0x2706   :  { %v4979_v47 = vsel %vm8689_vm4, %v4978_v46, %v4977_v60  ;;  %6409 = vmatprep.subr.bf16.mxu0 %v7172_v9 }
0x2707   :  { %6182 = vmatmul.mubr.msk.f32.vlgmr.msra.gmra.mrb[34].mxu1 %vm8691_vm5, %v4979_v47 }
0x2708   :  { %6414 = vmatpush3.bf16.msra.mxu1 %v8007_v7  ;;  %6203 = vmatprep.mubr.msk.f32.mxu1 %vm7173_vm2, %v7171_v0  ;;  %vm8692_vm2 = vmmov %vm8689_vm4 }
0x2709   :  { %6415 = vmatprep.subr.bf16.mxu1 %v7172_v9  ;;  %6411 = vmatpush3.bf16.msra.mxu0 %v7949_v58  ;;  %vm8693_vm5 = vmmov %vm8692_vm2 }
0x270a   :  { %vm8694_vm4 = vmmov %vm8690_vm3 }
0x270c   :  { %6417 = vmatpush3.bf16.msra.mxu1 %v8010_v31 }
0x27d7   :  { %v4973_v22 = vpop.f32.mrb[32].mxu0 }
0x27d8   :  { %v5071_v44 = vadd.f32 %v4973_v22, %v8055_v63  ;;  %v6172_v23 = vpop.f32.mrb[33].mxu0  ;;  %v5053_v58 = vrot.slane %v4973_v22, 2  ;;  %v5054_v31 = vrot.slane %v4973_v22, 3 }
0x27da   :  { %v5073_v50 = vrot.slane %v5071_v44, 2  ;;  %v5074_v39 = vrot.slane %v5071_v44, 3  ;;  %v5048_v18 = vpop.f32.mrb[34].mxu1  ;;  %v5057_v52 = vadd.f32 %v5053_v58, %v8074_v30  ;;  %v5058_v10 = vadd.f32 %v5054_v31, %v8079_v1 }
0x27db   :  { %v6183_v33 = vpop.f32.mrb[35].mxu1  ;;  %v5116_v7 = vrot.slane %v5048_v18, 7  ;;  %v5151_v0 = vadd.f32 %v5048_v18, %v8098_v36 }
0x27dc   :  { %5077 = vrot.lane.b32.xlu0 %v5074_v39, %s7174_s18  ;;  %5075 = vrot.lane.b32.xlu1 %v5073_v50, %s7174_s18  ;;  %v5672_v35 = vmul.f32 -1.442695, %v5057_v52  ;;  %v5673_v2 = vmul.f32 -1.442695, %v5058_v10 }
0x27dd   :  { %v5153_v9 = vrot.slane %v5151_v0, 7 }
0x27de   :  { %6885 = vpow2.f32 %v5672_v35 }
0x27df   :  { %6887 = vpow2.f32 %v5673_v2 }
0x27e0   :  { %5119 = vrot.lane.b32.xlu0 %v5048_v18, %s7175_s4  ;;  %5117 = vrot.lane.b32.xlu1 %v5116_v7, %s7175_s4 }
0x27e4   :  { %5156 = vrot.lane.b32.xlu0 %v5151_v0, %s7176_s19  ;;  %5154 = vrot.lane.b32.xlu1 %v5153_v9, %s7176_s19 }
0x27e8   :  { %v6886_v54 = vpop.eup %6885 }
0x27e9   :  { %v6888_v17 = vpop.eup %6887  ;;  %v5065_v56 = vadd.f32 1.0, %v6886_v54 }
0x27ea   :  { %v5066_v37 = vadd.f32 1.0, %v6888_v17 }
0x27eb   :  { %6889 = vrcp.f32 %v5065_v56 }
0x27ec   :  { %6891 = vrcp.f32 %v5066_v37 }
0x27f5   :  { %v8457_v29 = vpop.eup %6889 }
0x27f6   :  { %v6892_v14 = vpop.eup %6891 }
0x284e   :  { %v5078_v12 = vpop.permute.xlu0 %5077  ;;  %v5076_v51 = vpop.permute.xlu1 %5075 }
0x284f   :  { %v5082_v40 = vmul.f32 %v6892_v14, %v5078_v12  ;;  %v5081_v38 = vmul.f32 %v8457_v29, %v5076_v51 }
0x2851   :  { %5087 = vrot.lane.b32.xlu0 %v5082_v40, %s7174_s18  ;;  %5085 = vrot.lane.b32.xlu1 %v5081_v38, %s7174_s18 }
0x2852   :  { %v5120_v32 = vpop.permute.xlu0 %5119  ;;  %v5118_v26 = vpop.permute.xlu1 %5117 }
0x2853   :  { %v5124_v49 = vadd.f32 %v5120_v32, %v8079_v1  ;;  %v5123_v20 = vadd.f32 %v5118_v26, %v8074_v30  ;;  %v5138_v51 = vadd.f32 %v5120_v32, %v8130_v62  ;;  %v5137_v40 = vadd.f32 %v5118_v26, %v8126_v45 }
0x2855   :  { %v5675_v19 = vmul.f32 -1.442695, %v5124_v49  ;;  %v5674_v60 = vmul.f32 -1.442695, %v5123_v20  ;;  %v5677_v38 = vmul.f32 -1.442695, %v5138_v51 }
0x2856   :  { %v5157_v39 = vpop.permute.xlu0 %5156  ;;  %v5155_v7 = vpop.permute.xlu1 %5154  ;;  %v5676_v49 = vmul.f32 -1.442695, %v5137_v40  ;;  %v5096_v20 = vsub.f32 1.0, %v6892_v14 }
0x2857   :  { %6893 = vpow2.f32 %v5675_v19  ;;  %v5108_v19 = vrot.slane %v8412_v42, 7 }
0x2858   :  { %6895 = vpow2.f32 %v5674_v60 }
0x2861   :  { %v6894_v47 = vpop.eup %6893 }
0x2862   :  { %v5132_v22 = vadd.f32 1.0, %v6894_v47  ;;  %v6896_v44 = vpop.eup %6895  ;;  %v5095_v47 = vsub.f32 1.0, %v8457_v29 }
0x2863   :  { %v5131_v23 = vadd.f32 1.0, %v6896_v44  ;;  %v5112_v44 = vmul.f32 %v6892_v14, %v5108_v19 }
0x2864   :  { %6897 = vrcp.f32 %v5132_v22  ;;  %v5107_v22 = vrot.slane %v8414_v41, 7 }
0x2865   :  { %6899 = vrcp.f32 %v5131_v23 }
0x286e   :  { %v6898_v50 = vpop.eup %6897 }
0x286f   :  { %v5161_v18 = vmul.f32 %v6898_v50, %v5157_v39  ;;  %v6900_v33 = vpop.eup %6899  ;;  %v5111_v39 = vmul.f32 %v8457_v29, %v5107_v22 }
0x2870   :  { %v5160_v0 = vmul.f32 %v6900_v33, %v5155_v7 }
0x2871   :  { %5166 = vrot.lane.b32.xlu0 %v5161_v18, %s7174_s18 }
0x2872   :  { %5164 = vrot.lane.b32.xlu1 %v5160_v0, %s7174_s18 }
0x28c3   :  { %v5088_v9 = vpop.permute.xlu0 %5087  ;;  %v5086_v58 = vpop.permute.xlu1 %5085 }
0x28c4   :  { %v5092_v31 = vadd.f32 %v5088_v9, %v8079_v1  ;;  %v5091_v52 = vadd.f32 %v5086_v58, %v8074_v30 }
0x28c6   :  { %6901 = vtanh.f32 %v5092_v31 }
0x28c7   :  { %6903 = vtanh.f32 %v5091_v52 }
0x28d0   :  { %v6902_v10 = vpop.eup %6901 }
0x28d1   :  { %v6904_v35 = vpop.eup %6903  ;;  %5101 = vrot.lane.b32.xlu0 %v6902_v10, %s7175_s4 }
0x28d2   :  { %5099 = vrot.lane.b32.xlu1 %v6904_v35, %s7175_s4 }
0x28e3   :  { %v5167_v2 = vpop.permute.xlu0 %5166 }
0x28e4   :  { %v5171_v54 = vadd.f32 %v5167_v2, %v8130_v62  ;;  %v5165_v17 = vpop.permute.xlu1 %5164 }
0x28e5   :  { %v5170_v56 = vadd.f32 %v5165_v17, %v8126_v45 }
0x28e6   :  { %6905 = vtanh.f32 %v5171_v54  ;;  %v5186_v54 = vrot.slane %v8428_v3, 1 }
0x28e7   :  { %6907 = vtanh.f32 %v5170_v56 }
0x28e8   :  { %6909 = vpow2.f32 %v5677_v38 }
0x28e9   :  { %6911 = vpow2.f32 %v5676_v49 }
0x28f0   :  { %v6906_v37 = vpop.eup %6905 }
0x28f1   :  { %5180 = vrot.lane.b32.xlu0 %v6906_v37, %s7175_s4  ;;  %v6908_v12 = vpop.eup %6907 }
0x28f2   :  { %5178 = vrot.lane.b32.xlu1 %v6908_v12, %s7175_s4  ;;  %v6910_v14 = vpop.eup %6909 }
0x28f3   :  { %v6912_v9 = vpop.eup %6911  ;;  %v5146_v58 = vadd.f32 1.0, %v6910_v14 }
0x28f4   :  { %v5145_v31 = vadd.f32 1.0, %v6912_v9 }
0x28f5   :  { %6913 = vrcp.f32 %v5146_v58 }
0x28f6   :  { %6915 = vrcp.f32 %v5145_v31 }
0x28ff   :  { %v6914_v29 = vpop.eup %6913 }
0x2900   :  { %v6916_v52 = vpop.eup %6915  ;;  %v5175_v35 = vsub.f32 1.0, %v6914_v29  ;;  %v5190_v51 = vmul.f32 %v6914_v29, %v4978_v46 }
0x2901   :  { %v5174_v2 = vsub.f32 1.0, %v6916_v52  ;;  %v5189_v37 = vmul.f32 %v6916_v52, %v5186_v54 }
0x2943   :  { %v5102_v60 = vpop.permute.xlu0 %5101 }
0x2944   :  { %v5106_v23 = vmul.f32 %v5102_v60, %v5096_v20  ;;  %v5100_v50 = vpop.permute.xlu1 %5099 }
0x2945   :  { %v5105_v18 = vmul.f32 %v5100_v50, %v5095_v47 }
0x2946   :  { %v8480_v32 = vadd.f32 %v5112_v44, %v5106_v23 }
0x2947   :  { %v8482_v26 = vadd.f32 %v5111_v39, %v5105_v18 }
0x2948   :  { %v5214_v33 = vrot.slane %v8480_v32, 5 }
0x2949   :  { %v5213_v7 = vrot.slane %v8482_v26, 6 }
0x294b   :  { %v5215_v0 = vsel %vm8692_vm2, %v5214_v33, %v5213_v7 }
0x294c   :  { %5216 = vrot.lane.b32.xlu1 %v5215_v0, %s7175_s4 }
0x2963   :  { %v5181_v10 = vpop.permute.xlu0 %5180 }
0x2964   :  { %v5179_v17 = vpop.permute.xlu1 %5178  ;;  %v5185_v56 = vmul.f32 %v5181_v10, %v5175_v35 }
0x2965   :  { %v5184_v12 = vmul.f32 %v5179_v17, %v5174_v2 }
0x2966   :  { %v8493_v38 = vadd.f32 %v5190_v51, %v5185_v56 }
0x2967   :  { %v8491_v40 = vadd.f32 %v5189_v37, %v5184_v12 }
0x2969   :  { %v5290_v49 = vrot.slane %v8491_v40, 1 }
0x296b   :  { %v5291_v20 = vsel %vm8693_vm5, %v8493_v38, %v5290_v49 }
0x296c   :  { %6204 = vmatmul.mubr.msk.f32.vlgmr.msra.gmra.mrb[36].mxu1 %vm8690_vm3, %v5291_v20 }
0x29be   :  { %v5217_v19 = vpop.permute.xlu1 %5216 }
0x29bf   :  { %6193 = vmatmul.mubr.msk.f32.vlgmr.msra.gmra.mrb[34].mxu0 %vm8694_vm4, %v5217_v19 }
0x2a3f   :  { %v5360_v60 = vpop.f32.mrb[36].mxu1 }
0x2a40   :  { %v5428_v47 = vrot.slane %v5360_v60, 1  ;;  %5429 = vrot.lane.b32.xlu0 %v5360_v60, %s7175_s4  ;;  %v6205_v46 = vpop.f32.mrb[37].mxu1  ;;  %v5463_v50 = vadd.f32 %v5360_v60, %v8098_v36 }
0x2a42   :  { %5431 = vrot.lane.b32.xlu1 %v5428_v47, %s7175_s4  ;;  %v5465_v33 = vrot.slane %v5463_v50, 1 }
0x2a92   :  { %v5286_v22 = vpop.f32.mrb[34].mxu0 }
0x2a93   :  { %v5383_v44 = vadd.f32 %v5286_v22, %v8055_v63  ;;  %v6194_v23 = vpop.f32.mrb[35].mxu0  ;;  %v5365_v7 = vrot.slane %v5286_v22, 1  ;;  %v5366_v0 = vrot.slane %v5286_v22, 2 }
0x2a95   :  { %v5385_v39 = vrot.slane %v5383_v44, 1  ;;  %v5386_v18 = vrot.slane %v5383_v44, 2  ;;  %v5369_v14 = vadd.f32 %v5365_v7, %v8074_v30  ;;  %v5370_v63 = vadd.f32 %v5366_v0, %v8079_v1 }
0x2a97   :  { %5389 = vrot.lane.b32.xlu1 %v5386_v18, %s7174_s18  ;;  %5387 = vrot.lane.b32.xlu0 %v5385_v39, %s7174_s18  ;;  %v5680_v58 = vmul.f32 -1.442695, %v5369_v14  ;;  %v5681_v29 = vmul.f32 -1.442695, %v5370_v63 }
0x2a99   :  { %6917 = vpow2.f32 %v5680_v58 }
0x2a9a   :  { %6919 = vpow2.f32 %v5681_v29 }
0x2a9b   :  { %5468 = vrot.lane.b32.xlu1 %v5465_v33, %s7176_s19  ;;  %5466 = vrot.lane.b32.xlu0 %v5463_v50, %s7176_s19 }
0x2aa3   :  { %v6918_v2 = vpop.eup %6917 }
0x2aa4   :  { %v6920_v54 = vpop.eup %6919  ;;  %v5377_v17 = vadd.f32 1.0, %v6918_v2 }
0x2aa5   :  { %v5378_v37 = vadd.f32 1.0, %v6920_v54 }
0x2ab2   :  { %v8512_v9 = vpop.permute.xlu0 %5429 }
0x2ab3   :  { %v5435_v31 = vadd.f32 %v8512_v9, %v8074_v30 }
0x2ab4   :  { %v8514_v36 = vpop.permute.xlu1 %5431 }
0x2ab5   :  { %v5436_v52 = vadd.f32 %v8514_v36, %v8079_v1  ;;  %v5682_v10 = vmul.f32 -1.442695, %v5435_v31 }
0x2ab7   :  { %v5683_v35 = vmul.f32 -1.442695, %v5436_v52  ;;  %6921 = vpow2.f32 %v5682_v10 }
0x2ab9   :  { %6923 = vpow2.f32 %v5683_v35 }
0x2aba   :  { %6925 = vrcp.f32 %v5377_v17 }
0x2abb   :  { %6927 = vrcp.f32 %v5378_v37 }
0x2ac1   :  { %v6922_v56 = vpop.eup %6921 }
0x2ac2   :  { %v5443_v51 = vadd.f32 1.0, %v6922_v56 }
0x2ac3   :  { %v6924_v12 = vpop.eup %6923 }
0x2ac4   :  { %v5444_v20 = vadd.f32 1.0, %v6924_v12  ;;  %6929 = vrcp.f32 %v5443_v51  ;;  %v8520_v19 = vpop.eup %6925 }
0x2ac5   :  { %v8522_v60 = vpop.eup %6927 }
0x2ac6   :  { %6931 = vrcp.f32 %v5444_v20 }
0x2ace   :  { %v6930_v23 = vpop.eup %6929 }
0x2ad0   :  { %v6932_v50 = vpop.eup %6931 }
0x2b09   :  { %v5390_v47 = vpop.permute.xlu1 %5389  ;;  %v5388_v46 = vpop.permute.xlu0 %5387 }
0x2b0a   :  { %v5394_v22 = vmul.f32 %v8522_v60, %v5390_v47  ;;  %v5393_v44 = vmul.f32 %v8520_v19, %v5388_v46 }
0x2b0c   :  { %5399 = vrot.lane.b32.xlu1 %v5394_v22, %s7174_s18  ;;  %5397 = vrot.lane.b32.xlu0 %v5393_v44, %s7174_s18 }
0x2b0d   :  { %v5469_v39 = vpop.permute.xlu1 %5468  ;;  %v5467_v18 = vpop.permute.xlu0 %5466 }
0x2b0e   :  { %v5473_v33 = vmul.f32 %v6932_v50, %v5469_v39  ;;  %v5472_v7 = vmul.f32 %v6930_v23, %v5467_v18 }
0x2b10   :  { %5478 = vrot.lane.b32.xlu1 %v5473_v33, %s7174_s18  ;;  %5476 = vrot.lane.b32.xlu0 %v5472_v7, %s7174_s18 }
0x2b7e   :  { %v5400_v0 = vpop.permute.xlu1 %5399  ;;  %v5398_v14 = vpop.permute.xlu0 %5397 }
0x2b7f   :  { %v5404_v52 = vadd.f32 %v5400_v0, %v8079_v1  ;;  %v5403_v10 = vadd.f32 %v5398_v14, %v8074_v30  ;;  %v5450_v30 = vadd.f32 %v8514_v36, %v8130_v62  ;;  %v5449_v1 = vadd.f32 %v8512_v9, %v8126_v45 }
0x2b82   :  { %v5479_v63 = vpop.permute.xlu1 %5478  ;;  %v5477_v58 = vpop.permute.xlu0 %5476 }
0x2b83   :  { %v5483_v31 = vadd.f32 %v5479_v63, %v8130_v62  ;;  %v5482_v29 = vadd.f32 %v5477_v58, %v8126_v45  ;;  %v5420_v62 = vrot.slane %v8480_v32, 7  ;;  %v5407_v45 = vsub.f32 1.0, %v8520_v19 }
0x2b85   :  { %6933 = vtanh.f32 %v5483_v31 }
0x2b86   :  { %6935 = vtanh.f32 %v5482_v29 }
0x2b87   :  { %6937 = vtanh.f32 %v5404_v52 }
0x2b88   :  { %6939 = vtanh.f32 %v5403_v10 }
0x2b8f   :  { %v6934_v35 = vpop.eup %6933 }
0x2b90   :  { %v6936_v2 = vpop.eup %6935  ;;  %5492 = vrot.lane.b32.xlu1 %v6934_v35, %s7175_s4 }
0x2b91   :  { %5490 = vrot.lane.b32.xlu0 %v6936_v2, %s7175_s4  ;;  %v6938_v54 = vpop.eup %6937 }
0x2b92   :  { %v6940_v17 = vpop.eup %6939 }
0x2b94   :  { %5413 = vrot.lane.b32.xlu1 %v6938_v54, %s7175_s4 }
0x2b95   :  { %5411 = vrot.lane.b32.xlu0 %v6940_v17, %s7175_s4 }
0x2b98   :  { %3309 = vrot.lane.b32.xlu1 %v8096_v5, %s7175_s4  ;;  %v5685_v5 = vmul.f32 -1.442695, %v5450_v30 }
0x2b99   :  { %3307 = vrot.lane.b32.xlu0 %v8100_v25, %s7175_s4  ;;  %v5684_v25 = vmul.f32 -1.442695, %v5449_v1 }
0x2b9a   :  { %6941 = vpow2.f32 %v5685_v5 }
0x2b9b   :  { %6943 = vpow2.f32 %v5684_v25 }
0x2b9c   :  { %3319 = vrot.lane.b32.xlu1 %v8142_v24, %s7176_s19 }
0x2b9d   :  { %3317 = vrot.lane.b32.xlu0 %v8140_v4, %s7176_s19 }
0x2ba0   :  { %3621 = vrot.lane.b32.xlu1 %v8172_v21, %s7175_s4 }
0x2ba1   :  { %3619 = vrot.lane.b32.xlu0 %v8170_v55, %s7175_s4 }
0x2ba4   :  { %3631 = vrot.lane.b32.xlu1 %v8197_v53, %s7176_s19  ;;  %v6942_v4 = vpop.eup %6941 }
0x2ba5   :  { %3629 = vrot.lane.b32.xlu0 %v8199_v59, %s7176_s19  ;;  %v6944_v24 = vpop.eup %6943  ;;  %v5458_v55 = vadd.f32 1.0, %v6942_v4 }
0x2ba6   :  { %v5457_v21 = vadd.f32 1.0, %v6944_v24 }
0x2ba7   :  { %6945 = vrcp.f32 %v5458_v55 }
0x2ba8   :  { %3936 = vrot.lane.b32.xlu1 %v8231_v11, %s7175_s4  ;;  %6947 = vrcp.f32 %v5457_v21 }
0x2ba9   :  { %3934 = vrot.lane.b32.xlu0 %v8229_v48, %s7175_s4 }
0x2bac   :  { %3946 = vrot.lane.b32.xlu1 %v8258_v16, %s7176_s19 }
0x2bad   :  { %3944 = vrot.lane.b32.xlu0 %v8256_v34, %s7176_s19  ;;  %v5408_v34 = vsub.f32 1.0, %v8522_v60 }
0x2bb0   :  { %4252 = vrot.lane.b32.xlu1 %v8292_v15, %s7175_s4  ;;  %v5419_v15 = vrot.slane %v8482_v26, 7 }
0x2bb1   :  { %4250 = vrot.lane.b32.xlu0 %v8294_v61, %s7175_s4  ;;  %v6946_v48 = vpop.eup %6945 }
0x2bb2   :  { %v6948_v11 = vpop.eup %6947  ;;  %v5487_v61 = vsub.f32 1.0, %v6946_v48 }
0x2bb3   :  { %v5501_v56 = vmul.f32 %v6948_v11, %v5290_v49 }
0x2bb4   :  { %4262 = vrot.lane.b32.xlu1 %v8315_v8, %s7176_s19  ;;  %v5424_v8 = vmul.f32 %v8522_v60, %v5420_v62 }
0x2bb5   :  { %4260 = vrot.lane.b32.xlu0 %v8317_v6, %s7176_s19 }
0x2bb8   :  { %4568 = vrot.lane.b32.xlu1 %v8353_v28, %s7175_s4  ;;  %v5486_v28 = vsub.f32 1.0, %v6948_v11 }
0x2bb9   :  { %4566 = vrot.lane.b32.xlu0 %v8351_v27, %s7175_s4 }
0x2bbc   :  { %4578 = vrot.lane.b32.xlu1 %v8376_v57, %s7176_s19 }
0x2bbd   :  { %4576 = vrot.lane.b32.xlu0 %v8374_v43, %s7176_s19  ;;  %v5423_v43 = vmul.f32 %v8520_v19, %v5419_v15 }
0x2bc0   :  { %4884 = vrot.lane.b32.xlu1 %v8412_v42, %s7175_s4  ;;  %v5498_v42 = vrot.slane %v8493_v38, 1 }
0x2bc1   :  { %4882 = vrot.lane.b32.xlu0 %v8414_v41, %s7175_s4 }
0x2bc2   :  { %v5502_v36 = vmul.f32 %v6946_v48, %v5498_v42 }
0x2bc4   :  { %4894 = vrot.lane.b32.xlu1 %v8426_v13, %s7176_s19 }
0x2bc5   :  { %4892 = vrot.lane.b32.xlu0 %v8428_v3, %s7176_s19 }
0x2bc8   :  { %5197 = vrot.lane.b32.xlu1 %v8480_v32, %s7175_s4 }
0x2bc9   :  { %5195 = vrot.lane.b32.xlu0 %v8482_v26, %s7175_s4 }
0x2bcc   :  { %5207 = vrot.lane.b32.xlu1 %v8493_v38, %s7176_s19 }
0x2bcd   :  { %5205 = vrot.lane.b32.xlu0 %v8491_v40, %s7176_s19 }
0x2c02   :  { %v5493_v53 = vpop.permute.xlu1 %5492 }
0x2c03   :  { %v5491_v59 = vpop.permute.xlu0 %5490  ;;  %v5497_v41 = vmul.f32 %v5493_v53, %v5487_v61 }
0x2c04   :  { %v5496_v3 = vmul.f32 %v5491_v59, %v5486_v28 }
0x2c05   :  { %v5504_v37 = vadd.f32 %v5502_v36, %v5497_v41 }
0x2c06   :  { %v5414_v16 = vpop.permute.xlu1 %5413  ;;  %v5503_v38 = vadd.f32 %v5501_v56, %v5496_v3 }
0x2c07   :  { %v5418_v6 = vmul.f32 %v5414_v16, %v5408_v34  ;;  %v5412_v27 = vpop.permute.xlu0 %5411 }
0x2c08   :  { %v5417_v57 = vmul.f32 %v5412_v27, %v5407_v45 }
0x2c09   :  { %v5426_v13 = vadd.f32 %v5424_v8, %v5418_v6 }
0x2c0a   :  { %v5425_v32 = vadd.f32 %v5423_v43, %v5417_v57  ;;  %v3310_v9 = vpop.permute.xlu1 %3309 }
0x2c0b   :  { %3314 = vst.msk [vmem:[#allocation2 + $0x8] sm:$0x1] %vm662_vm10, %v3310_v9  ;;  %v3308_v26 = vpop.permute.xlu0 %3307  ;;  %5509 = vrot.lane.b32.xlu1 %v5426_v13, %s7175_s4 }
0x2c0c   :  { %3313 = vst.msk [vmem:[#allocation2] sm:$0x1] %vm662_vm10, %v3308_v26  ;;  %5507 = vrot.lane.b32.xlu0 %v5425_v32, %s7175_s4  ;;  %vm8699_vm10 = vcmask 261127  }
0x2c0e   :  { %v3320_v12 = vpop.permute.xlu1 %3319 }
0x2c0f   :  { %3324 = vst.msk [vmem:[#allocation2 + $0x8] sm:$0x80] %vm673_vm6, %v3320_v12  ;;  %v3318_v51 = vpop.permute.xlu0 %3317  ;;  %5519 = vrot.lane.b32.xlu1 %v5504_v37, %s7176_s19 }
0x2c10   :  { %3323 = vst.msk [vmem:[#allocation2] sm:$0x80] %vm673_vm6, %v3318_v51  ;;  %5517 = vrot.lane.b32.xlu0 %v5503_v38, %s7176_s19  ;;  %vm8695_vm6 = vcmask 259077  }
0x2c12   :  { %v3622_v20 = vpop.permute.xlu1 %3621 }
0x2c13   :  { %3626 = vst.msk [vmem:[#allocation2 + $0x8] sm:$0x2] %vm977_vm11, %v3622_v20  ;;  %v3620_v40 = vpop.permute.xlu0 %3619 }
0x2c14   :  { %3625 = vst.msk [vmem:[#allocation2] sm:$0x2] %vm977_vm11, %v3620_v40  ;;  %vm8700_vm11 = vmmov %vm8699_vm10 }
0x2c16   :  { %v3632_v49 = vpop.permute.xlu1 %3631 }
0x2c17   :  { %3636 = vst.msk [vmem:[#allocation2 + $0x8] sm:$0x40] %vm988_vm7, %v3632_v49  ;;  %v3630_v19 = vpop.permute.xlu0 %3629 }
0x2c18   :  { %3635 = vst.msk [vmem:[#allocation2] sm:$0x40] %vm988_vm7, %v3630_v19  ;;  %vm8696_vm7 = vmmov %vm8695_vm6 }
0x2c1a   :  { %v3937_v60 = vpop.permute.xlu1 %3936 }
0x2c1b   :  { %3941 = vst.msk [vmem:[#allocation2 + $0x8] sm:$0x4] %vm1294_vm13, %v3937_v60  ;;  %v3935_v47 = vpop.permute.xlu0 %3934 }
0x2c1c   :  { %3940 = vst.msk [vmem:[#allocation2] sm:$0x4] %vm1294_vm13, %v3935_v47  ;;  %vm8701_vm13 = vcmask 516352  }
0x2c1e   :  { %v3947_v46 = vpop.permute.xlu1 %3946 }
0x2c1f   :  { %3951 = vst.msk [vmem:[#allocation2 + $0x8] sm:$0x20] %vm1305_vm8, %v3947_v46  ;;  %v3945_v22 = vpop.permute.xlu0 %3944 }
0x2c20   :  { %3950 = vst.msk [vmem:[#allocation2] sm:$0x20] %vm1305_vm8, %v3945_v22  ;;  %vm8697_vm8 = vcmask 260102  }
0x2c22   :  { %v4253_v44 = vpop.permute.xlu1 %4252 }
0x2c23   :  { %4257 = vst.msk [vmem:[#allocation2 + $0x8] sm:$0x8] %vm1612_vm15, %v4253_v44  ;;  %v4251_v23 = vpop.permute.xlu0 %4250 }
0x2c24   :  { %4256 = vst.msk [vmem:[#allocation2] sm:$0x8] %vm1612_vm15, %v4251_v23  ;;  %vm8703_vm15 = vcmask 523264  }
0x2c26   :  { %v4263_v50 = vpop.permute.xlu1 %4262 }
0x2c27   :  { %4267 = vst.msk [vmem:[#allocation2 + $0x8] sm:$0x10] %vm1623_vm9, %v4263_v50  ;;  %v4261_v39 = vpop.permute.xlu0 %4260 }
0x2c28   :  { %4266 = vst.msk [vmem:[#allocation2] sm:$0x10] %vm1623_vm9, %v4261_v39  ;;  %vm8698_vm9 = vmmov %vm8697_vm8 }
0x2c2a   :  { %v4569_v18 = vpop.permute.xlu1 %4568 }
0x2c2b   :  { %4573 = vst.msk [vmem:[#allocation2 + $0x8] sm:$0x10] %vm1930_vm1, %v4569_v18  ;;  %v4567_v33 = vpop.permute.xlu0 %4566 }
0x2c2c   :  { %4572 = vst.msk [vmem:[#allocation2] sm:$0x10] %vm1930_vm1, %v4567_v33 }
0x2c2e   :  { %v4579_v7 = vpop.permute.xlu1 %4578 }
0x2c2f   :  { %4583 = vst.msk [vmem:[#allocation2 + $0x8] sm:$0x8] %vm1941_vm0, %v4579_v7  ;;  %v4577_v0 = vpop.permute.xlu0 %4576 }
0x2c30   :  { %4582 = vst.msk [vmem:[#allocation2] sm:$0x8] %vm1941_vm0, %v4577_v0 }
0x2c32   :  { %v4885_v14 = vpop.permute.xlu1 %4884 }
0x2c33   :  { %4889 = vst.msk [vmem:[#allocation2 + $0x8] sm:$0x20] %vm8695_vm6, %v4885_v14  ;;  %v4883_v63 = vpop.permute.xlu0 %4882 }
0x2c34   :  { %4888 = vst.msk [vmem:[#allocation2] sm:$0x20] %vm8696_vm7, %v4883_v63 }
0x2c36   :  { %v4895_v58 = vpop.permute.xlu1 %4894 }
0x2c37   :  { %4899 = vst.msk [vmem:[#allocation2 + $0x8] sm:$0x4] %vm2259_vm14, %v4895_v58  ;;  %v4893_v31 = vpop.permute.xlu0 %4892 }
0x2c38   :  { %4898 = vst.msk [vmem:[#allocation2] sm:$0x4] %vm2259_vm14, %v4893_v31  ;;  %vm8702_vm14 = vmmov %vm8701_vm13 }
0x2c3a   :  { %v5198_v29 = vpop.permute.xlu1 %5197 }
0x2c3b   :  { %5202 = vst.msk [vmem:[#allocation2 + $0x8] sm:$0x40] %vm8697_vm8, %v5198_v29  ;;  %v5196_v52 = vpop.permute.xlu0 %5195 }
0x2c3c   :  { %5201 = vst.msk [vmem:[#allocation2] sm:$0x40] %vm8698_vm9, %v5196_v52 }
0x2c3e   :  { %v5208_v10 = vpop.permute.xlu1 %5207 }
0x2c3f   :  { %5212 = vst.msk [vmem:[#allocation2 + $0x8] sm:$0x2] %vm2574_vm12, %v5208_v10  ;;  %v5206_v35 = vpop.permute.xlu0 %5205 }
0x2c40   :  { %5211 = vst.msk [vmem:[#allocation2] sm:$0x2] %vm2574_vm12, %v5206_v35  ;;  %vm8704_vm12 = vmmov %vm8703_vm15 }
0x2c7d   :  { %v5510_v2 = vpop.permute.xlu1 %5509 }
0x2c7e   :  { %5514 = vst.msk [vmem:[#allocation2 + $0x8] sm:$0x80] %vm8699_vm10, %v5510_v2  ;;  %v5508_v54 = vpop.permute.xlu0 %5507 }
0x2c7f   :  { %5513 = vst.msk [vmem:[#allocation2] sm:$0x80] %vm8700_vm11, %v5508_v54 }
0x2c81   :  { %v5520_v17 = vpop.permute.xlu1 %5519 }
0x2c82   :  { %5524 = vst.msk [vmem:[#allocation2 + $0x8] sm:$0x1] %vm8701_vm13, %v5520_v17  ;;  %v5518_v30 = vpop.permute.xlu0 %5517 }
0x2c83   :  { %5523 = vst.msk [vmem:[#allocation2] sm:$0x1] %vm8702_vm14, %v5518_v30 }
0x2c89   :  { %v5526_v1 = vld [vmem:[#allocation2 + $0x8] sm:$0xff] }
0x2c8a   :  { %v5525_v5 = vld [vmem:[#allocation2] sm:$0xff]  ;;  %5528 = vst.msk [vmem:[#allocation17 + $0x8] sm:$0xff] %vm8703_vm15, %v5526_v1 }
0x2c8b   :  { %5527 = vst.msk [vmem:[#allocation17] sm:$0xff] %vm8704_vm12, %v5525_v5 }
0x2c8c   :  { %7136 = shalt.err (!%p7133_p12)
}
0x2c8d   :  { %s8705_s9 = sld [smem:[#allocation24_spill]] }
0x2c93   :  { %s7137_s21 = scalar_lea.hbm %s8705_s9, 256 }
0x2c94   :  { %p7138_p13 = scmp.ne.s32.totalorder %s8705_s9, %s7137_s21  ;;  %p7141_p0 = scmp.lt.u32.totalorder %s7137_s21, %s8705_s9 }
0x2c96   :  { %p7143_p1 = pnand %p7141_p0, %p7138_p13 }
0x2c98   :  { %7146 = shalt.err (!%p7143_p1)
}
0x2c99   :  { %5540 = dma.vmem_to_hbm [thread:$0]  %s5535_s30, 256, %s8705_s9, [#allocation5], %s7160_s28, %s7160_s28, %s7161_s29  }
0x2c9a   :  { %7157 = dma.done.wait [#allocation5], 256  }
0x2c9b   :  { %7158 = vsyncadd [#allocation5], 4294967040 }
0x2c9c   :  { %5544 = vsyncpa [#allocation4], 1 }
0x2c9d   :  { %5545 = vsyncpa [#allocation7], 1 }
0x2c9e   :  { %5546 = vsyncpa [#allocation10], 1 }
0x2c9f   :  { %5547 = vsyncpa [#allocation13], 1 }
0x2ca0   :  { %5548 = vsyncpa [#allocation16], 1 }
0x2ca1   :  { %5549 = vsyncpa [#allocation5], 1 }

</bundles_post_ra>
